<compile_context>
chip_gen: v7x
topology: tpu7x:2x2x1
jax: 0.10.0
libtpu: 0.0.40
codegen_flags: <defaults>
</compile_context>

<pallas_src>
import functools

import jax
import jax.numpy as jnp
from jax.experimental import pallas as pl
from jax.experimental.pallas import tpu as pltpu

BN_EPS = 1e-5
TARGET_PIX = 4096                  # output pixels per grid step (review: 4096-8192)
TILE_P = 4096                      # row tile for the fallback flattened-matmul path
VMEM_LIMIT = 32 * 1024 * 1024      # scoped VMEM budget, v7x-safe


def _round_up(x, m):
    return (x + m - 1) // m * m


def _compiler_params(rank):
    return pltpu.CompilerParams(dimension_semantics=("parallel",) * rank,
                                vmem_limit_bytes=VMEM_LIMIT)


def _bn_fold(bn):
    scale = bn["gamma"] / jnp.sqrt(bn["var"] + BN_EPS)
    shift = bn["beta"] - bn["mean"] * scale
    return scale, shift


def _pick_tile_h(ho, wo, target_pix=TARGET_PIX):
    t = max(1, min(ho, target_pix // max(wo, 1)))
    while ho % t:
        t -= 1
    return t


def _pick_tile_rows_head(h4, w4, target_pix=TARGET_PIX):
    t = min(h4, max(8, (target_pix // max(w4, 1)) // 8 * 8))
    while h4 % t:
        t -= 8
    return t


# ---------------------------------------------------------------------------
# 3x3 / stride-2 conv, "window" path: in-kernel patch construction.
# Input is zero-padded by 1 pixel and reshaped (free) so adjacent column pairs
# become channels: (N, H+2, Wo+1, 2*Cin).  Per grid step we load 2*tile_h
# padded rows plus a 2-row halo and build the (tile_h*Wo, 12*Cin) patch matrix
# in VMEM (3 row taps x [col pair wo, col pair wo+1]); weight rows are laid out
# to match with zeros on the unused 4th column of each pair.
# ---------------------------------------------------------------------------

_TAPS_WIN = [(0, 0), (0, 1), (1, 0), (1, 1), (2, 0), (2, 1),
             (0, 2), None, (1, 2), None, (2, 2), None]


def _conv_weight_win(w_oihw, bn):
    cout, cin = w_oihw.shape[0], w_oihw.shape[1]
    scale, shift = None, jnp.zeros((cout,), jnp.float32)
    if bn is not None:
        scale, shift = _bn_fold(bn)
    blocks = []
    for tap in _TAPS_WIN:
        if tap is None:
            blocks.append(jnp.zeros((cin, cout), jnp.float32))
        else:
            ky, kx = tap
            wt = w_oihw[:, :, ky, kx]
            if scale is not None:
                wt = wt * scale[:, None]          # fold BN scale into columns
            blocks.append(jnp.transpose(wt))
    return jnp.concatenate(blocks, axis=0), shift  # (12*Cin, Cout), (Cout,)


def _conv_win_kernel(*refs, tile_h, n_heads, relu):
    main_ref, halo_ref = refs[0], refs[1]
    w_refs = [refs[2 + 2 * j] for j in range(n_heads)]
    b_refs = [refs[3 + 2 * j] for j in range(n_heads)]
    o_refs = refs[2 + 2 * n_heads:]

    _, _, wo1, c2 = main_ref.shape
    wo = wo1 - 1
    cin = c2 // 2

    m = main_ref[0].reshape(tile_h, 2, wo1, c2)        # outer-dim split (free)
    r0 = m[:, 0]                                       # padded rows 2*ho   (dy=0)
    r1 = m[:, 1]                                       # padded rows 2*ho+1 (dy=1)
    halo_row = halo_ref[0, 0:1]                        # padded row 2*(i+1)*tile_h
    if tile_h > 1:
        r2 = jnp.concatenate([m[1:, 0], halo_row], axis=0)   # rows 2*ho+2 (dy=2)
    else:
        r2 = halo_row
    rr = jnp.concatenate([r0, r1, r2], axis=-1)        # (tile_h, Wo+1, 6*Cin)
    patch = jnp.concatenate([rr[:, :wo, :], rr[:, 1:, :]], axis=-1)
    flat = patch.reshape(tile_h * wo, 12 * cin)        # (pixels, K)

    for j in range(n_heads):
        acc = jnp.dot(flat, w_refs[j][...], preferred_element_type=jnp.float32)
        acc = acc + b_refs[j][...]
        if relu[j]:
            acc = jnp.maximum(acc, 0.0)
        o_refs[j][0] = acc.astype(o_refs[j].dtype)


def _conv_window(x, heads, couts, relus):
    n, h, w, cin = x.shape
    ho, wo = h // 2, w // 2
    wo1, c2, k = wo + 1, 2 * cin, 12 * cin
    tile_h = _pick_tile_h(ho, wo)
    n_tiles = ho // tile_h

    # TODO(synk): the 1-pixel zero border (jnp.pad) could move in-kernel with
    # masked edge loads to save this single XLA copy of the activation.
    xp = jnp.pad(x, ((0, 0), (1, 1), (1, 1), (0, 0)))
    xs = xp.reshape(n, h + 2, wo1, c2)                 # free W-pairing reshape

    in_specs = [
        pl.BlockSpec((1, 2 * tile_h, wo1, c2), lambda b, i: (b, i, 0, 0)),
        pl.BlockSpec((1, 2, wo1, c2), lambda b, i: (b, (i + 1) * tile_h, 0, 0)),
    ]
    args = [xs, xs]
    for hd in heads:
        wm, bias = _conv_weight_win(hd["w"], hd.get("bn"))
        cout = wm.shape[1]
        in_specs += [pl.BlockSpec((k, cout), lambda b, i: (0, 0)),
                     pl.BlockSpec((1, cout), lambda b, i: (0, 0))]
        args += [wm.astype(jnp.bfloat16),
                 bias.reshape(1, cout).astype(jnp.float32)]

    out_shape = [jax.ShapeDtypeStruct((n, ho * wo, c), jnp.bfloat16) for c in couts]
    out_specs = [pl.BlockSpec((1, tile_h * wo, c), lambda b, i: (b, i, 0))
                 for c in couts]

    kernel = functools.partial(_conv_win_kernel, tile_h=tile_h,
                               n_heads=len(heads), relu=relus)
    outs = pl.pallas_call(
        kernel,
        out_shape=out_shape,
        grid=(n, n_tiles),
        in_specs=in_specs,
        out_specs=out_specs,
        compiler_params=_compiler_params(2),
    )(*args)
    return [o.reshape(n, ho, wo, c) for o, c in zip(outs, couts)]


# ---------------------------------------------------------------------------
# Fallback path for tiny / non-8-aligned widths: XLA im2col + flattened matmul
# (multi-head, one launch).  Negligible traffic at these resolutions.
# ---------------------------------------------------------------------------

def _im2col_3x3_s2(x):
    n, h, w, c = x.shape
    ho, wo = h // 2, w // 2
    xp = jnp.pad(x, ((0, 0), (1, 1), (1, 1), (0, 0)))
    cols = []
    for dy in range(3):
        for dx in range(3):
            cols.append(xp[:, dy:dy + 2 * ho:2, dx:dx + 2 * wo:2, :])
    patches = jnp.stack(cols, axis=3)                  # (N, Ho, Wo, 9, C)
    return patches.reshape(n * ho * wo, 9 * c)


def _conv_weight_im2col(w_oihw, bn):
    cout = w_oihw.shape[0]
    scale, shift = None, jnp.zeros((cout,), jnp.float32)
    if bn is not None:
        scale, shift = _bn_fold(bn)
    wm = jnp.transpose(w_oihw, (2, 3, 1, 0)).reshape(-1, cout)
    if scale is not None:
        wm = wm * scale[None, :]
    return wm, shift


def _matmul_heads_kernel(*refs, n_heads, relu):
    x_ref = refs[0]
    w_refs = [refs[1 + 2 * j] for j in range(n_heads)]
    b_refs = [refs[2 + 2 * j] for j in range(n_heads)]
    o_refs = refs[1 + 2 * n_heads:]
    x = x_ref[...]
    for j in range(n_heads):
        acc = jnp.dot(x, w_refs[j][...], preferred_element_type=jnp.float32)
        acc = acc + b_refs[j][...]
        if relu[j]:
            acc = jnp.maximum(acc, 0.0)
        o_refs[j][...] = acc.astype(o_refs[j].dtype)


def _conv_im2col(x, heads, couts, relus):
    n, h, w, cin = x.shape
    ho, wo = h // 2, w // 2
    patches = _im2col_3x3_s2(x)
    p = patches.shape[0]
    pp = _round_up(p, 8)
    if pp != p:                                        # tail pad only (<= 7 rows)
        patches = jnp.pad(patches, ((0, pp - p), (0, 0)))
    k = patches.shape[1]
    tile = min(TILE_P, pp)

    in_specs = [pl.BlockSpec((tile, k), lambda i: (i, 0))]
    args = [patches]
    for hd in heads:
        wm, bias = _conv_weight_im2col(hd["w"], hd.get("bn"))
        cout = wm.shape[1]
        in_specs += [pl.BlockSpec((k, cout), lambda i: (0, 0)),
                     pl.BlockSpec((1, cout), lambda i: (0, 0))]
        args += [wm.astype(jnp.bfloat16),
                 bias.reshape(1, cout).astype(jnp.float32)]

    out_shape = [jax.ShapeDtypeStruct((pp, c), jnp.bfloat16) for c in couts]
    out_specs = [pl.BlockSpec((tile, c), lambda i: (i, 0)) for c in couts]
    kernel = functools.partial(_matmul_heads_kernel, n_heads=len(heads), relu=relus)
    outs = pl.pallas_call(
        kernel,
        out_shape=out_shape,
        grid=(pl.cdiv(pp, tile),),
        in_specs=in_specs,
        out_specs=out_specs,
        compiler_params=_compiler_params(1),
    )(*args)
    return [o[:p].reshape(n, ho, wo, c) for o, c in zip(outs, couts)]


def conv3x3_s2(x, heads):
    """3x3, stride-2, pad-1 conv with folded BN / ReLU; multi-head (shared input)."""
    x = x.astype(jnp.bfloat16)
    wo = x.shape[2] // 2
    couts = [hd["w"].shape[0] for hd in heads]
    relus = tuple(bool(hd.get("relu", False)) for hd in heads)
    if wo % 8 == 0:
        return _conv_window(x, heads, couts, relus)
    # TODO(synk): non-8-aligned output widths use the XLA-im2col matmul path.
    return _conv_im2col(x, heads, couts, relus)


# ---------------------------------------------------------------------------
# Head: fused nearest upsample (H axis in-kernel) + concat + 1x1 convs + sigmoid
# ---------------------------------------------------------------------------

def _up_rows(a, f):
    """Nearest upsample along the leading (row) axis of a (h, w, c) value."""
    if f == 1:
        return a
    h, w, c = a.shape
    return jnp.broadcast_to(a[:, None, :, :], (h, f, w, c)).reshape(h * f, w, c)


def _head_kernel(x0_ref, x1_ref, x2_ref, x3_ref, w1_ref, b1_ref, w2_ref, b2_ref,
                 o_ref):
    _, t, w4, c = x0_ref.shape
    a0 = x0_ref[0]
    a1 = _up_rows(x1_ref[0], 2)
    a2 = _up_rows(x2_ref[0], 4)
    a3 = _up_rows(x3_ref[0], 8)
    cat = jnp.concatenate([a0, a1, a2, a3], axis=-1)        # (t, W4, 4*c) in VMEM
    flat = cat.reshape(t * w4, 4 * c)
    h = jnp.dot(flat, w1_ref[...], preferred_element_type=jnp.float32) + b1_ref[...]
    h = jnp.maximum(h, 0.0)
    y = jnp.dot(h.astype(w2_ref.dtype), w2_ref[...],
                preferred_element_type=jnp.float32) + b2_ref[...]
    o_ref[0] = jax.nn.sigmoid(y).astype(o_ref.dtype)


def head_forward(x0, x1, x2, x3, params):
    n, h4, w4, c = x0.shape
    assert h4 % 8 == 0 and w4 % 8 == 0
    # TODO(synk): the W-direction nearest repeat of the coarse branches is a
    # small XLA op; the 8x larger H-direction repeat + 128-ch concat + both
    # 1x1 convs run in-kernel.
    x1w = jnp.repeat(x1, 2, axis=2)
    x2w = jnp.repeat(x2, 4, axis=2)
    x3w = jnp.repeat(x3, 8, axis=2)

    hs, hb = _bn_fold(params["head_bn1"])
    w1 = (jnp.transpose(params["head_conv1"][:, :, 0, 0]) * hs[None, :]).astype(jnp.bfloat16)
    w2 = jnp.transpose(params["head_conv2"][:, :, 0, 0]).astype(jnp.bfloat16)
    b1 = hb.reshape(1, -1).astype(jnp.float32)
    b2 = params["head_conv2_b"].reshape(1, -1).astype(jnp.float32)
    cc = 4 * c
    n_cls = w2.shape[1]

    t = _pick_tile_rows_head(h4, w4)
    out = pl.pallas_call(
        _head_kernel,
        out_shape=jax.ShapeDtypeStruct((n, h4 * w4, n_cls), jnp.float32),
        grid=(n, h4 // t),
        in_specs=[
            pl.BlockSpec((1, t, w4, c), lambda b, i: (b, i, 0, 0)),
            pl.BlockSpec((1, t // 2, w4, c), lambda b, i: (b, i, 0, 0)),
            pl.BlockSpec((1, t // 4, w4, c), lambda b, i: (b, i, 0, 0)),
            pl.BlockSpec((1, t // 8, w4, c), lambda b, i: (b, i, 0, 0)),
            pl.BlockSpec((cc, cc), lambda b, i: (0, 0)),
            pl.BlockSpec((1, cc), lambda b, i: (0, 0)),
            pl.BlockSpec((cc, n_cls), lambda b, i: (0, 0)),
            pl.BlockSpec((1, n_cls), lambda b, i: (0, 0)),
        ],
        out_specs=pl.BlockSpec((1, t * w4, n_cls), lambda b, i: (b, i, 0)),
        compiler_params=_compiler_params(2),
    )(x0, x1w, x2w, x3w, w1, b1, w2, b2)
    return out.reshape(n, h4, w4, n_cls)


# ---------------------------------------------------------------------------
# Full forward
# ---------------------------------------------------------------------------

def hrnet_forward(x_nchw, params):
    n, _, h, w = x_nchw.shape
    assert h % 32 == 0 and w % 32 == 0, "HRNet head requires /32-divisible input"
    x = jnp.transpose(x_nchw, (0, 2, 3, 1))                 # NCHW -> NHWC

    # ---- Stem ----
    (h1,) = conv3x3_s2(x, [dict(w=params["stem_conv1"], bn=params["stem_bn1"], relu=True)])
    (x0,) = conv3x3_s2(h1, [dict(w=params["stem_conv2"], bn=params["stem_bn2"], relu=True)])
    x1, d4a, d8a = conv3x3_s2(
        x0, [dict(w=params["down2"]), dict(w=params["down4a"]), dict(w=params["down8a"])])
    (x2,) = conv3x3_s2(d4a, [dict(w=params["down4b"])])
    (d8b,) = conv3x3_s2(d8a, [dict(w=params["down8b"])])
    (x3,) = conv3x3_s2(d8b, [dict(w=params["down8c"])])

    # ---- Head (fused upsample + concat + 1x1 convs + sigmoid) ----
    out = head_forward(x0, x1, x2, x3, params)              # (N, H/4, W/4, 17) f32

    # up_final: transpose first, then the x4 nearest repeat (16x fewer bytes
    # go through the layout change).
    out = jnp.transpose(out, (0, 3, 1, 2))                  # NHWC -> NCHW at /4
    out = jnp.repeat(jnp.repeat(out, 4, axis=2), 4, axis=3)
    return out


# --------------------------- pure-JAX reference -----------------------------

def ref_forward(x, params):
    def conv(x, w, stride=2, pad=1):
        return jax.lax.conv_general_dilated(
            x, w, (stride, stride), ((pad, pad), (pad, pad)),
            dimension_numbers=("NCHW", "OIHW", "NCHW"))

    def bn(x, b):
        s, sh = _bn_fold(b)
        return x * s[None, :, None, None] + sh[None, :, None, None]

    up = lambda t, f: jnp.repeat(jnp.repeat(t, f, axis=2), f, axis=3)

    x = jnp.maximum(bn(conv(x, params["stem_conv1"]), params["stem_bn1"]), 0.0)
    x0 = jnp.maximum(bn(conv(x, params["stem_conv2"]), params["stem_bn2"]), 0.0)
    x1 = conv(x0, params["down2"])
    x2 = conv(conv(x0, params["down4a"]), params["down4b"])
    x3 = conv(conv(conv(x0, params["down8a"]), params["down8b"]), params["down8c"])
    cat = jnp.concatenate([x0, up(x1, 2), up(x2, 4), up(x3, 8)], axis=1)
    h = jnp.maximum(bn(conv(cat, params["head_conv1"], 1, 0), params["head_bn1"]), 0.0)
    o = conv(h, params["head_conv2"], 1, 0) + params["head_conv2_b"][None, :, None, None]
    return up(jax.nn.sigmoid(o), 4)


# ------------------------------ parameters ----------------------------------

def init_params(key):
    keys = jax.random.split(key, 14)

    def w(k, shape, scale=0.1):
        return scale * jax.random.normal(k, shape, jnp.float32)

    def bn(k, c):
        ks = jax.random.split(k, 4)
        return dict(
            gamma=1.0 + 0.1 * jax.random.normal(ks[0], (c,), jnp.float32),
            beta=0.1 * jax.random.normal(ks[1], (c,), jnp.float32),
            mean=0.1 * jax.random.normal(ks[2], (c,), jnp.float32),
            var=1.0 + 0.1 * jnp.abs(jax.random.normal(ks[3], (c,), jnp.float32)),
        )

    return dict(
        stem_conv1=w(keys[0], (32, 3, 3, 3)),
        stem_bn1=bn(keys[1], 32),
        stem_conv2=w(keys[2], (32, 32, 3, 3)),
        stem_bn2=bn(keys[3], 32),
        down2=w(keys[4], (32, 32, 3, 3)),
        down4a=w(keys[5], (32, 32, 3, 3)),
        down4b=w(keys[6], (32, 32, 3, 3)),
        down8a=w(keys[7], (32, 32, 3, 3)),
        down8b=w(keys[8], (32, 32, 3, 3)),
        down8c=w(keys[9], (32, 32, 3, 3)),
        head_conv1=w(keys[10], (128, 128, 1, 1)),
        head_bn1=bn(keys[11], 128),
        head_conv2=w(keys[12], (17, 128, 1, 1)),
        head_conv2_b=w(keys[13], (17,)),
    )


if __name__ == "__main__":
    key = jax.random.PRNGKey(0)
    kx, kp = jax.random.split(key)
    # NCHW input; spatial 32 so the deepest (/32) branch bottoms out at 1x1.
    x = jax.random.normal(kx, (2, 3, 32, 32), jnp.float32)
    params = init_params(kp)

    out = jax.jit(hrnet_forward)(x, params)
    out = jax.block_until_ready(out)
    assert out.shape == (2, 17, 32, 32), out.shape

    ref = ref_forward(x, params)
    max_err = float(jnp.max(jnp.abs(out - ref)))
    assert jnp.allclose(out, ref, atol=2e-2, rtol=2e-2), max_err
    print("KERNEL_OK")
</pallas_src>

<mosaic_0001>
module attributes {stable_mosaic.version = 11 : i64} {
  func.func @_conv_win_kernel(%arg0: i32, %arg1: i32, %arg2: memref<1x32x17x6xbf16, #tpu.memory_space<vmem>>, %arg3: memref<1x2x17x6xbf16, #tpu.memory_space<vmem>>, %arg4: memref<36x32xbf16, #tpu.memory_space<vmem>>, %arg5: memref<1x32xf32, #tpu.memory_space<vmem>>, %arg6: memref<1x256x32xbf16, #tpu.memory_space<vmem>>) attributes {dimension_semantics = [#tpu.dimension_semantics<parallel>, #tpu.dimension_semantics<parallel>], iteration_bounds = array<i64: 2, 1>, scalar_prefetch = 0 : i64, scratch_operands = 0 : i64, tpu.core_type = #tpu.core_type<tc>, window_params = [{transform_indices = @transform_0, window_bounds = array<i64: 1, 32, 17, 6>}, {transform_indices = @transform_1, window_bounds = array<i64: 1, 2, 17, 6>}, {pipeline_mode = #tpu.pipeline_mode<synchronous>, transform_indices = @transform_2, window_bounds = array<i64: 36, 32>}, {pipeline_mode = #tpu.pipeline_mode<synchronous>, transform_indices = @transform_3, window_bounds = array<i64: 1, 32>}, {transform_indices = @transform_4, window_bounds = array<i64: 1, 256, 32>}]} {
    %c0 = arith.constant 0 : index
    %c0_0 = arith.constant 0 : index
    %c0_1 = arith.constant 0 : index
    %c0_2 = arith.constant 0 : index
    %0 = vector.load %arg2[%c0, %c0_0, %c0_1, %c0_2] : memref<1x32x17x6xbf16, #tpu.memory_space<vmem>>, vector<1x32x17x6xbf16>
    %1 = vector.shape_cast %0 : vector<1x32x17x6xbf16> to vector<32x17x6xbf16>
    %2 = vector.shape_cast %1 : vector<32x17x6xbf16> to vector<16x2x17x6xbf16>
    %3 = vector.extract_strided_slice %2 {offsets = [0, 0, 0, 0], sizes = [16, 1, 17, 6], strides = [1, 1, 1, 1]} : vector<16x2x17x6xbf16> to vector<16x1x17x6xbf16>
    %4 = vector.shape_cast %3 : vector<16x1x17x6xbf16> to vector<16x17x6xbf16>
    %5 = vector.extract_strided_slice %2 {offsets = [0, 1, 0, 0], sizes = [16, 1, 17, 6], strides = [1, 1, 1, 1]} : vector<16x2x17x6xbf16> to vector<16x1x17x6xbf16>
    %6 = vector.shape_cast %5 : vector<16x1x17x6xbf16> to vector<16x17x6xbf16>
    %c0_3 = arith.constant 0 : index
    %c0_4 = arith.constant 0 : index
    %c0_5 = arith.constant 0 : index
    %c0_6 = arith.constant 0 : index
    %7 = vector.load %arg3[%c0_3, %c0_4, %c0_5, %c0_6] : memref<1x2x17x6xbf16, #tpu.memory_space<vmem>>, vector<1x1x17x6xbf16>
    %8 = vector.shape_cast %7 : vector<1x1x17x6xbf16> to vector<1x17x6xbf16>
    %9 = vector.extract_strided_slice %2 {offsets = [1, 0, 0, 0], sizes = [15, 1, 17, 6], strides = [1, 1, 1, 1]} : vector<16x2x17x6xbf16> to vector<15x1x17x6xbf16>
    %10 = vector.shape_cast %9 : vector<15x1x17x6xbf16> to vector<15x17x6xbf16>
    %11 = tpu.concatenate %10, %8 in 0 : vector<15x17x6xbf16>, vector<1x17x6xbf16> -> vector<16x17x6xbf16>
    %12 = tpu.concatenate %4, %6, %11 in 2 : vector<16x17x6xbf16>, vector<16x17x6xbf16>, vector<16x17x6xbf16> -> vector<16x17x18xbf16>
    %13 = vector.extract_strided_slice %12 {offsets = [0, 0, 0], sizes = [16, 16, 18], strides = [1, 1, 1]} : vector<16x17x18xbf16> to vector<16x16x18xbf16>
    %14 = vector.extract_strided_slice %12 {offsets = [0, 1, 0], sizes = [16, 16, 18], strides = [1, 1, 1]} : vector<16x17x18xbf16> to vector<16x16x18xbf16>
    %15 = tpu.concatenate %13, %14 in 2 : vector<16x16x18xbf16>, vector<16x16x18xbf16> -> vector<16x16x36xbf16>
    %16 = vector.shape_cast %15 : vector<16x16x36xbf16> to vector<256x36xbf16>
    %c0_7 = arith.constant 0 : index
    %c0_8 = arith.constant 0 : index
    %17 = vector.load %arg4[%c0_7, %c0_8] : memref<36x32xbf16, #tpu.memory_space<vmem>>, vector<36x32xbf16>
    %cst = arith.constant dense<0.000000e+00> : vector<256x32xf32>
    %18 = tpu.matmul %16, %17, %cst {dimension_numbers = #tpu.dot_dimension_numbers<[1], [0], [0], [1], [0, 0, 1, 1], [], []>} : vector<256x36xbf16>, vector<36x32xbf16>, vector<256x32xf32> -> vector<256x32xf32>
    %c0_9 = arith.constant 0 : index
    %c0_10 = arith.constant 0 : index
    %19 = vector.load %arg5[%c0_9, %c0_10] : memref<1x32xf32, #tpu.memory_space<vmem>>, vector<1x32xf32>
    %20 = vector.broadcast %19 : vector<1x32xf32> to vector<256x32xf32>
    %21 = arith.addf %18, %20 : vector<256x32xf32>
    %cst_11 = arith.constant 0.000000e+00 : f32
    %22 = vector.broadcast %cst_11 : f32 to vector<256x32xf32>
    %23 = arith.maximumf %21, %22 : vector<256x32xf32>
    %24 = arith.truncf %23 : vector<256x32xf32> to vector<256x32xbf16>
    %c0_12 = arith.constant 0 : index
    %c0_13 = arith.constant 0 : index
    %c0_14 = arith.constant 0 : index
    %25 = vector.load %arg6[%c0_12, %c0_13, %c0_14] : memref<1x256x32xbf16, #tpu.memory_space<vmem>>, vector<1x256x32xbf16>
    %26 = vector.shape_cast %25 : vector<1x256x32xbf16> to vector<256x32xbf16>
    %27 = vector.shape_cast %24 : vector<256x32xbf16> to vector<1x256x32xbf16>
    tpu.vector_store %arg6[%c0_12, %c0_13, %c0_14], %27 {strides = array<i32>} : memref<1x256x32xbf16, #tpu.memory_space<vmem>>, vector<1x256x32xbf16>,
    return
  }
  func.func @transform_0(%arg0: i32, %arg1: i32) -> (i32, i32, i32, i32) {
    %c0_i32 = arith.constant 0 : i32
    %c0_i32_0 = arith.constant 0 : i32
    %c0_i32_1 = arith.constant 0 : i32
    return %arg0, %arg1, %c0_i32, %c0_i32_0 : i32, i32, i32, i32
  }
  func.func @transform_1(%arg0: i32, %arg1: i32) -> (i32, i32, i32, i32) {
    %c1_i32 = arith.constant 1 : i32
    %0 = arith.addi %arg1, %c1_i32 : i32
    %c16_i32 = arith.constant 16 : i32
    %1 = arith.muli %0, %c16_i32 : i32
    %c0_i32 = arith.constant 0 : i32
    %c0_i32_0 = arith.constant 0 : i32
    %c0_i32_1 = arith.constant 0 : i32
    return %arg0, %1, %c0_i32, %c0_i32_0 : i32, i32, i32, i32
  }
  func.func @transform_2(%arg0: i32, %arg1: i32) -> (i32, i32) {
    %c0_i32 = arith.constant 0 : i32
    %c0_i32_0 = arith.constant 0 : i32
    %c0_i32_1 = arith.constant 0 : i32
    return %c0_i32, %c0_i32_0 : i32, i32
  }
  func.func @transform_3(%arg0: i32, %arg1: i32) -> (i32, i32) {
    %c0_i32 = arith.constant 0 : i32
    %c0_i32_0 = arith.constant 0 : i32
    %c0_i32_1 = arith.constant 0 : i32
    return %c0_i32, %c0_i32_0 : i32, i32
  }
  func.func @transform_4(%arg0: i32, %arg1: i32) -> (i32, i32, i32) {
    %c0_i32 = arith.constant 0 : i32
    %c0_i32_0 = arith.constant 0 : i32
    return %arg0, %arg1, %c0_i32 : i32, i32, i32
  }
}

module attributes {stable_mosaic.version = 11 : i64} {
  func.func @_conv_win_kernel(%arg0: i32, %arg1: i32, %arg2: memref<1x16x9x64xbf16, #tpu.memory_space<vmem>>, %arg3: memref<1x2x9x64xbf16, #tpu.memory_space<vmem>>, %arg4: memref<384x32xbf16, #tpu.memory_space<vmem>>, %arg5: memref<1x32xf32, #tpu.memory_space<vmem>>, %arg6: memref<1x64x32xbf16, #tpu.memory_space<vmem>>) attributes {dimension_semantics = [#tpu.dimension_semantics<parallel>, #tpu.dimension_semantics<parallel>], iteration_bounds = array<i64: 2, 1>, scalar_prefetch = 0 : i64, scratch_operands = 0 : i64, tpu.core_type = #tpu.core_type<tc>, window_params = [{transform_indices = @transform_0, window_bounds = array<i64: 1, 16, 9, 64>}, {transform_indices = @transform_1, window_bounds = array<i64: 1, 2, 9, 64>}, {pipeline_mode = #tpu.pipeline_mode<synchronous>, transform_indices = @transform_2, window_bounds = array<i64: 384, 32>}, {pipeline_mode = #tpu.pipeline_mode<synchronous>, transform_indices = @transform_3, window_bounds = array<i64: 1, 32>}, {transform_indices = @transform_4, window_bounds = array<i64: 1, 64, 32>}]} {
    %c0 = arith.constant 0 : index
    %c0_0 = arith.constant 0 : index
    %c0_1 = arith.constant 0 : index
    %c0_2 = arith.constant 0 : index
    %0 = vector.load %arg2[%c0, %c0_0, %c0_1, %c0_2] : memref<1x16x9x64xbf16, #tpu.memory_space<vmem>>, vector<1x16x9x64xbf16>
    %1 = vector.shape_cast %0 : vector<1x16x9x64xbf16> to vector<16x9x64xbf16>
    %2 = vector.shape_cast %1 : vector<16x9x64xbf16> to vector<8x2x9x64xbf16>
    %3 = vector.extract_strided_slice %2 {offsets = [0, 0, 0, 0], sizes = [8, 1, 9, 64], strides = [1, 1, 1, 1]} : vector<8x2x9x64xbf16> to vector<8x1x9x64xbf16>
    %4 = vector.shape_cast %3 : vector<8x1x9x64xbf16> to vector<8x9x64xbf16>
    %5 = vector.extract_strided_slice %2 {offsets = [0, 1, 0, 0], sizes = [8, 1, 9, 64], strides = [1, 1, 1, 1]} : vector<8x2x9x64xbf16> to vector<8x1x9x64xbf16>
    %6 = vector.shape_cast %5 : vector<8x1x9x64xbf16> to vector<8x9x64xbf16>
    %c0_3 = arith.constant 0 : index
    %c0_4 = arith.constant 0 : index
    %c0_5 = arith.constant 0 : index
    %c0_6 = arith.constant 0 : index
    %7 = vector.load %arg3[%c0_3, %c0_4, %c0_5, %c0_6] : memref<1x2x9x64xbf16, #tpu.memory_space<vmem>>, vector<1x1x9x64xbf16>
    %8 = vector.shape_cast %7 : vector<1x1x9x64xbf16> to vector<1x9x64xbf16>
    %9 = vector.extract_strided_slice %2 {offsets = [1, 0, 0, 0], sizes = [7, 1, 9, 64], strides = [1, 1, 1, 1]} : vector<8x2x9x64xbf16> to vector<7x1x9x64xbf16>
    %10 = vector.shape_cast %9 : vector<7x1x9x64xbf16> to vector<7x9x64xbf16>
    %11 = tpu.concatenate %10, %8 in 0 : vector<7x9x64xbf16>, vector<1x9x64xbf16> -> vector<8x9x64xbf16>
    %12 = tpu.concatenate %4, %6, %11 in 2 : vector<8x9x64xbf16>, vector<8x9x64xbf16>, vector<8x9x64xbf16> -> vector<8x9x192xbf16>
    %13 = vector.extract_strided_slice %12 {offsets = [0, 0, 0], sizes = [8, 8, 192], strides = [1, 1, 1]} : vector<8x9x192xbf16> to vector<8x8x192xbf16>
    %14 = vector.extract_strided_slice %12 {offsets = [0, 1, 0], sizes = [8, 8, 192], strides = [1, 1, 1]} : vector<8x9x192xbf16> to vector<8x8x192xbf16>
    %15 = tpu.concatenate %13, %14 in 2 : vector<8x8x192xbf16>, vector<8x8x192xbf16> -> vector<8x8x384xbf16>
    %16 = vector.shape_cast %15 : vector<8x8x384xbf16> to vector<64x384xbf16>
    %c0_7 = arith.constant 0 : index
    %c0_8 = arith.constant 0 : index
    %17 = vector.load %arg4[%c0_7, %c0_8] : memref<384x32xbf16, #tpu.memory_space<vmem>>, vector<384x32xbf16>
    %cst = arith.constant dense<0.000000e+00> : vector<64x32xf32>
    %18 = tpu.matmul %16, %17, %cst {dimension_numbers = #tpu.dot_dimension_numbers<[1], [0], [0], [1], [0, 0, 1, 1], [], []>} : vector<64x384xbf16>, vector<384x32xbf16>, vector<64x32xf32> -> vector<64x32xf32>
    %c0_9 = arith.constant 0 : index
    %c0_10 = arith.constant 0 : index
    %19 = vector.load %arg5[%c0_9, %c0_10] : memref<1x32xf32, #tpu.memory_space<vmem>>, vector<1x32xf32>
    %20 = vector.broadcast %19 : vector<1x32xf32> to vector<64x32xf32>
    %21 = arith.addf %18, %20 : vector<64x32xf32>
    %cst_11 = arith.constant 0.000000e+00 : f32
    %22 = vector.broadcast %cst_11 : f32 to vector<64x32xf32>
    %23 = arith.maximumf %21, %22 : vector<64x32xf32>
    %24 = arith.truncf %23 : vector<64x32xf32> to vector<64x32xbf16>
    %c0_12 = arith.constant 0 : index
    %c0_13 = arith.constant 0 : index
    %c0_14 = arith.constant 0 : index
    %25 = vector.load %arg6[%c0_12, %c0_13, %c0_14] : memref<1x64x32xbf16, #tpu.memory_space<vmem>>, vector<1x64x32xbf16>
    %26 = vector.shape_cast %25 : vector<1x64x32xbf16> to vector<64x32xbf16>
    %27 = vector.shape_cast %24 : vector<64x32xbf16> to vector<1x64x32xbf16>
    tpu.vector_store %arg6[%c0_12, %c0_13, %c0_14], %27 {strides = array<i32>} : memref<1x64x32xbf16, #tpu.memory_space<vmem>>, vector<1x64x32xbf16>,
    return
  }
  func.func @transform_0(%arg0: i32, %arg1: i32) -> (i32, i32, i32, i32) {
    %c0_i32 = arith.constant 0 : i32
    %c0_i32_0 = arith.constant 0 : i32
    %c0_i32_1 = arith.constant 0 : i32
    return %arg0, %arg1, %c0_i32, %c0_i32_0 : i32, i32, i32, i32
  }
  func.func @transform_1(%arg0: i32, %arg1: i32) -> (i32, i32, i32, i32) {
    %c1_i32 = arith.constant 1 : i32
    %0 = arith.addi %arg1, %c1_i32 : i32
    %c8_i32 = arith.constant 8 : i32
    %1 = arith.muli %0, %c8_i32 : i32
    %c0_i32 = arith.constant 0 : i32
    %c0_i32_0 = arith.constant 0 : i32
    %c0_i32_1 = arith.constant 0 : i32
    return %arg0, %1, %c0_i32, %c0_i32_0 : i32, i32, i32, i32
  }
  func.func @transform_2(%arg0: i32, %arg1: i32) -> (i32, i32) {
    %c0_i32 = arith.constant 0 : i32
    %c0_i32_0 = arith.constant 0 : i32
    %c0_i32_1 = arith.constant 0 : i32
    return %c0_i32, %c0_i32_0 : i32, i32
  }
  func.func @transform_3(%arg0: i32, %arg1: i32) -> (i32, i32) {
    %c0_i32 = arith.constant 0 : i32
    %c0_i32_0 = arith.constant 0 : i32
    %c0_i32_1 = arith.constant 0 : i32
    return %c0_i32, %c0_i32_0 : i32, i32
  }
  func.func @transform_4(%arg0: i32, %arg1: i32) -> (i32, i32, i32) {
    %c0_i32 = arith.constant 0 : i32
    %c0_i32_0 = arith.constant 0 : i32
    return %arg0, %arg1, %c0_i32 : i32, i32, i32
  }
}

module attributes {stable_mosaic.version = 11 : i64} {
  func.func @_matmul_heads_kernel(%arg0: i32, %arg1: memref<32x288xbf16, #tpu.memory_space<vmem>>, %arg2: memref<288x32xbf16, #tpu.memory_space<vmem>>, %arg3: memref<1x32xf32, #tpu.memory_space<vmem>>, %arg4: memref<288x32xbf16, #tpu.memory_space<vmem>>, %arg5: memref<1x32xf32, #tpu.memory_space<vmem>>, %arg6: memref<288x32xbf16, #tpu.memory_space<vmem>>, %arg7: memref<1x32xf32, #tpu.memory_space<vmem>>, %arg8: memref<32x32xbf16, #tpu.memory_space<vmem>>, %arg9: memref<32x32xbf16, #tpu.memory_space<vmem>>, %arg10: memref<32x32xbf16, #tpu.memory_space<vmem>>) attributes {dimension_semantics = [#tpu.dimension_semantics<parallel>], iteration_bounds = array<i64: 1>, scalar_prefetch = 0 : i64, scratch_operands = 0 : i64, tpu.core_type = #tpu.core_type<tc>, window_params = [{transform_indices = @transform_0, window_bounds = array<i64: 32, 288>}, {pipeline_mode = #tpu.pipeline_mode<synchronous>, transform_indices = @transform_1, window_bounds = array<i64: 288, 32>}, {pipeline_mode = #tpu.pipeline_mode<synchronous>, transform_indices = @transform_2, window_bounds = array<i64: 1, 32>}, {pipeline_mode = #tpu.pipeline_mode<synchronous>, transform_indices = @transform_3, window_bounds = array<i64: 288, 32>}, {pipeline_mode = #tpu.pipeline_mode<synchronous>, transform_indices = @transform_4, window_bounds = array<i64: 1, 32>}, {pipeline_mode = #tpu.pipeline_mode<synchronous>, transform_indices = @transform_5, window_bounds = array<i64: 288, 32>}, {pipeline_mode = #tpu.pipeline_mode<synchronous>, transform_indices = @transform_6, window_bounds = array<i64: 1, 32>}, {transform_indices = @transform_7, window_bounds = array<i64: 32, 32>}, {transform_indices = @transform_8, window_bounds = array<i64: 32, 32>}, {transform_indices = @transform_9, window_bounds = array<i64: 32, 32>}]} {
    %c0 = arith.constant 0 : index
    %c0_0 = arith.constant 0 : index
    %0 = vector.load %arg1[%c0, %c0_0] : memref<32x288xbf16, #tpu.memory_space<vmem>>, vector<32x288xbf16>
    %c0_1 = arith.constant 0 : index
    %c0_2 = arith.constant 0 : index
    %1 = vector.load %arg2[%c0_1, %c0_2] : memref<288x32xbf16, #tpu.memory_space<vmem>>, vector<288x32xbf16>
    %cst = arith.constant dense<0.000000e+00> : vector<32x32xf32>
    %2 = tpu.matmul %0, %1, %cst {dimension_numbers = #tpu.dot_dimension_numbers<[1], [0], [0], [1], [0, 0, 1, 1], [], []>} : vector<32x288xbf16>, vector<288x32xbf16>, vector<32x32xf32> -> vector<32x32xf32>
    %c0_3 = arith.constant 0 : index
    %c0_4 = arith.constant 0 : index
    %3 = vector.load %arg3[%c0_3, %c0_4] : memref<1x32xf32, #tpu.memory_space<vmem>>, vector<1x32xf32>
    %4 = vector.broadcast %3 : vector<1x32xf32> to vector<32x32xf32>
    %5 = arith.addf %2, %4 : vector<32x32xf32>
    %6 = arith.truncf %5 : vector<32x32xf32> to vector<32x32xbf16>
    %c0_5 = arith.constant 0 : index
    %c0_6 = arith.constant 0 : index
    %7 = vector.load %arg8[%c0_5, %c0_6] : memref<32x32xbf16, #tpu.memory_space<vmem>>, vector<32x32xbf16>
    tpu.vector_store %arg8[%c0_5, %c0_6], %6 {strides = array<i32>} : memref<32x32xbf16, #tpu.memory_space<vmem>>, vector<32x32xbf16>,
    %c0_7 = arith.constant 0 : index
    %c0_8 = arith.constant 0 : index
    %8 = vector.load %arg4[%c0_7, %c0_8] : memref<288x32xbf16, #tpu.memory_space<vmem>>, vector<288x32xbf16>
    %cst_9 = arith.constant dense<0.000000e+00> : vector<32x32xf32>
    %9 = tpu.matmul %0, %8, %cst_9 {dimension_numbers = #tpu.dot_dimension_numbers<[1], [0], [0], [1], [0, 0, 1, 1], [], []>} : vector<32x288xbf16>, vector<288x32xbf16>, vector<32x32xf32> -> vector<32x32xf32>
    %c0_10 = arith.constant 0 : index
    %c0_11 = arith.constant 0 : index
    %10 = vector.load %arg5[%c0_10, %c0_11] : memref<1x32xf32, #tpu.memory_space<vmem>>, vector<1x32xf32>
    %11 = vector.broadcast %10 : vector<1x32xf32> to vector<32x32xf32>
    %12 = arith.addf %9, %11 : vector<32x32xf32>
    %13 = arith.truncf %12 : vector<32x32xf32> to vector<32x32xbf16>
    %c0_12 = arith.constant 0 : index
    %c0_13 = arith.constant 0 : index
    %14 = vector.load %arg9[%c0_12, %c0_13] : memref<32x32xbf16, #tpu.memory_space<vmem>>, vector<32x32xbf16>
    tpu.vector_store %arg9[%c0_12, %c0_13], %13 {strides = array<i32>} : memref<32x32xbf16, #tpu.memory_space<vmem>>, vector<32x32xbf16>,
    %c0_14 = arith.constant 0 : index
    %c0_15 = arith.constant 0 : index
    %15 = vector.load %arg6[%c0_14, %c0_15] : memref<288x32xbf16, #tpu.memory_space<vmem>>, vector<288x32xbf16>
    %cst_16 = arith.constant dense<0.000000e+00> : vector<32x32xf32>
    %16 = tpu.matmul %0, %15, %cst_16 {dimension_numbers = #tpu.dot_dimension_numbers<[1], [0], [0], [1], [0, 0, 1, 1], [], []>} : vector<32x288xbf16>, vector<288x32xbf16>, vector<32x32xf32> -> vector<32x32xf32>
    %c0_17 = arith.constant 0 : index
    %c0_18 = arith.constant 0 : index
    %17 = vector.load %arg7[%c0_17, %c0_18] : memref<1x32xf32, #tpu.memory_space<vmem>>, vector<1x32xf32>
    %18 = vector.broadcast %17 : vector<1x32xf32> to vector<32x32xf32>
    %19 = arith.addf %16, %18 : vector<32x32xf32>
    %20 = arith.truncf %19 : vector<32x32xf32> to vector<32x32xbf16>
    %c0_19 = arith.constant 0 : index
    %c0_20 = arith.constant 0 : index
    %21 = vector.load %arg10[%c0_19, %c0_20] : memref<32x32xbf16, #tpu.memory_space<vmem>>, vector<32x32xbf16>
    tpu.vector_store %arg10[%c0_19, %c0_20], %20 {strides = array<i32>} : memref<32x32xbf16, #tpu.memory_space<vmem>>, vector<32x32xbf16>,
    return
  }
  func.func @transform_0(%arg0: i32) -> (i32, i32) {
    %c0_i32 = arith.constant 0 : i32
    %c0_i32_0 = arith.constant 0 : i32
    return %arg0, %c0_i32 : i32, i32
  }
  func.func @transform_1(%arg0: i32) -> (i32, i32) {
    %c0_i32 = arith.constant 0 : i32
    %c0_i32_0 = arith.constant 0 : i32
    %c0_i32_1 = arith.constant 0 : i32
    return %c0_i32, %c0_i32_0 : i32, i32
  }
  func.func @transform_2(%arg0: i32) -> (i32, i32) {
    %c0_i32 = arith.constant 0 : i32
    %c0_i32_0 = arith.constant 0 : i32
    %c0_i32_1 = arith.constant 0 : i32
    return %c0_i32, %c0_i32_0 : i32, i32
  }
  func.func @transform_3(%arg0: i32) -> (i32, i32) {
    %c0_i32 = arith.constant 0 : i32
    %c0_i32_0 = arith.constant 0 : i32
    %c0_i32_1 = arith.constant 0 : i32
    return %c0_i32, %c0_i32_0 : i32, i32
  }
  func.func @transform_4(%arg0: i32) -> (i32, i32) {
    %c0_i32 = arith.constant 0 : i32
    %c0_i32_0 = arith.constant 0 : i32
    %c0_i32_1 = arith.constant 0 : i32
    return %c0_i32, %c0_i32_0 : i32, i32
  }
  func.func @transform_5(%arg0: i32) -> (i32, i32) {
    %c0_i32 = arith.constant 0 : i32
    %c0_i32_0 = arith.constant 0 : i32
    %c0_i32_1 = arith.constant 0 : i32
    return %c0_i32, %c0_i32_0 : i32, i32
  }
  func.func @transform_6(%arg0: i32) -> (i32, i32) {
    %c0_i32 = arith.constant 0 : i32
    %c0_i32_0 = arith.constant 0 : i32
    %c0_i32_1 = arith.constant 0 : i32
    return %c0_i32, %c0_i32_0 : i32, i32
  }
  func.func @transform_7(%arg0: i32) -> (i32, i32) {
    %c0_i32 = arith.constant 0 : i32
    %c0_i32_0 = arith.constant 0 : i32
    return %arg0, %c0_i32 : i32, i32
  }
  func.func @transform_8(%arg0: i32) -> (i32, i32) {
    %c0_i32 = arith.constant 0 : i32
    %c0_i32_0 = arith.constant 0 : i32
    return %arg0, %c0_i32 : i32, i32
  }
  func.func @transform_9(%arg0: i32) -> (i32, i32) {
    %c0_i32 = arith.constant 0 : i32
    %c0_i32_0 = arith.constant 0 : i32
    return %arg0, %c0_i32 : i32, i32
  }
}

module attributes {stable_mosaic.version = 11 : i64} {
  func.func @_matmul_heads_kernel(%arg0: i32, %arg1: memref<8x288xbf16, #tpu.memory_space<vmem>>, %arg2: memref<288x32xbf16, #tpu.memory_space<vmem>>, %arg3: memref<1x32xf32, #tpu.memory_space<vmem>>, %arg4: memref<8x32xbf16, #tpu.memory_space<vmem>>) attributes {dimension_semantics = [#tpu.dimension_semantics<parallel>], iteration_bounds = array<i64: 1>, scalar_prefetch = 0 : i64, scratch_operands = 0 : i64, tpu.core_type = #tpu.core_type<tc>, window_params = [{transform_indices = @transform_0, window_bounds = array<i64: 8, 288>}, {pipeline_mode = #tpu.pipeline_mode<synchronous>, transform_indices = @transform_1, window_bounds = array<i64: 288, 32>}, {pipeline_mode = #tpu.pipeline_mode<synchronous>, transform_indices = @transform_2, window_bounds = array<i64: 1, 32>}, {transform_indices = @transform_3, window_bounds = array<i64: 8, 32>}]} {
    %c0 = arith.constant 0 : index
    %c0_0 = arith.constant 0 : index
    %0 = vector.load %arg1[%c0, %c0_0] : memref<8x288xbf16, #tpu.memory_space<vmem>>, vector<8x288xbf16>
    %c0_1 = arith.constant 0 : index
    %c0_2 = arith.constant 0 : index
    %1 = vector.load %arg2[%c0_1, %c0_2] : memref<288x32xbf16, #tpu.memory_space<vmem>>, vector<288x32xbf16>
    %cst = arith.constant dense<0.000000e+00> : vector<8x32xf32>
    %2 = tpu.matmul %0, %1, %cst {dimension_numbers = #tpu.dot_dimension_numbers<[1], [0], [0], [1], [0, 0, 1, 1], [], []>} : vector<8x288xbf16>, vector<288x32xbf16>, vector<8x32xf32> -> vector<8x32xf32>
    %c0_3 = arith.constant 0 : index
    %c0_4 = arith.constant 0 : index
    %3 = vector.load %arg3[%c0_3, %c0_4] : memref<1x32xf32, #tpu.memory_space<vmem>>, vector<1x32xf32>
    %4 = vector.broadcast %3 : vector<1x32xf32> to vector<8x32xf32>
    %5 = arith.addf %2, %4 : vector<8x32xf32>
    %6 = arith.truncf %5 : vector<8x32xf32> to vector<8x32xbf16>
    %c0_5 = arith.constant 0 : index
    %c0_6 = arith.constant 0 : index
    %7 = vector.load %arg4[%c0_5, %c0_6] : memref<8x32xbf16, #tpu.memory_space<vmem>>, vector<8x32xbf16>
    tpu.vector_store %arg4[%c0_5, %c0_6], %6 {strides = array<i32>} : memref<8x32xbf16, #tpu.memory_space<vmem>>, vector<8x32xbf16>,
    return
  }
  func.func @transform_0(%arg0: i32) -> (i32, i32) {
    %c0_i32 = arith.constant 0 : i32
    %c0_i32_0 = arith.constant 0 : i32
    return %arg0, %c0_i32 : i32, i32
  }
  func.func @transform_1(%arg0: i32) -> (i32, i32) {
    %c0_i32 = arith.constant 0 : i32
    %c0_i32_0 = arith.constant 0 : i32
    %c0_i32_1 = arith.constant 0 : i32
    return %c0_i32, %c0_i32_0 : i32, i32
  }
  func.func @transform_2(%arg0: i32) -> (i32, i32) {
    %c0_i32 = arith.constant 0 : i32
    %c0_i32_0 = arith.constant 0 : i32
    %c0_i32_1 = arith.constant 0 : i32
    return %c0_i32, %c0_i32_0 : i32, i32
  }
  func.func @transform_3(%arg0: i32) -> (i32, i32) {
    %c0_i32 = arith.constant 0 : i32
    %c0_i32_0 = arith.constant 0 : i32
    return %arg0, %c0_i32 : i32, i32
  }
}

module attributes {stable_mosaic.version = 11 : i64} {
  func.func @_head_kernel(%arg0: i32, %arg1: i32, %arg2: memref<1x8x8x32xbf16, #tpu.memory_space<vmem>>, %arg3: memref<1x4x8x32xbf16, #tpu.memory_space<vmem>>, %arg4: memref<1x2x8x32xbf16, #tpu.memory_space<vmem>>, %arg5: memref<1x1x8x32xbf16, #tpu.memory_space<vmem>>, %arg6: memref<128x128xbf16, #tpu.memory_space<vmem>>, %arg7: memref<1x128xf32, #tpu.memory_space<vmem>>, %arg8: memref<128x17xbf16, #tpu.memory_space<vmem>>, %arg9: memref<1x17xf32, #tpu.memory_space<vmem>>, %arg10: memref<1x64x17xf32, #tpu.memory_space<vmem>>) attributes {dimension_semantics = [#tpu.dimension_semantics<parallel>, #tpu.dimension_semantics<parallel>], iteration_bounds = array<i64: 2, 1>, scalar_prefetch = 0 : i64, scratch_operands = 0 : i64, tpu.core_type = #tpu.core_type<tc>, window_params = [{transform_indices = @transform_0, window_bounds = array<i64: 1, 8, 8, 32>}, {transform_indices = @transform_1, window_bounds = array<i64: 1, 4, 8, 32>}, {transform_indices = @transform_2, window_bounds = array<i64: 1, 2, 8, 32>}, {transform_indices = @transform_3, window_bounds = array<i64: 1, 1, 8, 32>}, {pipeline_mode = #tpu.pipeline_mode<synchronous>, transform_indices = @transform_4, window_bounds = array<i64: 128, 128>}, {pipeline_mode = #tpu.pipeline_mode<synchronous>, transform_indices = @transform_5, window_bounds = array<i64: 1, 128>}, {pipeline_mode = #tpu.pipeline_mode<synchronous>, transform_indices = @transform_6, window_bounds = array<i64: 128, 17>}, {pipeline_mode = #tpu.pipeline_mode<synchronous>, transform_indices = @transform_7, window_bounds = array<i64: 1, 17>}, {transform_indices = @transform_8, window_bounds = array<i64: 1, 64, 17>}]} {
    %c0 = arith.constant 0 : index
    %c0_0 = arith.constant 0 : index
    %c0_1 = arith.constant 0 : index
    %c0_2 = arith.constant 0 : index
    %0 = vector.load %arg2[%c0, %c0_0, %c0_1, %c0_2] : memref<1x8x8x32xbf16, #tpu.memory_space<vmem>>, vector<1x8x8x32xbf16>
    %1 = vector.shape_cast %0 : vector<1x8x8x32xbf16> to vector<8x8x32xbf16>
    %c0_3 = arith.constant 0 : index
    %c0_4 = arith.constant 0 : index
    %c0_5 = arith.constant 0 : index
    %c0_6 = arith.constant 0 : index
    %2 = vector.load %arg3[%c0_3, %c0_4, %c0_5, %c0_6] : memref<1x4x8x32xbf16, #tpu.memory_space<vmem>>, vector<1x4x8x32xbf16>
    %3 = vector.shape_cast %2 : vector<1x4x8x32xbf16> to vector<4x8x32xbf16>
    %4 = vector.shape_cast %3 : vector<4x8x32xbf16> to vector<4x1x8x32xbf16>
    %5 = vector.shape_cast %4 : vector<4x1x8x32xbf16> to vector<4x1x8x32xbf16>
    %6 = vector.broadcast %5 : vector<4x1x8x32xbf16> to vector<4x2x8x32xbf16>
    %7 = vector.shape_cast %6 : vector<4x2x8x32xbf16> to vector<8x8x32xbf16>
    %c0_7 = arith.constant 0 : index
    %c0_8 = arith.constant 0 : index
    %c0_9 = arith.constant 0 : index
    %c0_10 = arith.constant 0 : index
    %8 = vector.load %arg4[%c0_7, %c0_8, %c0_9, %c0_10] : memref<1x2x8x32xbf16, #tpu.memory_space<vmem>>, vector<1x2x8x32xbf16>
    %9 = vector.shape_cast %8 : vector<1x2x8x32xbf16> to vector<2x8x32xbf16>
    %10 = vector.shape_cast %9 : vector<2x8x32xbf16> to vector<2x1x8x32xbf16>
    %11 = vector.shape_cast %10 : vector<2x1x8x32xbf16> to vector<2x1x8x32xbf16>
    %12 = vector.broadcast %11 : vector<2x1x8x32xbf16> to vector<2x4x8x32xbf16>
    %13 = vector.shape_cast %12 : vector<2x4x8x32xbf16> to vector<8x8x32xbf16>
    %c0_11 = arith.constant 0 : index
    %c0_12 = arith.constant 0 : index
    %c0_13 = arith.constant 0 : index
    %c0_14 = arith.constant 0 : index
    %14 = vector.load %arg5[%c0_11, %c0_12, %c0_13, %c0_14] : memref<1x1x8x32xbf16, #tpu.memory_space<vmem>>, vector<1x1x8x32xbf16>
    %15 = vector.shape_cast %14 : vector<1x1x8x32xbf16> to vector<1x8x32xbf16>
    %16 = vector.shape_cast %15 : vector<1x8x32xbf16> to vector<1x1x8x32xbf16>
    %17 = vector.shape_cast %16 : vector<1x1x8x32xbf16> to vector<1x1x8x32xbf16>
    %18 = vector.broadcast %17 : vector<1x1x8x32xbf16> to vector<1x8x8x32xbf16>
    %19 = vector.shape_cast %18 : vector<1x8x8x32xbf16> to vector<8x8x32xbf16>
    %20 = tpu.concatenate %1, %7, %13, %19 in 2 : vector<8x8x32xbf16>, vector<8x8x32xbf16>, vector<8x8x32xbf16>, vector<8x8x32xbf16> -> vector<8x8x128xbf16>
    %21 = vector.shape_cast %20 : vector<8x8x128xbf16> to vector<64x128xbf16>
    %c0_15 = arith.constant 0 : index
    %c0_16 = arith.constant 0 : index
    %22 = vector.load %arg6[%c0_15, %c0_16] : memref<128x128xbf16, #tpu.memory_space<vmem>>, vector<128x128xbf16>
    %cst = arith.constant dense<0.000000e+00> : vector<64x128xf32>
    %23 = tpu.matmul %21, %22, %cst {dimension_numbers = #tpu.dot_dimension_numbers<[1], [0], [0], [1], [0, 0, 1, 1], [], []>} : vector<64x128xbf16>, vector<128x128xbf16>, vector<64x128xf32> -> vector<64x128xf32>
    %c0_17 = arith.constant 0 : index
    %c0_18 = arith.constant 0 : index
    %24 = vector.load %arg7[%c0_17, %c0_18] : memref<1x128xf32, #tpu.memory_space<vmem>>, vector<1x128xf32>
    %25 = vector.broadcast %24 : vector<1x128xf32> to vector<64x128xf32>
    %26 = arith.addf %23, %25 : vector<64x128xf32>
    %cst_19 = arith.constant 0.000000e+00 : f32
    %27 = vector.broadcast %cst_19 : f32 to vector<64x128xf32>
    %28 = arith.maximumf %26, %27 : vector<64x128xf32>
    %29 = arith.truncf %28 : vector<64x128xf32> to vector<64x128xbf16>
    %c0_20 = arith.constant 0 : index
    %c0_21 = arith.constant 0 : index
    %30 = vector.load %arg8[%c0_20, %c0_21] : memref<128x17xbf16, #tpu.memory_space<vmem>>, vector<128x17xbf16>
    %cst_22 = arith.constant dense<0.000000e+00> : vector<64x17xf32>
    %31 = tpu.matmul %29, %30, %cst_22 {dimension_numbers = #tpu.dot_dimension_numbers<[1], [0], [0], [1], [0, 0, 1, 1], [], []>} : vector<64x128xbf16>, vector<128x17xbf16>, vector<64x17xf32> -> vector<64x17xf32>
    %c0_23 = arith.constant 0 : index
    %c0_24 = arith.constant 0 : index
    %32 = vector.load %arg9[%c0_23, %c0_24] : memref<1x17xf32, #tpu.memory_space<vmem>>, vector<1x17xf32>
    %33 = vector.broadcast %32 : vector<1x17xf32> to vector<64x17xf32>
    %34 = arith.addf %31, %33 : vector<64x17xf32>
    %35 = arith.negf %34 : vector<64x17xf32>
    %36 = math.exp %35 : vector<64x17xf32>
    %cst_25 = arith.constant 1.000000e+00 : f32
    %37 = vector.broadcast %cst_25 : f32 to vector<64x17xf32>
    %38 = arith.addf %37, %36 : vector<64x17xf32>
    %39 = arith.divf %37, %38 : vector<64x17xf32>
    %c0_26 = arith.constant 0 : index
    %c0_27 = arith.constant 0 : index
    %c0_28 = arith.constant 0 : index
    %40 = vector.load %arg10[%c0_26, %c0_27, %c0_28] : memref<1x64x17xf32, #tpu.memory_space<vmem>>, vector<1x64x17xf32>
    %41 = vector.shape_cast %40 : vector<1x64x17xf32> to vector<64x17xf32>
    %42 = vector.shape_cast %39 : vector<64x17xf32> to vector<1x64x17xf32>
    tpu.vector_store %arg10[%c0_26, %c0_27, %c0_28], %42 {strides = array<i32>} : memref<1x64x17xf32, #tpu.memory_space<vmem>>, vector<1x64x17xf32>,
    return
  }
  func.func @transform_0(%arg0: i32, %arg1: i32) -> (i32, i32, i32, i32) {
    %c0_i32 = arith.constant 0 : i32
    %c0_i32_0 = arith.constant 0 : i32
    %c0_i32_1 = arith.constant 0 : i32
    return %arg0, %arg1, %c0_i32, %c0_i32_0 : i32, i32, i32, i32
  }
  func.func @transform_1(%arg0: i32, %arg1: i32) -> (i32, i32, i32, i32) {
    %c0_i32 = arith.constant 0 : i32
    %c0_i32_0 = arith.constant 0 : i32
    %c0_i32_1 = arith.constant 0 : i32
    return %arg0, %arg1, %c0_i32, %c0_i32_0 : i32, i32, i32, i32
  }
  func.func @transform_2(%arg0: i32, %arg1: i32) -> (i32, i32, i32, i32) {
    %c0_i32 = arith.constant 0 : i32
    %c0_i32_0 = arith.constant 0 : i32
    %c0_i32_1 = arith.constant 0 : i32
    return %arg0, %arg1, %c0_i32, %c0_i32_0 : i32, i32, i32, i32
  }
  func.func @transform_3(%arg0: i32, %arg1: i32) -> (i32, i32, i32, i32) {
    %c0_i32 = arith.constant 0 : i32
    %c0_i32_0 = arith.constant 0 : i32
    %c0_i32_1 = arith.constant 0 : i32
    return %arg0, %arg1, %c0_i32, %c0_i32_0 : i32, i32, i32, i32
  }
  func.func @transform_4(%arg0: i32, %arg1: i32) -> (i32, i32) {
    %c0_i32 = arith.constant 0 : i32
    %c0_i32_0 = arith.constant 0 : i32
    %c0_i32_1 = arith.constant 0 : i32
    return %c0_i32, %c0_i32_0 : i32, i32
  }
  func.func @transform_5(%arg0: i32, %arg1: i32) -> (i32, i32) {
    %c0_i32 = arith.constant 0 : i32
    %c0_i32_0 = arith.constant 0 : i32
    %c0_i32_1 = arith.constant 0 : i32
    return %c0_i32, %c0_i32_0 : i32, i32
  }
  func.func @transform_6(%arg0: i32, %arg1: i32) -> (i32, i32) {
    %c0_i32 = arith.constant 0 : i32
    %c0_i32_0 = arith.constant 0 : i32
    %c0_i32_1 = arith.constant 0 : i32
    return %c0_i32, %c0_i32_0 : i32, i32
  }
  func.func @transform_7(%arg0: i32, %arg1: i32) -> (i32, i32) {
    %c0_i32 = arith.constant 0 : i32
    %c0_i32_0 = arith.constant 0 : i32
    %c0_i32_1 = arith.constant 0 : i32
    return %c0_i32, %c0_i32_0 : i32, i32
  }
  func.func @transform_8(%arg0: i32, %arg1: i32) -> (i32, i32, i32) {
    %c0_i32 = arith.constant 0 : i32
    %c0_i32_0 = arith.constant 0 : i32
    return %arg0, %arg1, %c0_i32 : i32, i32, i32
  }
}

</mosaic_0001>

<bundles_post_ra>
// kernel: hrnet_forward.7
= control target key start
LH: loop header
LB: loop body
LE: loop exit
PB: predicated region body
PF: predicated region fallthrough
CT: control target
= control target key end

     0   :  { %s2107_s15 = smov 0   ;;  %s2109_s16 = smov 0   ;;  %s2717_s0 = inlined_call_operand.vmem [shape: bf16[2,34,17,6], index: 0, kind: input, shape index: {}, may-alias: {0,1}]   ;;  %s2718_s1 = inlined_call_operand.vmem [shape: bf16[2,34,17,6], index: 1, kind: input, shape index: {}, may-alias: {0,1}]   ;;  %s2719_s2 = inlined_call_operand.vmem [shape: bf16[36,32], index: 2, kind: input, shape index: {}]   ;;  %s2720_s3 = inlined_call_operand.vmem [shape: f32[1,32], index: 3, kind: input, shape index: {}]   ;;  %s2721_s4 = inlined_call_operand.vmem [shape: bf16[2,256,32], index: 4, kind: output, shape index: {}]  }
   0x1   :  { %s2111_s17 = smov 0  }
   0x2 LB: > { %s26_s18 = sadd.s32 1, %s2073_s16  ;;  %p1731_p0 = scmp.ge.s32.totalorder %s2077_s17, 1  ;;  %s2077_s17 = sphi %s2111_s17, %s14_s17   ;;  %s2073_s16 = sphi %s2109_s16, %s2723_s16   ;;  %s2069_s15 = sphi %s2107_s15, %s2722_s15  }
   0x3   : > { %p28_p1 = scmp.ge.s32.totalorder %s26_s18, 2  ;;  %p220_p2 = scmp.lt.s32.totalorder %s2077_s17, 3 }
   0x5   : > { %s2725_s18 = smov (%p28_p1, %s26_s18), 0  ;;  %p221_p3 = pnand %p1731_p0, %p220_p2 }
   0x6   : > { %p278_p4 = scmp.lt.s32.totalorder (!%p221_p3), %s2069_s15, 1  ;;  %s2079_s23 = smov (!%p221_p3), 6   ;;  %vm810_vm0 = vcmask (!%p221_p3), 48128   ;;  %vm907_vm1 = vcmask (!%p221_p3), 97280   ;;  %vm1258_vm2 = vcmask (!%p221_p3), 1041408   ;;  %vm1165_vm4 = vcmask (!%p221_p3), 146432  }
   0x7   : > { %224 = sbr.rel (%p221_p3) target bundleno = 602 (0x25a), region = 36  ;;  %s2080_s24 = smov (!%p221_p3), 12   ;;  %vm972_vm3 = vsmask.f32 (!%p221_p3), 7424  ;;  %vm1225_vm5 = vcmask (!%p221_p3), 293888   ;;  %vm1583_vm6 = vcmask (!%p221_p3), 257024  }
   0x8   : > { %s2081_s9 = smov (!%p221_p3), 18  }
   0xe   : > { %s2727_s15 = smov (!%p278_p4, %s2069_s15), 1 }
   0xf   : > { %s1956_s19 = smul.u32 408, %s2727_s15  ;;  %s1858_s12 = sshll.u32 %s2727_s15, 7 }
  0x10   : > { %s2615_s15 = scalar_lea.vmem %s2721_s4, %s1858_s12 }
  0x11   : > { %s2133_s22 = scalar_lea.vmem %s2717_s0, %s1956_s19  ;;  %s1857_s25 = sadd.s32 384, %s1956_s19 }
  0x12   : > { %v1986_v0 = vld [vmem:[%s2133_s22 + $0x24] sm:$0xff]   ;;  %v1987_v1 = vld [vmem:[%s2133_s22 + $0xc] sm:$0xff]   ;;  %v2143_v4 = vld [vmem:[%s2133_s22 + $0xd8] sm:$0xff]   ;;  %s2224_s28 = scalar_lea.vmem %s2718_s1, %s1857_s25 }
  0x13   : > { %678 = vrot.lane.b32.xlu1 %v1986_v0, %s2079_s23  ;;  %v1988_v2 = vld [vmem:[%s2133_s22 + $0xe4] sm:$0xff]   ;;  %674 = vrot.lane.b32.xlu0 %v1987_v1, %s2079_s23  ;;  %v1989_v3 = vld [vmem:[%s2133_s22 + $0xcc] sm:$0xff]  }
  0x14   : > { %v2147_v5 = vld [vmem:[%s2133_s22 + $0x18] sm:$0xff]   ;;  %v1992_v6 = vld [vmem:[%s2133_s22 + $0xd4] ss:$0 sps:$4 sm:$0x11]   ;;  %v2199_v20 = vld [vmem:[%s2133_s22 + $0x108] sm:$0xff]  }
  0x15   : > { %v1993_v7 = vld [vmem:[%s2133_s22 + $0x14] ss:$0 sps:$4 sm:$0x11]   ;;  %v1996_v10 = vld [vmem:[%s2133_s22 + $0xec] ss:$0 sps:$4 sm:$0x11]  }
  0x16   : > { %v2157_v8 = vld [vmem:[%s2133_s22 + $0xf0] sm:$0xff]   ;;  %v1997_v11 = vld [vmem:[%s2133_s22 + $0x2c] ss:$0 sps:$4 sm:$0x11]   ;;  %v2002_v16 = vld [vmem:[%s2133_s22 + $0xfc] sm:$0xff]  }
  0x17   : > { %710 = vrot.lane.b32.xlu1 %v1988_v2, %s2079_s23  ;;  %706 = vrot.lane.b32.xlu0 %v1989_v3, %s2079_s23  ;;  %v2160_v9 = vld [vmem:[%s2133_s22 + $0x30] sm:$0xff]   ;;  %v2170_v12 = vld [vmem:[%s2133_s22 + $0xe0] ss:$0 sps:$4 sm:$0x11]  }
  0x18   : > { %v2175_v13 = vld [vmem:[%s2133_s22 + $0x20] ss:$0 sps:$4 sm:$0x11]   ;;  %v2180_v14 = vld [vmem:[%s2133_s22 + $0xf8] ss:$0 sps:$4 sm:$0x11]  }
  0x19   : > { %v2185_v15 = vld [vmem:[%s2133_s22 + $0x38] ss:$0 sps:$4 sm:$0x11]   ;;  %v2003_v17 = vld [vmem:[%s2133_s22 + $0x3c] sm:$0xff]   ;;  %v2203_v21 = vld [vmem:[%s2133_s22 + $0x48] sm:$0xff]  }
  0x1a   : > { %v2004_v18 = vld [vmem:[%s2133_s22 + $0x114] sm:$0xff]   ;;  %v2008_v22 = vld [vmem:[%s2133_s22 + $0x104] ss:$0 sps:$4 sm:$0x11]   ;;  %v2018_v32 = vld [vmem:[%s2133_s22 + $0x12c] sm:$0xff]  }
  0x1b   : > { %778 = vrot.lane.b32.xlu1 %v2143_v4, %s2080_s24  ;;  %746 = vrot.lane.b32.xlu0 %v2147_v5, %s2080_s24  ;;  %v2005_v19 = vld [vmem:[%s2133_s22 + $0x54] sm:$0xff]   ;;  %v2009_v23 = vld [vmem:[%s2133_s22 + $0x44] ss:$0 sps:$4 sm:$0x11]  }
  0x1c   : > { %v2215_v24 = vld [vmem:[%s2133_s22 + $0x120] sm:$0xff]   ;;  %v2012_v26 = vld [vmem:[%s2133_s22 + $0x11c] ss:$0 sps:$4 sm:$0x11]   ;;  %v2019_v33 = vld [vmem:[%s2133_s22 + $0x6c] sm:$0xff]  }
  0x1d   : > { %v2219_v25 = vld [vmem:[%s2133_s22 + $0x60] sm:$0xff]   ;;  %v2013_v27 = vld [vmem:[%s2133_s22 + $0x5c] ss:$0 sps:$4 sm:$0x11]   ;;  %v2276_v40 = vld [vmem:[%s2133_s22 + $0x150] sm:$0xff]  }
  0x1e   : > { %v2234_v28 = vld [vmem:[%s2133_s22 + $0x110] ss:$0 sps:$4 sm:$0x11]   ;;  %v2243_v30 = vld [vmem:[%s2133_s22 + $0x128] ss:$0 sps:$4 sm:$0x11]  }
  0x1f   : > { %708 = vrot.lane.b32.xlu1 %v1992_v6, %s2079_s23  ;;  %676 = vrot.lane.b32.xlu0 %v1993_v7, %s2079_s23  ;;  %v2238_v29 = vld [vmem:[%s2133_s22 + $0x50] ss:$0 sps:$4 sm:$0x11]   ;;  %v2248_v31 = vld [vmem:[%s2133_s22 + $0x68] ss:$0 sps:$4 sm:$0x11]  }
  0x20   : > { %v2020_v34 = vld [vmem:[%s2133_s22 + $0x144] sm:$0xff]   ;;  %v2262_v36 = vld [vmem:[%s2133_s22 + $0x138] sm:$0xff]   ;;  %v2024_v38 = vld [vmem:[%s2133_s22 + $0x134] ss:$0 sps:$4 sm:$0x11]  }
  0x21   : > { %v2021_v35 = vld [vmem:[%s2133_s22 + $0x84] sm:$0xff]   ;;  %v2266_v37 = vld [vmem:[%s2133_s22 + $0x78] sm:$0xff]   ;;  %v2025_v39 = vld [vmem:[%s2133_s22 + $0x74] ss:$0 sps:$4 sm:$0x11]  }
  0x22   : > { %v2280_v41 = vld [vmem:[%s2133_s22 + $0x90] sm:$0xff]   ;;  %v2028_v42 = vld [vmem:[%s2133_s22 + $0x14c] ss:$0 sps:$4 sm:$0x11]   ;;  %v2034_v48 = vld [vmem:[%s2133_s22 + $0x15c] sm:$0xff]  }
  0x23   : > { %782 = vrot.lane.b32.xlu1 %v2157_v8, %s2080_s24  ;;  %750 = vrot.lane.b32.xlu0 %v2160_v9, %s2080_s24  ;;  %v2029_v43 = vld [vmem:[%s2133_s22 + $0x8c] ss:$0 sps:$4 sm:$0x11]   ;;  %v2290_v44 = vld [vmem:[%s2133_s22 + $0x140] ss:$0 sps:$4 sm:$0x11]  }
  0x24   : > { %v2294_v45 = vld [vmem:[%s2133_s22 + $0x80] ss:$0 sps:$4 sm:$0x11]   ;;  %v2299_v46 = vld [vmem:[%s2133_s22 + $0x158] ss:$0 sps:$4 sm:$0x11]  }
  0x25   : > { %v2304_v47 = vld [vmem:[%s2133_s22 + $0x98] ss:$0 sps:$4 sm:$0x11]   ;;  %v2035_v49 = vld [vmem:[%s2133_s22 + $0x9c] sm:$0xff]   ;;  %v2318_v52 = vld [vmem:[%s2133_s22 + $0x168] sm:$0xff]  }
  0x26   : > { %v2036_v50 = vld [vmem:[%s2133_s22 + $0x174] sm:$0xff]   ;;  %v2322_v53 = vld [vmem:[%s2133_s22 + $0xa8] sm:$0xff]   ;;  %v2040_v54 = vld [vmem:[%s2133_s22 + $0x164] ss:$0 sps:$4 sm:$0x11]  }
  0x27   : > { %712 = vrot.lane.b32.xlu1 %v1996_v10, %s2079_s23  ;;  %680 = vrot.lane.b32.xlu0 %v1997_v11, %s2079_s23  ;;  %v2037_v51 = vld [vmem:[%s2133_s22 + $0xb4] sm:$0xff]   ;;  %v2041_v55 = vld [vmem:[%s2133_s22 + $0xa4] ss:$0 sps:$4 sm:$0x11]  }
  0x28   : > { %v2042_v56 = vld [vmem:[%s2224_s28] sm:$0xff]   ;;  %v2045_v58 = vld [vmem:[%s2133_s22 + $0x17c] ss:$0 sps:$4 sm:$0x11]   ;;  %v2053_v3 = vld [vmem:[%s2719_s2 + $0x8] sm:$0xff]  }
  0x29   : > { %v2043_v57 = vld [vmem:[%s2133_s22 + $0xc0] sm:$0xff]   ;;  %v2046_v59 = vld [vmem:[%s2133_s22 + $0xbc] ss:$0 sps:$4 sm:$0x11]  }
  0x2a   : > { %v2340_v62 = vld [vmem:[%s2133_s22 + $0x170] ss:$0 sps:$4 sm:$0x11]   ;;  %v2052_v1 = vld [vmem:[%s2719_s2] sm:$0xff]  }
  0x2b   : > { %780 = vrot.lane.b32.xlu1 %v2170_v12, %s2080_s24  ;;  %748 = vrot.lane.b32.xlu0 %v2175_v13, %s2080_s24  ;;  %v2344_v63 = vld [vmem:[%s2133_s22 + $0xb0] ss:$0 sps:$4 sm:$0x11]   ;;  %v2049_v6 = vld [vmem:[%s2224_s28 + $0x8] ss:$0 sps:$4 sm:$0x11]  }
  0x2c   : > { %1910 = vmatprep.subr.bf16.mxu0 %v2052_v1  ;;  %v2050_v7 = vld [vmem:[%s2133_s22 + $0xc8] ss:$0 sps:$4 sm:$0x11]   ;;  %1948 = vmatprep.subr.bf16.mxu1 %v2052_v1 }
  0x2d   : > { %1911 = vmatpush3.bf16.msra.mxu0 %v2052_v1  ;;  %1951 = vmatpush3.bf16.msra.mxu1 %v2052_v1 }
  0x2e   : > { %1912 = vmatprep.subr.bf16.mxu0 %v2053_v3  ;;  %1949 = vmatprep.subr.bf16.mxu1 %v2053_v3 }
  0x2f   : > { %784 = vrot.lane.b32.xlu1 %v2180_v14, %s2080_s24  ;;  %752 = vrot.lane.b32.xlu0 %v2185_v15, %s2080_s24 }
  0x31   : > { %1913 = vmatpush3.bf16.msra.mxu0 %v2053_v3  ;;  %1952 = vmatpush3.bf16.msra.mxu1 %v2053_v3 }
  0x33   : > { %714 = vrot.lane.b32.xlu1 %v2002_v16, %s2079_s23  ;;  %682 = vrot.lane.b32.xlu0 %v2003_v17, %s2079_s23  ;;  %v2044_v16 = vld [vmem:[%s2133_s22] sm:$0xff]  }
  0x37   : > { %718 = vrot.lane.b32.xlu1 %v2004_v18, %s2079_s23  ;;  %686 = vrot.lane.b32.xlu0 %v2005_v19, %s2079_s23 }
  0x3b   : > { %786 = vrot.lane.b32.xlu1 %v2199_v20, %s2080_s24  ;;  %754 = vrot.lane.b32.xlu0 %v2203_v21, %s2080_s24 }
  0x3f   : > { %716 = vrot.lane.b32.xlu1 %v2008_v22, %s2079_s23  ;;  %684 = vrot.lane.b32.xlu0 %v2009_v23, %s2079_s23 }
  0x43   : > { %790 = vrot.lane.b32.xlu1 %v2215_v24, %s2080_s24  ;;  %758 = vrot.lane.b32.xlu0 %v2219_v25, %s2080_s24 }
  0x47   : > { %720 = vrot.lane.b32.xlu1 %v2012_v26, %s2079_s23  ;;  %688 = vrot.lane.b32.xlu0 %v2013_v27, %s2079_s23 }
  0x4b   : > { %788 = vrot.lane.b32.xlu1 %v2234_v28, %s2080_s24  ;;  %756 = vrot.lane.b32.xlu0 %v2238_v29, %s2080_s24 }
  0x4f   : > { %792 = vrot.lane.b32.xlu1 %v2243_v30, %s2080_s24  ;;  %760 = vrot.lane.b32.xlu0 %v2248_v31, %s2080_s24 }
  0x53   : > { %722 = vrot.lane.b32.xlu1 %v2018_v32, %s2079_s23  ;;  %690 = vrot.lane.b32.xlu0 %v2019_v33, %s2079_s23  ;;  %v2054_v33 = vld [vmem:[%s2719_s2 + $0x10] ss:$0 sps:$4 sm:$0x33]  }
  0x54   : > { %1954 = vmatprep.subr.msk.bf16.mxu0 %vm1258_vm2, %v2054_v33  ;;  %1955 = vmatprep.subr.msk.bf16.mxu1 %vm1258_vm2, %v2054_v33 }
  0x57   : > { %726 = vrot.lane.b32.xlu1 %v2020_v34, %s2079_s23  ;;  %694 = vrot.lane.b32.xlu0 %v2021_v35, %s2079_s23 }
  0x5b   : > { %794 = vrot.lane.b32.xlu1 %v2262_v36, %s2080_s24  ;;  %762 = vrot.lane.b32.xlu0 %v2266_v37, %s2080_s24 }
  0x5f   : > { %724 = vrot.lane.b32.xlu1 %v2024_v38, %s2079_s23  ;;  %692 = vrot.lane.b32.xlu0 %v2025_v39, %s2079_s23 }
  0x63   : > { %798 = vrot.lane.b32.xlu1 %v2276_v40, %s2080_s24  ;;  %766 = vrot.lane.b32.xlu0 %v2280_v41, %s2080_s24 }
  0x67   : > { %728 = vrot.lane.b32.xlu1 %v2028_v42, %s2079_s23  ;;  %696 = vrot.lane.b32.xlu0 %v2029_v43, %s2079_s23  ;;  %v1260_v42 = vsel %vm1258_vm2, %v2054_v33, 0 }
  0x68   : > { %1915 = vmatpush3.bf16.msra.mxu0 %v1260_v42  ;;  %1953 = vmatpush3.bf16.msra.mxu1 %v1260_v42 }
  0x6b   : > { %796 = vrot.lane.b32.xlu1 %v2290_v44, %s2080_s24  ;;  %764 = vrot.lane.b32.xlu0 %v2294_v45, %s2080_s24 }
  0x6f   : > { %800 = vrot.lane.b32.xlu1 %v2299_v46, %s2080_s24  ;;  %768 = vrot.lane.b32.xlu0 %v2304_v47, %s2080_s24 }
  0x73   : > { %730 = vrot.lane.b32.xlu1 %v2034_v48, %s2079_s23  ;;  %698 = vrot.lane.b32.xlu0 %v2035_v49, %s2079_s23  ;;  %v2051_v48 = vld [vmem:[%s2133_s22 + $0x8] ss:$0 sps:$4 sm:$0x11]  }
  0x77   : > { %734 = vrot.lane.b32.xlu1 %v2036_v50, %s2079_s23  ;;  %702 = vrot.lane.b32.xlu0 %v2037_v51, %s2079_s23 }
  0x7b   : > { %802 = vrot.lane.b32.xlu1 %v2318_v52, %s2080_s24  ;;  %770 = vrot.lane.b32.xlu0 %v2322_v53, %s2080_s24 }
  0x7f   : > { %732 = vrot.lane.b32.xlu1 %v2040_v54, %s2079_s23  ;;  %700 = vrot.lane.b32.xlu0 %v2041_v55, %s2079_s23 }
  0x83   : > { %806 = vrot.lane.b32.xlu1 %v2042_v56, %s2080_s24  ;;  %774 = vrot.lane.b32.xlu0 %v2043_v57, %s2080_s24 }
  0x85   : > { %v679_v60 = vpop.permute.xlu1 %678  ;;  %v675_v61 = vpop.permute.xlu0 %674 }
  0x86   : > { %v813_v22 = vsel %vm810_vm0, %v2044_v16, %v675_v61  ;;  %v819_v43 = vsel %vm810_vm0, %v2147_v5, %v679_v60 }
  0x87   : > { %736 = vrot.lane.b32.xlu1 %v2045_v58, %s2079_s23  ;;  %704 = vrot.lane.b32.xlu0 %v2046_v59, %s2079_s23 }
  0x89   : > { %v711_v0 = vpop.permute.xlu1 %710  ;;  %v707_v2 = vpop.permute.xlu0 %706 }
  0x8a   : > { %v861_v19 = vsel %vm810_vm0, %v2043_v57, %v707_v2  ;;  %v867_v35 = vsel %vm810_vm0, %v2143_v4, %v711_v0 }
  0x8b   : > { %804 = vrot.lane.b32.xlu1 %v2340_v62, %s2080_s24  ;;  %772 = vrot.lane.b32.xlu0 %v2344_v63, %s2080_s24 }
  0x8d   : > { %v779_v10 = vpop.permute.xlu1 %778  ;;  %v747_v11 = vpop.permute.xlu0 %746 }
  0x8e   : > { %v2364_v23 = vsel %vm907_vm1, %v861_v19, %v779_v10  ;;  %v2367_v27 = vsel %vm907_vm1, %v813_v22, %v747_v11 }
  0x8f   : > { %808 = vrot.lane.b32.xlu1 %v2049_v6, %s2080_s24  ;;  %776 = vrot.lane.b32.xlu0 %v2050_v7, %s2080_s24  ;;  %v1055_v34 = vshll.u32 %v2364_v23, 16  ;;  %v975_v38 = vshll.u32 %v2367_v27, 16  ;;  %v1053_v58 = vshrl.u32 %v2364_v23, 16  ;;  %v973_v0 = vshrl.u32 %v2367_v27, 16 }
  0x91   : > { %v709_v17 = vpop.permute.xlu1 %708  ;;  %v677_v18 = vpop.permute.xlu0 %676  ;;  %v1057_v4 = vrot.slane %v1055_v34, 1  ;;  %v977_v54 = vrot.slane %v975_v38, 1 }
  0x92   : > { %v864_v55 = vsel %vm810_vm0, %v2050_v7, %v709_v17  ;;  %v816_v5 = vsel %vm810_vm0, %v2051_v48, %v677_v18 }
  0x93   : > { %v1058_v3 = vor.u32 %v1057_v4, %v1053_v58  ;;  %v978_v7 = vor.u32 %v977_v54, %v973_v0 }
  0x95   : > { %v783_v26 = vpop.permute.xlu1 %782  ;;  %v751_v32 = vpop.permute.xlu0 %750 }
  0x96   : > { %v2380_v49 = vsel %vm907_vm1, %v867_v35, %v783_v26  ;;  %v2383_v51 = vsel %vm907_vm1, %v819_v43, %v751_v32 }
  0x97   : > { %v1065_v56 = vshll.u32 %v2380_v49, 16  ;;  %v985_v59 = vshll.u32 %v2383_v51, 16  ;;  %v1063_v33 = vshrl.u32 %v2380_v49, 16  ;;  %v983_v42 = vshrl.u32 %v2383_v51, 16 }
  0x99   : > { %v713_v39 = vpop.permute.xlu1 %712  ;;  %v681_v50 = vpop.permute.xlu0 %680  ;;  %v1067_v10 = vrot.slane %v1065_v56, 1  ;;  %v987_v18 = vrot.slane %v985_v59, 1 }
  0x9a   : > { %v870_v11 = vsel %vm810_vm0, %v2170_v12, %v713_v39  ;;  %v822_v19 = vsel %vm810_vm0, %v2175_v13, %v681_v50 }
  0x9b   : > { %v1068_v13 = vor.u32 %v1067_v10, %v1063_v33  ;;  %v988_v50 = vor.u32 %v987_v18, %v983_v42 }
  0x9d   : > { %v781_v57 = vpop.permute.xlu1 %780  ;;  %v749_v61 = vpop.permute.xlu0 %748 }
  0x9e   : > { %v943_v60 = vsel %vm907_vm1, %v864_v55, %v781_v57  ;;  %v911_v2 = vsel %vm907_vm1, %v816_v5, %v749_v61 }
  0x9f   : > { %v1059_v1 = vshll.u32 %v943_v60, 16  ;;  %v979_v6 = vshll.u32 %v911_v2, 16 }
  0xa1   : > { %v1061_v16 = vrot.slane %v1059_v1, 1  ;;  %v785_v17 = vpop.permute.xlu1 %784  ;;  %v981_v22 = vrot.slane %v979_v6, 1  ;;  %v753_v32 = vpop.permute.xlu0 %752 }
  0xa2   : > { %v947_v26 = vsel %vm907_vm1, %v870_v11, %v785_v17  ;;  %v915_v35 = vsel %vm907_vm1, %v822_v19, %v753_v32 }
  0xa3   : > { %v1069_v34 = vshll.u32 %v947_v26, 16  ;;  %v1062_v38 = vsel %vm972_vm3, %v1058_v3, %v1061_v16  ;;  %v989_v12 = vshll.u32 %v915_v35, 16  ;;  %v982_v39 = vsel %vm972_vm3, %v978_v7, %v981_v22 }
  0xa4   : > { %1149 = vrot.lane.b32.xlu1 %v1062_v38, %s2081_s9  ;;  %1133 = vrot.lane.b32.xlu0 %v982_v39, %s2081_s9 }
  0xa5   : > { %v1071_v43 = vrot.slane %v1069_v34, 1  ;;  %v715_v48 = vpop.permute.xlu1 %714  ;;  %v991_v4 = vrot.slane %v989_v12, 1  ;;  %v683_v54 = vpop.permute.xlu0 %682 }
  0xa6   : > { %v873_v0 = vsel %vm810_vm0, %v2157_v8, %v715_v48  ;;  %v825_v1 = vsel %vm810_vm0, %v2160_v9, %v683_v54 }
  0xa7   : > { %v1072_v55 = vsel %vm972_vm3, %v1068_v13, %v1071_v43  ;;  %v992_v56 = vsel %vm972_vm3, %v988_v50, %v991_v4 }
  0xa8   : > { %1151 = vrot.lane.b32.xlu1 %v1072_v55, %s2081_s9  ;;  %1135 = vrot.lane.b32.xlu0 %v992_v56, %s2081_s9 }
  0xa9   : > { %v719_v57 = vpop.permute.xlu1 %718  ;;  %v687_v58 = vpop.permute.xlu0 %686 }
  0xaa   : > { %v879_v11 = vsel %vm810_vm0, %v2199_v20, %v719_v57  ;;  %v831_v8 = vsel %vm810_vm0, %v2203_v21, %v687_v58 }
  0xad   : > { %v787_v5 = vpop.permute.xlu1 %786  ;;  %v755_v59 = vpop.permute.xlu0 %754 }
  0xae   : > { %v2414_v2 = vsel %vm907_vm1, %v873_v0, %v787_v5  ;;  %v2417_v6 = vsel %vm907_vm1, %v825_v1, %v755_v59 }
  0xaf   : > { %v1075_v10 = vshll.u32 %v2414_v2, 16  ;;  %v995_v16 = vshll.u32 %v2417_v6, 16  ;;  %v1073_v34 = vshrl.u32 %v2414_v2, 16  ;;  %v993_v12 = vshrl.u32 %v2417_v6, 16 }
  0xb1   : > { %v717_v60 = vpop.permute.xlu1 %716  ;;  %v685_v61 = vpop.permute.xlu0 %684  ;;  %v1077_v22 = vrot.slane %v1075_v10, 1  ;;  %v997_v26 = vrot.slane %v995_v16, 1 }
  0xb2   : > { %v876_v32 = vsel %vm810_vm0, %v2180_v14, %v717_v60  ;;  %v828_v21 = vsel %vm810_vm0, %v2185_v15, %v685_v61 }
  0xb3   : > { %v1078_v43 = vor.u32 %v1077_v22, %v1073_v34  ;;  %v998_v48 = vor.u32 %v997_v26, %v993_v12 }
  0xb5   : > { %v791_v3 = vpop.permute.xlu1 %790  ;;  %v759_v7 = vpop.permute.xlu0 %758 }
  0xb6   : > { %v2426_v9 = vsel %vm907_vm1, %v879_v11, %v791_v3  ;;  %v2429_v19 = vsel %vm907_vm1, %v831_v8, %v759_v7 }
  0xb7   : > { %v1085_v20 = vshll.u32 %v2426_v9, 16  ;;  %v1005_v35 = vshll.u32 %v2429_v19, 16  ;;  %v1083_v59 = vshrl.u32 %v2426_v9, 16  ;;  %v1003_v1 = vshrl.u32 %v2429_v19, 16 }
  0xb9   : > { %v721_v17 = vpop.permute.xlu1 %720  ;;  %v689_v18 = vpop.permute.xlu0 %688  ;;  %v1087_v50 = vrot.slane %v1085_v20, 1  ;;  %v1007_v15 = vrot.slane %v1005_v35, 1 }
  0xba   : > { %v882_v4 = vsel %vm810_vm0, %v2234_v28, %v721_v17  ;;  %v834_v56 = vsel %vm810_vm0, %v2238_v29, %v689_v18 }
  0xbb   : > { %v1088_v7 = vor.u32 %v1087_v50, %v1083_v59  ;;  %v1008_v11 = vor.u32 %v1007_v15, %v1003_v1 }
  0xbd   : > { %v789_v33 = vpop.permute.xlu1 %788  ;;  %v757_v42 = vpop.permute.xlu0 %756 }
  0xbe   : > { %v951_v38 = vsel %vm907_vm1, %v876_v32, %v789_v33  ;;  %v919_v13 = vsel %vm907_vm1, %v828_v21, %v757_v42 }
  0xbf   : > { %v1079_v39 = vshll.u32 %v951_v38, 16  ;;  %v999_v14 = vshll.u32 %v919_v13, 16 }
  0xc1   : > { %v1081_v54 = vrot.slane %v1079_v39, 1  ;;  %v793_v55 = vpop.permute.xlu1 %792  ;;  %v1001_v57 = vrot.slane %v999_v14, 1  ;;  %v761_v5 = vpop.permute.xlu0 %760 }
  0xc2   : > { %v955_v58 = vsel %vm907_vm1, %v882_v4, %v793_v55  ;;  %v923_v61 = vsel %vm907_vm1, %v834_v56, %v761_v5 }
  0xc3   : > { %v1089_v60 = vshll.u32 %v955_v58, 16  ;;  %v1082_v0 = vsel %vm972_vm3, %v1078_v43, %v1081_v54  ;;  %v1009_v28 = vshll.u32 %v923_v61, 16  ;;  %v1002_v3 = vsel %vm972_vm3, %v998_v48, %v1001_v57 }
  0xc4   : > { %1153 = vrot.lane.b32.xlu1 %v1082_v0, %s2081_s9  ;;  %1137 = vrot.lane.b32.xlu0 %v1002_v3, %s2081_s9 }
  0xc5   : > { %v1091_v29 = vrot.slane %v1089_v60, 1  ;;  %v723_v10 = vpop.permute.xlu1 %722  ;;  %v1011_v16 = vrot.slane %v1009_v28, 1  ;;  %v691_v17 = vpop.permute.xlu0 %690 }
  0xc6   : > { %v885_v21 = vsel %vm810_vm0, %v2215_v24, %v723_v10  ;;  %v837_v35 = vsel %vm810_vm0, %v2219_v25, %v691_v17 }
  0xc7   : > { %v1092_v8 = vsel %vm972_vm3, %v1088_v7, %v1091_v29  ;;  %v1012_v18 = vsel %vm972_vm3, %v1008_v11, %v1011_v16 }
  0xc8   : > { %1155 = vrot.lane.b32.xlu1 %v1092_v8, %s2081_s9  ;;  %1139 = vrot.lane.b32.xlu0 %v1012_v18, %s2081_s9 }
  0xc9   : > { %v727_v22 = vpop.permute.xlu1 %726  ;;  %v695_v26 = vpop.permute.xlu0 %694 }
  0xca   : > { %v891_v43 = vsel %vm810_vm0, %v2262_v36, %v727_v22  ;;  %v843_v24 = vsel %vm810_vm0, %v2266_v37, %v695_v26 }
  0xcd   : > { %v795_v32 = vpop.permute.xlu1 %794  ;;  %v763_v20 = vpop.permute.xlu0 %762 }
  0xce   : > { %v2462_v38 = vsel %vm907_vm1, %v885_v21, %v795_v32  ;;  %v2465_v12 = vsel %vm907_vm1, %v837_v35, %v763_v20 }
  0xcf   : > { %v1095_v13 = vshll.u32 %v2462_v38, 16  ;;  %v1015_v14 = vshll.u32 %v2465_v12, 16  ;;  %v1093_v57 = vshrl.u32 %v2462_v38, 16  ;;  %v1013_v60 = vshrl.u32 %v2465_v12, 16 }
  0xd1   : > { %v725_v33 = vpop.permute.xlu1 %724  ;;  %v693_v34 = vpop.permute.xlu0 %692  ;;  %v1097_v54 = vrot.slane %v1095_v13, 1  ;;  %v1017_v55 = vrot.slane %v1015_v14, 1 }
  0xd2   : > { %v888_v15 = vsel %vm810_vm0, %v2243_v30, %v725_v33  ;;  %v840_v37 = vsel %vm810_vm0, %v2248_v31, %v693_v34 }
  0xd3   : > { %v1098_v1 = vor.u32 %v1097_v54, %v1093_v57  ;;  %v1018_v28 = vor.u32 %v1017_v55, %v1013_v60 }
  0xd5   : > { %v799_v42 = vpop.permute.xlu1 %798  ;;  %v767_v39 = vpop.permute.xlu0 %766 }
  0xd6   : > { %v2474_v25 = vsel %vm907_vm1, %v891_v43, %v799_v42  ;;  %v2477_v4 = vsel %vm907_vm1, %v843_v24, %v767_v39 }
  0xd7   : > { %v1105_v36 = vshll.u32 %v2474_v25, 16  ;;  %v1025_v58 = vshll.u32 %v2477_v4, 16  ;;  %v1103_v18 = vshrl.u32 %v2474_v25, 16  ;;  %v1023_v20 = vshrl.u32 %v2477_v4, 16 }
  0xd9   : > { %v729_v48 = vpop.permute.xlu1 %728  ;;  %v697_v50 = vpop.permute.xlu0 %696  ;;  %v1107_v3 = vrot.slane %v1105_v36, 1  ;;  %v1027_v31 = vrot.slane %v1025_v58, 1 }
  0xda   : > { %v894_v7 = vsel %vm810_vm0, %v2290_v44, %v729_v48  ;;  %v846_v11 = vsel %vm810_vm0, %v2294_v45, %v697_v50 }
  0xdb   : > { %v1108_v34 = vor.u32 %v1107_v3, %v1103_v18  ;;  %v1028_v35 = vor.u32 %v1027_v31, %v1023_v20 }
  0xdd   : > { %v797_v56 = vpop.permute.xlu1 %796  ;;  %v765_v59 = vpop.permute.xlu0 %764 }
  0xde   : > { %v959_v5 = vsel %vm907_vm1, %v888_v15, %v797_v56  ;;  %v927_v0 = vsel %vm907_vm1, %v840_v37, %v765_v59 }
  0xdf   : > { %v1099_v61 = vshll.u32 %v959_v5, 16  ;;  %v1019_v30 = vshll.u32 %v927_v0, 16 }
  0xe1   : > { %v1101_v29 = vrot.slane %v1099_v61, 1  ;;  %v801_v10 = vpop.permute.xlu1 %800  ;;  %v1021_v16 = vrot.slane %v1019_v30, 1  ;;  %v769_v8 = vpop.permute.xlu0 %768 }
  0xe2   : > { %v963_v17 = vsel %vm907_vm1, %v894_v7, %v801_v10  ;;  %v931_v26 = vsel %vm907_vm1, %v846_v11, %v769_v8 }
  0xe3   : > { %v1109_v22 = vshll.u32 %v963_v17, 16  ;;  %v1102_v32 = vsel %vm972_vm3, %v1098_v1, %v1101_v29  ;;  %v1029_v44 = vshll.u32 %v931_v26, 16  ;;  %v1022_v33 = vsel %vm972_vm3, %v1018_v28, %v1021_v16 }
  0xe4   : > { %1157 = vrot.lane.b32.xlu1 %v1102_v32, %s2081_s9  ;;  %1141 = vrot.lane.b32.xlu0 %v1022_v33, %s2081_s9 }
  0xe5   : > { %v1111_v45 = vrot.slane %v1109_v22, 1  ;;  %v731_v21 = vpop.permute.xlu1 %730  ;;  %v1031_v42 = vrot.slane %v1029_v44, 1  ;;  %v699_v39 = vpop.permute.xlu0 %698 }
  0xe6   : > { %v897_v15 = vsel %vm810_vm0, %v2276_v40, %v731_v21  ;;  %v849_v36 = vsel %vm810_vm0, %v2280_v41, %v699_v39 }
  0xe7   : > { %v1112_v13 = vsel %vm972_vm3, %v1108_v34, %v1111_v45  ;;  %v1032_v43 = vsel %vm972_vm3, %v1028_v35, %v1031_v42 }
  0xe8   : > { %1159 = vrot.lane.b32.xlu1 %v1112_v13, %s2081_s9  ;;  %1143 = vrot.lane.b32.xlu0 %v1032_v43, %s2081_s9 }
  0xe9   : > { %v735_v14 = vpop.permute.xlu1 %734  ;;  %v703_v48 = vpop.permute.xlu0 %702 }
  0xea   : > { %v903_v59 = vsel %vm810_vm0, %v2318_v52, %v735_v14  ;;  %v855_v40 = vsel %vm810_vm0, %v2322_v53, %v703_v48 }
  0xed   : > { %v803_v24 = vpop.permute.xlu1 %802  ;;  %v771_v50 = vpop.permute.xlu0 %770 }
  0xee   : > { %v2510_v56 = vsel %vm907_vm1, %v897_v15, %v803_v24  ;;  %v2513_v37 = vsel %vm907_vm1, %v849_v36, %v771_v50 }
  0xef   : > { %v1115_v5 = vshll.u32 %v2510_v56, 16  ;;  %v1035_v60 = vshll.u32 %v2513_v37, 16  ;;  %v1113_v29 = vshrl.u32 %v2510_v56, 16  ;;  %v1033_v16 = vshrl.u32 %v2513_v37, 16 }
  0xf1   : > { %v733_v54 = vpop.permute.xlu1 %732  ;;  %v701_v55 = vpop.permute.xlu0 %700  ;;  %v1117_v30 = vrot.slane %v1115_v5, 1  ;;  %v1037_v28 = vrot.slane %v1035_v60, 1 }
  0xf2   : > { %v900_v3 = vsel %vm810_vm0, %v2299_v46, %v733_v54  ;;  %v852_v53 = vsel %vm810_vm0, %v2304_v47, %v701_v55 }
  0xf3   : > { %v1118_v18 = vor.u32 %v1117_v30, %v1113_v29  ;;  %v1038_v22 = vor.u32 %v1037_v28, %v1033_v16 }
  0xf5   : > { %v807_v57 = vpop.permute.xlu1 %806  ;;  %v775_v58 = vpop.permute.xlu0 %774 }
  0xf6   : > { %v2522_v41 = vsel %vm907_vm1, %v903_v59, %v807_v57  ;;  %v2525_v1 = vsel %vm907_vm1, %v855_v40, %v775_v58 }
  0xf7   : > { %v1125_v52 = vshll.u32 %v2522_v41, 16  ;;  %v1045_v10 = vshll.u32 %v2525_v1, 16  ;;  %v1123_v35 = vshrl.u32 %v2522_v41, 16  ;;  %v1043_v43 = vshrl.u32 %v2525_v1, 16 }
  0xf9   : > { %v737_v61 = vpop.permute.xlu1 %736  ;;  %v705_v0 = vpop.permute.xlu0 %704  ;;  %v1127_v26 = vrot.slane %v1125_v52, 1  ;;  %v1047_v47 = vrot.slane %v1045_v10, 1 }
  0xfa   : > { %v906_v32 = vsel %vm810_vm0, %v2340_v62, %v737_v61  ;;  %v858_v33 = vsel %vm810_vm0, %v2344_v63, %v705_v0 }
  0xfb   : > { %v1128_v48 = vor.u32 %v1127_v26, %v1123_v35  ;;  %v1048_v24 = vor.u32 %v1047_v47, %v1043_v43 }
  0xfd   : > { %v805_v7 = vpop.permute.xlu1 %804  ;;  %v773_v11 = vpop.permute.xlu0 %772 }
  0xfe   : > { %v967_v31 = vsel %vm907_vm1, %v900_v3, %v805_v7  ;;  %v935_v8 = vsel %vm907_vm1, %v852_v53, %v773_v11 }
  0xff   : > { %v1119_v17 = vshll.u32 %v967_v31, 16  ;;  %v1039_v46 = vshll.u32 %v935_v8, 16 }
 0x101   : > { %v1121_v20 = vrot.slane %v1119_v17, 1  ;;  %v809_v44 = vpop.permute.xlu1 %808  ;;  %v1041_v34 = vrot.slane %v1039_v46, 1  ;;  %v777_v21 = vpop.permute.xlu0 %776 }
 0x102   : > { %v971_v45 = vsel %vm907_vm1, %v906_v32, %v809_v44  ;;  %v939_v39 = vsel %vm907_vm1, %v858_v33, %v777_v21 }
 0x103   : > { %v1129_v42 = vshll.u32 %v971_v45, 16  ;;  %v1122_v13 = vsel %vm972_vm3, %v1118_v18, %v1121_v20  ;;  %v1049_v62 = vshll.u32 %v939_v39, 16  ;;  %v1042_v14 = vsel %vm972_vm3, %v1038_v22, %v1041_v34 }
 0x104   : > { %1161 = vrot.lane.b32.xlu1 %v1122_v13, %s2081_s9  ;;  %1145 = vrot.lane.b32.xlu0 %v1042_v14, %s2081_s9 }
 0x105   : > { %v1131_v63 = vrot.slane %v1129_v42, 1  ;;  %v1051_v50 = vrot.slane %v1049_v62, 1 }
 0x107   : > { %v1132_v54 = vsel %vm972_vm3, %v1128_v48, %v1131_v63  ;;  %v1052_v55 = vsel %vm972_vm3, %v1048_v24, %v1051_v50 }
 0x108   : > { %1163 = vrot.lane.b32.xlu1 %v1132_v54, %s2081_s9  ;;  %1147 = vrot.lane.b32.xlu0 %v1052_v55, %s2081_s9 }
 0x116   : > { %v1150_v15 = vpop.permute.xlu1 %1149  ;;  %v1134_v36 = vpop.permute.xlu0 %1133 }
 0x117   : > { %v1183_v57 = vsel %vm1165_vm4, %v2364_v23, %v1150_v15  ;;  %v1167_v58 = vsel %vm1165_vm4, %v2367_v27, %v1134_v36 }
 0x118   : > { %1932 = vmatprep.mubr.msk.bf16.mxu1 %vm1225_vm5, %v1183_v57  ;;  %1916 = vmatprep.mubr.msk.bf16.mxu0 %vm1225_vm5, %v1167_v58 }
 0x11a   : > { %v1152_v5 = vpop.permute.xlu1 %1151  ;;  %v1136_v60 = vpop.permute.xlu0 %1135 }
 0x11b   : > { %v1185_v59 = vsel %vm1165_vm4, %v2380_v49, %v1152_v5  ;;  %v1169_v61 = vsel %vm1165_vm4, %v2383_v51, %v1136_v60 }
 0x11c   : > { %1933 = vmatmul.mubr.msk.bf16.vlgmr.msra.gmra.mrb[0].mxu1 %vm1225_vm5, %v1185_v59  ;;  %1917 = vmatmul.mubr.msk.bf16.vlgmr.msra.gmra.mrb[0].mxu0 %vm1225_vm5, %v1169_v61 }
 0x136   : > { %v1154_v23 = vpop.permute.xlu1 %1153  ;;  %v1138_v40 = vpop.permute.xlu0 %1137 }
 0x137   : > { %v1187_v27 = vsel %vm1165_vm4, %v2414_v2, %v1154_v23  ;;  %v1171_v0 = vsel %vm1165_vm4, %v2417_v6, %v1138_v40 }
 0x138   : > { %1936 = vmatprep.mubr.msk.bf16.mxu1 %vm1225_vm5, %v1187_v27  ;;  %1920 = vmatprep.mubr.msk.bf16.mxu0 %vm1225_vm5, %v1171_v0 }
 0x13a   : > { %v1156_v49 = vpop.permute.xlu1 %1155  ;;  %v1140_v30 = vpop.permute.xlu0 %1139 }
 0x13b   : > { %v1189_v51 = vsel %vm1165_vm4, %v2426_v9, %v1156_v49  ;;  %v1173_v28 = vsel %vm1165_vm4, %v2429_v19, %v1140_v30 }
 0x13c   : > { %1937 = vmatmul.mubr.msk.bf16.gmra.mrb[4].mxu1 %vm1225_vm5, %v1189_v51  ;;  %1921 = vmatmul.mubr.msk.bf16.gmra.mrb[4].mxu0 %vm1225_vm5, %v1173_v28 }
 0x156   : > { %v1158_v2 = vpop.permute.xlu1 %1157  ;;  %v1142_v3 = vpop.permute.xlu0 %1141 }
 0x157   : > { %v1191_v6 = vsel %vm1165_vm4, %v2462_v38, %v1158_v2  ;;  %v1175_v52 = vsel %vm1165_vm4, %v2465_v12, %v1142_v3 }
 0x158   : > { %1940 = vmatprep.mubr.msk.bf16.mxu1 %vm1225_vm5, %v1191_v6  ;;  %1924 = vmatprep.mubr.msk.bf16.mxu0 %vm1225_vm5, %v1175_v52 }
 0x15a   : > { %v1160_v9 = vpop.permute.xlu1 %1159  ;;  %v1144_v7 = vpop.permute.xlu0 %1143 }
 0x15b   : > { %v1193_v19 = vsel %vm1165_vm4, %v2474_v25, %v1160_v9  ;;  %v1177_v29 = vsel %vm1165_vm4, %v2477_v4, %v1144_v7 }
 0x15c   : > { %1941 = vmatmul.mubr.msk.bf16.gmra.mrb[8].mxu1 %vm1225_vm5, %v1193_v19  ;;  %1925 = vmatmul.mubr.msk.bf16.gmra.mrb[8].mxu0 %vm1225_vm5, %v1177_v29 }
 0x176   : > { %v1162_v38 = vpop.permute.xlu1 %1161  ;;  %v1146_v53 = vpop.permute.xlu0 %1145 }
 0x177   : > { %v1195_v12 = vsel %vm1165_vm4, %v2510_v56, %v1162_v38  ;;  %v1179_v10 = vsel %vm1165_vm4, %v2513_v37, %v1146_v53  ;;  %v2604_v56 = vld [vmem:[%s2720_s3] ss:$0 sm:$0xff] }
 0x178   : > { %1944 = vmatprep.mubr.msk.bf16.mxu1 %vm1225_vm5, %v1195_v12  ;;  %1928 = vmatprep.mubr.msk.bf16.mxu0 %vm1225_vm5, %v1179_v10 }
 0x17a   : > { %v1164_v25 = vpop.permute.xlu1 %1163  ;;  %v1148_v31 = vpop.permute.xlu0 %1147 }
 0x17b   : > { %v1197_v4 = vsel %vm1165_vm4, %v2522_v41, %v1164_v25  ;;  %v1181_v11 = vsel %vm1165_vm4, %v2525_v1, %v1148_v31 }
 0x17c   : > { %1945 = vmatmul.mubr.msk.bf16.gmra.mrb[12].mxu1 %vm1225_vm5, %v1197_v4  ;;  %1929 = vmatmul.mubr.msk.bf16.gmra.mrb[12].mxu0 %vm1225_vm5, %v1181_v11 }
 0x1ef   : > { %v1934_v37 = vpop.f32.mrb[0].mxu1  ;;  %v1918_v16 = vpop.f32.mrb[0].mxu0 }
 0x1f0   : > { %v1369_v17 = vadd.f32 %v1934_v37, %v2604_v56  ;;  %v1360_v8 = vpop.f32.mrb[1].mxu1  ;;  %v1305_v41 = vadd.f32 %v1918_v16, %v2604_v56  ;;  %v1296_v18 = vpop.f32.mrb[1].mxu0 }
 0x1f1   : > { %v1361_v1 = vadd.f32 %v2604_v56, %v1360_v8  ;;  %v1935_v46 = vpop.f32.mrb[2].mxu1  ;;  %v1297_v26 = vadd.f32 %v2604_v56, %v1296_v18  ;;  %v1919_v32 = vpop.f32.mrb[2].mxu0 }
 0x1f2   : > { %v1441_v22 = vmax.f32 %v1369_v17, 0.0  ;;  %v1372_v20 = vadd.f32 %v1935_v46, %v2604_v56  ;;  %v1363_v44 = vpop.f32.mrb[3].mxu1  ;;  %v1425_v47 = vmax.f32 %v1305_v41, 0.0  ;;  %v1308_v34 = vadd.f32 %v1919_v32, %v2604_v56  ;;  %v1299_v45 = vpop.f32.mrb[3].mxu0 }
 0x1f3   : > { %v1439_v33 = vmax.f32 %v1361_v1, 0.0  ;;  %v1364_v21 = vadd.f32 %v2604_v56, %v1363_v44  ;;  %v1423_v42 = vmax.f32 %v1297_v26, 0.0  ;;  %v1300_v13 = vadd.f32 %v2604_v56, %v1299_v45 }
 0x1f4   : > { %v1877_v35 = vpack.c.bf16 %v1441_v22, %v1441_v22  ;;  %v1442_v39 = vmax.f32 %v1372_v20, 0.0  ;;  %v1861_v43 = vpack.c.bf16 %v1425_v47, %v1425_v47  ;;  %v1426_v14 = vmax.f32 %v1308_v34, 0.0 }
 0x1f5   : > { %v1875_v62 = vpack.c.bf16 %v1439_v33, %v1439_v33  ;;  %v1440_v48 = vmax.f32 %v1364_v21, 0.0  ;;  %v1859_v63 = vpack.c.bf16 %v1423_v42, %v1423_v42  ;;  %v1424_v50 = vmax.f32 %v1300_v13, 0.0 }
 0x1f6   : > { %1602 = vst.msk [vmem:[%s2615_s15 + $0x48] sm:$0xf] %vm1583_vm6, %v1877_v35  ;;  %v1878_v24 = vpack.c.bf16 %v1442_v39, %v1442_v39  ;;  %1586 = vst.msk [vmem:[%s2615_s15 + $0x8] sm:$0xf] %vm1583_vm6, %v1861_v43  ;;  %v1862_v54 = vpack.c.bf16 %v1426_v14, %v1426_v14 }
 0x1f7   : > { %1600 = vst.msk [vmem:[%s2615_s15 + $0x40] sm:$0xf] %vm1583_vm6, %v1875_v62  ;;  %v1876_v55 = vpack.c.bf16 %v1440_v48, %v1440_v48  ;;  %1584 = vst.msk [vmem:[%s2615_s15] sm:$0xf] %vm1583_vm6, %v1859_v63  ;;  %v1860_v15 = vpack.c.bf16 %v1424_v50, %v1424_v50 }
 0x1f8   : > { %1603 = vst.msk [vmem:[%s2615_s15 + $0x4c] sm:$0xf] %vm1583_vm6, %v1878_v24  ;;  %1587 = vst.msk [vmem:[%s2615_s15 + $0xc] sm:$0xf] %vm1583_vm6, %v1862_v54 }
 0x1f9   : > { %1601 = vst.msk [vmem:[%s2615_s15 + $0x44] sm:$0xf] %vm1583_vm6, %v1876_v55  ;;  %1585 = vst.msk [vmem:[%s2615_s15 + $0x4] sm:$0xf] %vm1583_vm6, %v1860_v15 }
 0x20f   : > { %v1938_v36 = vpop.f32.mrb[4].mxu1  ;;  %v1922_v57 = vpop.f32.mrb[4].mxu0 }
 0x210   : > { %v1385_v58 = vadd.f32 %v1938_v36, %v2604_v56  ;;  %v1376_v5 = vpop.f32.mrb[5].mxu1  ;;  %v1321_v59 = vadd.f32 %v1922_v57, %v2604_v56  ;;  %v1312_v60 = vpop.f32.mrb[5].mxu0 }
 0x211   : > { %v1377_v61 = vadd.f32 %v2604_v56, %v1376_v5  ;;  %v1939_v23 = vpop.f32.mrb[6].mxu1  ;;  %v1313_v40 = vadd.f32 %v2604_v56, %v1312_v60  ;;  %v1923_v0 = vpop.f32.mrb[6].mxu0 }
 0x212   : > { %v1445_v27 = vmax.f32 %v1385_v58, 0.0  ;;  %v1388_v49 = vadd.f32 %v1939_v23, %v2604_v56  ;;  %v1379_v51 = vpop.f32.mrb[7].mxu1  ;;  %v1429_v30 = vmax.f32 %v1321_v59, 0.0  ;;  %v1324_v2 = vadd.f32 %v1923_v0, %v2604_v56  ;;  %v1315_v6 = vpop.f32.mrb[7].mxu0 }
 0x213   : > { %v1443_v28 = vmax.f32 %v1377_v61, 0.0  ;;  %v1380_v3 = vadd.f32 %v2604_v56, %v1379_v51  ;;  %v1427_v9 = vmax.f32 %v1313_v40, 0.0  ;;  %v1316_v7 = vadd.f32 %v2604_v56, %v1315_v6 }
 0x214   : > { %v1881_v52 = vpack.c.bf16 %v1445_v27, %v1445_v27  ;;  %v1446_v19 = vmax.f32 %v1388_v49, 0.0  ;;  %v1865_v29 = vpack.c.bf16 %v1429_v30, %v1429_v30  ;;  %v1430_v12 = vmax.f32 %v1324_v2, 0.0 }
 0x215   : > { %v1879_v38 = vpack.c.bf16 %v1443_v28, %v1443_v28  ;;  %v1444_v53 = vmax.f32 %v1380_v3, 0.0  ;;  %v1863_v10 = vpack.c.bf16 %v1427_v9, %v1427_v9  ;;  %v1428_v4 = vmax.f32 %v1316_v7, 0.0 }
 0x216   : > { %1606 = vst.msk [vmem:[%s2615_s15 + $0x58] sm:$0xf] %vm1583_vm6, %v1881_v52  ;;  %v1882_v25 = vpack.c.bf16 %v1446_v19, %v1446_v19  ;;  %1590 = vst.msk [vmem:[%s2615_s15 + $0x18] sm:$0xf] %vm1583_vm6, %v1865_v29  ;;  %v1866_v31 = vpack.c.bf16 %v1430_v12, %v1430_v12 }
 0x217   : > { %1604 = vst.msk [vmem:[%s2615_s15 + $0x50] sm:$0xf] %vm1583_vm6, %v1879_v38  ;;  %v1880_v11 = vpack.c.bf16 %v1444_v53, %v1444_v53  ;;  %1588 = vst.msk [vmem:[%s2615_s15 + $0x10] sm:$0xf] %vm1583_vm6, %v1863_v10  ;;  %v1864_v37 = vpack.c.bf16 %v1428_v4, %v1428_v4 }
 0x218   : > { %1607 = vst.msk [vmem:[%s2615_s15 + $0x5c] sm:$0xf] %vm1583_vm6, %v1882_v25  ;;  %1591 = vst.msk [vmem:[%s2615_s15 + $0x1c] sm:$0xf] %vm1583_vm6, %v1866_v31 }
 0x219   : > { %1605 = vst.msk [vmem:[%s2615_s15 + $0x54] sm:$0xf] %vm1583_vm6, %v1880_v11  ;;  %1589 = vst.msk [vmem:[%s2615_s15 + $0x14] sm:$0xf] %vm1583_vm6, %v1864_v37 }
 0x22f   : > { %v1942_v16 = vpop.f32.mrb[8].mxu1  ;;  %v1926_v17 = vpop.f32.mrb[8].mxu0 }
 0x230   : > { %v1401_v8 = vadd.f32 %v1942_v16, %v2604_v56  ;;  %v1392_v41 = vpop.f32.mrb[9].mxu1  ;;  %v1337_v18 = vadd.f32 %v1926_v17, %v2604_v56  ;;  %v1328_v1 = vpop.f32.mrb[9].mxu0 }
 0x231   : > { %v1393_v46 = vadd.f32 %v2604_v56, %v1392_v41  ;;  %v1943_v22 = vpop.f32.mrb[10].mxu1  ;;  %v1329_v32 = vadd.f32 %v2604_v56, %v1328_v1  ;;  %v1927_v20 = vpop.f32.mrb[10].mxu0 }
 0x232   : > { %v1449_v26 = vmax.f32 %v1401_v8, 0.0  ;;  %v1404_v44 = vadd.f32 %v1943_v22, %v2604_v56  ;;  %v1395_v47 = vpop.f32.mrb[11].mxu1  ;;  %v1433_v33 = vmax.f32 %v1337_v18, 0.0  ;;  %v1340_v45 = vadd.f32 %v1927_v20, %v2604_v56  ;;  %v1331_v21 = vpop.f32.mrb[11].mxu0 }
 0x233   : > { %v1447_v34 = vmax.f32 %v1393_v46, 0.0  ;;  %v1396_v35 = vadd.f32 %v2604_v56, %v1395_v47  ;;  %v1431_v39 = vmax.f32 %v1329_v32, 0.0  ;;  %v1332_v43 = vadd.f32 %v2604_v56, %v1331_v21 }
 0x234   : > { %v1885_v42 = vpack.c.bf16 %v1449_v26, %v1449_v26  ;;  %v1450_v13 = vmax.f32 %v1404_v44, 0.0  ;;  %v1869_v62 = vpack.c.bf16 %v1433_v33, %v1433_v33  ;;  %v1434_v48 = vmax.f32 %v1340_v45, 0.0 }
 0x235   : > { %v1883_v14 = vpack.c.bf16 %v1447_v34, %v1447_v34  ;;  %v1448_v63 = vmax.f32 %v1396_v35, 0.0  ;;  %v1867_v24 = vpack.c.bf16 %v1431_v39, %v1431_v39  ;;  %v1432_v54 = vmax.f32 %v1332_v43, 0.0 }
 0x236   : > { %1610 = vst.msk [vmem:[%s2615_s15 + $0x68] sm:$0xf] %vm1583_vm6, %v1885_v42  ;;  %v1886_v50 = vpack.c.bf16 %v1450_v13, %v1450_v13  ;;  %1594 = vst.msk [vmem:[%s2615_s15 + $0x28] sm:$0xf] %vm1583_vm6, %v1869_v62  ;;  %v1870_v55 = vpack.c.bf16 %v1434_v48, %v1434_v48 }
 0x237   : > { %1608 = vst.msk [vmem:[%s2615_s15 + $0x60] sm:$0xf] %vm1583_vm6, %v1883_v14  ;;  %v1884_v15 = vpack.c.bf16 %v1448_v63, %v1448_v63  ;;  %1592 = vst.msk [vmem:[%s2615_s15 + $0x20] sm:$0xf] %vm1583_vm6, %v1867_v24  ;;  %v1868_v36 = vpack.c.bf16 %v1432_v54, %v1432_v54 }
 0x238   : > { %1611 = vst.msk [vmem:[%s2615_s15 + $0x6c] sm:$0xf] %vm1583_vm6, %v1886_v50  ;;  %1595 = vst.msk [vmem:[%s2615_s15 + $0x2c] sm:$0xf] %vm1583_vm6, %v1870_v55 }
 0x239   : > { %1609 = vst.msk [vmem:[%s2615_s15 + $0x64] sm:$0xf] %vm1583_vm6, %v1884_v15  ;;  %1593 = vst.msk [vmem:[%s2615_s15 + $0x24] sm:$0xf] %vm1583_vm6, %v1868_v36 }
 0x24f   : > { %v1946_v57 = vpop.f32.mrb[12].mxu1  ;;  %v1930_v58 = vpop.f32.mrb[12].mxu0 }
 0x250   : > { %v1417_v5 = vadd.f32 %v1946_v57, %v2604_v56  ;;  %v1408_v59 = vpop.f32.mrb[13].mxu1  ;;  %v1353_v60 = vadd.f32 %v1930_v58, %v2604_v56  ;;  %v1344_v61 = vpop.f32.mrb[13].mxu0 }
 0x251   : > { %v1409_v23 = vadd.f32 %v2604_v56, %v1408_v59  ;;  %v1947_v27 = vpop.f32.mrb[14].mxu1  ;;  %v1345_v0 = vadd.f32 %v2604_v56, %v1344_v61  ;;  %v1931_v49 = vpop.f32.mrb[14].mxu0 }
 0x252   : > { %v1453_v40 = vmax.f32 %v1417_v5, 0.0  ;;  %v1420_v51 = vadd.f32 %v1947_v27, %v2604_v56  ;;  %v1411_v30 = vpop.f32.mrb[15].mxu1  ;;  %v1437_v28 = vmax.f32 %v1353_v60, 0.0  ;;  %v1356_v6 = vadd.f32 %v1931_v49, %v2604_v56  ;;  %v1347_v3 = vpop.f32.mrb[15].mxu0 }
 0x253   : > { %v1451_v2 = vmax.f32 %v1409_v23, 0.0  ;;  %v1412_v52 = vadd.f32 %v2604_v56, %v1411_v30  ;;  %v1435_v19 = vmax.f32 %v1345_v0, 0.0  ;;  %v1348_v29 = vadd.f32 %v2604_v56, %v1347_v3 }
 0x254   : > { %v1889_v9 = vpack.c.bf16 %v1453_v40, %v1453_v40  ;;  %v1454_v7 = vmax.f32 %v1420_v51, 0.0  ;;  %v1873_v38 = vpack.c.bf16 %v1437_v28, %v1437_v28  ;;  %v1438_v53 = vmax.f32 %v1356_v6, 0.0 }
 0x255   : > { %v1887_v12 = vpack.c.bf16 %v1451_v2, %v1451_v2  ;;  %v1452_v10 = vmax.f32 %v1412_v52, 0.0  ;;  %v1871_v25 = vpack.c.bf16 %v1435_v19, %v1435_v19  ;;  %v1436_v31 = vmax.f32 %v1348_v29, 0.0 }
 0x256   : > { %1614 = vst.msk [vmem:[%s2615_s15 + $0x78] sm:$0xf] %vm1583_vm6, %v1889_v9  ;;  %v1890_v4 = vpack.c.bf16 %v1454_v7, %v1454_v7  ;;  %1598 = vst.msk [vmem:[%s2615_s15 + $0x38] sm:$0xf] %vm1583_vm6, %v1873_v38  ;;  %v1874_v11 = vpack.c.bf16 %v1438_v53, %v1438_v53 }
 0x257   : > { %1612 = vst.msk [vmem:[%s2615_s15 + $0x70] sm:$0xf] %vm1583_vm6, %v1887_v12  ;;  %v1888_v37 = vpack.c.bf16 %v1452_v10, %v1452_v10  ;;  %1596 = vst.msk [vmem:[%s2615_s15 + $0x30] sm:$0xf] %vm1583_vm6, %v1871_v25  ;;  %v1872_v56 = vpack.c.bf16 %v1436_v31, %v1436_v31 }
 0x258   : > { %1615 = vst.msk [vmem:[%s2615_s15 + $0x7c] sm:$0xf] %vm1583_vm6, %v1890_v4  ;;  %1599 = vst.msk [vmem:[%s2615_s15 + $0x3c] sm:$0xf] %vm1583_vm6, %v1874_v11 }
 0x259   : > { %1613 = vst.msk [vmem:[%s2615_s15 + $0x74] sm:$0xf] %vm1583_vm6, %v1888_v37  ;;  %1597 = vst.msk [vmem:[%s2615_s15 + $0x34] sm:$0xf] %vm1583_vm6, %v1872_v56 }
 0x25a PF: > { %s14_s17 = sadd.s32 1, %s2077_s17   ;;  %s2722_s15 = smov %s2073_s16 }
 0x25b   : > { %p11_p5 = scmp.ge.s32.totalorder %s14_s17, 4   ;;  %s2723_s16 = smov %s2725_s18 }
 0x25d   :  { %13 = sbr.rel (!%p11_p5) target bundleno = 2 (0x2), region = 69 }

// kernel: hrnet_forward.8
= control target key start
LH: loop header
LB: loop body
LE: loop exit
PB: predicated region body
PF: predicated region fallthrough
CT: control target
= control target key end

     0   :  { %s1465_s15 = smov 0   ;;  %s1467_s16 = smov 0   ;;  %s1766_s0 = inlined_call_operand.vmem [shape: bf16[2,18,9,64], index: 0, kind: input, shape index: {}, may-alias: {0,1}]   ;;  %s1767_s1 = inlined_call_operand.vmem [shape: bf16[2,18,9,64], index: 1, kind: input, shape index: {}, may-alias: {0,1}]   ;;  %s1768_s2 = inlined_call_operand.vmem [shape: bf16[384,32], index: 2, kind: input, shape index: {}]   ;;  %s1769_s3 = inlined_call_operand.vmem [shape: f32[1,32], index: 3, kind: input, shape index: {}]   ;;  %s1770_s4 = inlined_call_operand.vmem [shape: bf16[2,64,32], index: 4, kind: output, shape index: {}]  }
   0x1   :  { %s1469_s17 = smov 0  }
   0x2 LB: > { %s26_s18 = sadd.s32 1, %s1433_s16  ;;  %p1190_p0 = scmp.ge.s32.totalorder %s1437_s17, 1  ;;  %s1437_s17 = sphi %s1469_s17, %s14_s17   ;;  %s1433_s16 = sphi %s1467_s16, %s1772_s16   ;;  %s1429_s15 = sphi %s1465_s15, %s1771_s15  }
   0x3   : > { %p28_p1 = scmp.ge.s32.totalorder %s26_s18, 2  ;;  %p220_p2 = scmp.lt.s32.totalorder %s1437_s17, 3 }
   0x5   : > { %s1774_s18 = smov (%p28_p1, %s26_s18), 0  ;;  %p221_p3 = pnand %p1190_p0, %p220_p2 }
   0x6   : > { %p278_p4 = scmp.lt.s32.totalorder (!%p221_p3), %s1429_s15, 1  ;;  %s1439_s23 = smov (!%p221_p3), 64   ;;  %v1391_v8 = vld [vmem:[%s1768_s2 + $0x40] sm:$0xff] (!%p221_p3)   ;;  %v1393_v10 = vld [vmem:[%s1768_s2 + $0x48] sm:$0xff] (!%p221_p3)   ;;  %v1395_v14 = vld [vmem:[%s1768_s2 + $0x50] sm:$0xff] (!%p221_p3)   ;;  %vm454_vm0 = vcmask (!%p221_p3), 523264  }
   0x7   : > { %224 = sbr.rel (%p221_p3) target bundleno = 514 (0x202), region = 36  ;;  %v1392_v9 = vld [vmem:[%s1768_s2] sm:$0xff] (!%p221_p3)   ;;  %1270 = vmatprep.subr.bf16.mxu0 (!%p221_p3), %v1391_v8  ;;  %v1394_v12 = vld [vmem:[%s1768_s2 + $0x8] sm:$0xff] (!%p221_p3)   ;;  %v1405_v15 = vld [vmem:[%s1768_s2 + $0x90] sm:$0xff] (!%p221_p3)   ;;  %vm1066_vm1 = vcmask (!%p221_p3), 257024  }
   0x8   : > { %v1399_v11 = vld [vmem:[%s1768_s2 + $0x80] sm:$0xff] (!%p221_p3)   ;;  %1271 = vmatpush3.bf16.msra.mxu0 (!%p221_p3), %v1392_v9  ;;  %v1402_v13 = vld [vmem:[%s1768_s2 + $0x88] sm:$0xff] (!%p221_p3)   ;;  %v1396_v16 = vld [vmem:[%s1768_s2 + $0x10] sm:$0xff] (!%p221_p3)  }
   0x9   : > { %1272 = vmatprep.subr.bf16.mxu0 (!%p221_p3), %v1393_v10  ;;  %1322 = vmatprep.subr.bf16.mxu1 (!%p221_p3), %v1399_v11  ;;  %v1397_v17 = vld [vmem:[%s1768_s2 + $0x58] sm:$0xff] (!%p221_p3)   ;;  %v1400_v19 = vld [vmem:[%s1768_s2 + $0x60] sm:$0xff] (!%p221_p3)   ;;  %v1403_v21 = vld [vmem:[%s1768_s2 + $0x68] sm:$0xff] (!%p221_p3)  }
   0xa   : > { %1323 = vmatpush3.bf16.msra.mxu1 (!%p221_p3), %v1399_v11  ;;  %v1398_v18 = vld [vmem:[%s1768_s2 + $0x18] sm:$0xff] (!%p221_p3)   ;;  %v1401_v20 = vld [vmem:[%s1768_s2 + $0x20] sm:$0xff] (!%p221_p3)   ;;  %v1404_v22 = vld [vmem:[%s1768_s2 + $0x28] sm:$0xff] (!%p221_p3)  }
   0xb   : > { %1324 = vmatprep.subr.bf16.mxu1 (!%p221_p3), %v1402_v13  ;;  %v1406_v23 = vld [vmem:[%s1768_s2 + $0x70] sm:$0xff] (!%p221_p3)   ;;  %v1408_v25 = vld [vmem:[%s1768_s2 + $0x98] sm:$0xff] (!%p221_p3)   ;;  %v1411_v30 = vld [vmem:[%s1768_s2 + $0xa0] sm:$0xff] (!%p221_p3)  }
   0xc   : > { %1273 = vmatpush3.bf16.msra.mxu0 (!%p221_p3), %v1394_v12  ;;  %v1407_v24 = vld [vmem:[%s1768_s2 + $0x30] sm:$0xff] (!%p221_p3)   ;;  %v1409_v27 = vld [vmem:[%s1768_s2 + $0x78] sm:$0xff] (!%p221_p3)   ;;  %v1412_v44 = vld [vmem:[%s1768_s2 + $0xa8] sm:$0xff] (!%p221_p3)  }
   0xd   : > { %1274 = vmatprep.subr.bf16.mxu0 (!%p221_p3), %v1395_v14  ;;  %v1410_v29 = vld [vmem:[%s1768_s2 + $0x38] sm:$0xff] (!%p221_p3)   ;;  %v1413_v59 = vld [vmem:[%s1768_s2 + $0xb0] sm:$0xff] (!%p221_p3)  }
   0xe   : > { %s1776_s15 = smov (!%p278_p4, %s1429_s15), 1  ;;  %1325 = vmatpush3.bf16.msra.mxu1 %v1402_v13 }
   0xf   : > { %s1346_s19 = smul.u32 144, %s1776_s15  ;;  %1326 = vmatprep.subr.bf16.mxu1 %v1405_v15 }
  0x10   : > { %1275 = vmatpush3.bf16.msra.mxu0 %v1396_v16 }
  0x11   : > { %s1489_s22 = scalar_lea.vmem %s1766_s0, %s1346_s19  ;;  %s1507_s24 = sadd.s32 128, %s1346_s19  ;;  %1276 = vmatprep.subr.bf16.mxu0 %v1397_v17 }
  0x12   : > { %v1374_v0 = vld [vmem:[%s1489_s22 + $0x8] sm:$0x1f]   ;;  %v1376_v2 = vld [vmem:[%s1489_s22 + $0x18] sm:$0x1f]   ;;  %s304_s27 = scalar_lea.vmem %s1767_s1, %s1507_s24  ;;  %1327 = vmatpush3.bf16.msra.mxu1 %v1405_v15  ;;  %v1382_v26 = vld [vmem:[%s1489_s22] sm:$0x1f]  }
  0x13   : > { %v1375_v1 = vld [vmem:[%s1489_s22 + $0x28] sm:$0x1f]   ;;  %433 = vrot.lane.b32.xlu0 %v1374_v0, %s1439_s23  ;;  %v1377_v3 = vld [vmem:[%s1489_s22 + $0x38] sm:$0x1f]   ;;  %1328 = vmatprep.subr.bf16.mxu1 %v1408_v25  ;;  %v1572_v28 = vld [vmem:[%s1489_s22 + $0x20] sm:$0x1f]  }
  0x14   : > { %437 = vrot.lane.b32.xlu1 %v1375_v1, %s1439_s23  ;;  %v1378_v4 = vld [vmem:[%s1489_s22 + $0x48] sm:$0x1f]   ;;  %v1379_v5 = vld [vmem:[%s1489_s22 + $0x58] sm:$0x1f]   ;;  %1277 = vmatpush3.bf16.msra.mxu0 %v1398_v18  ;;  %v1584_v34 = vld [vmem:[%s1489_s22 + $0x10] sm:$0x1f]  }
  0x15   : > { %v1380_v6 = vld [vmem:[%s1489_s22 + $0x68] sm:$0x1f]   ;;  %v1381_v7 = vld [vmem:[%s1489_s22 + $0x78] sm:$0x1f]   ;;  %1278 = vmatprep.subr.bf16.mxu0 %v1400_v19  ;;  %v1592_v37 = vld [vmem:[%s1489_s22 + $0x30] sm:$0x1f]  }
  0x16   : > { %1329 = vmatpush3.bf16.msra.mxu1 %v1408_v25  ;;  %v487_v39 = vshll.u32 %v1584_v34, 16  ;;  %v1606_v48 = vld [vmem:[%s1489_s22 + $0x40] sm:$0x1f]   ;;  %v485_v49 = vshrl.u32 %v1584_v34, 16  ;;  %v1615_v53 = vld [vmem:[%s1489_s22 + $0x50] sm:$0x1f]  }
  0x17   : > { %435 = vrot.lane.b32.xlu0 %v1376_v2, %s1439_s23  ;;  %1330 = vmatprep.subr.bf16.mxu1 %v1411_v30  ;;  %v499_v54 = vshll.u32 %v1572_v28, 16  ;;  %v497_v8 = vshrl.u32 %v1572_v28, 16  ;;  %v1643_v9 = vld [vmem:[%s1489_s22 + $0x70] sm:$0x1f]   ;;  %v511_v12 = vshll.u32 %v1592_v37, 16  ;;  %v1414_v19 = vld [vmem:[%s1768_s2 + $0xb8] sm:$0xff]  }
  0x18   : > { %439 = vrot.lane.b32.xlu1 %v1377_v3, %s1439_s23  ;;  %1279 = vmatpush3.bf16.msra.mxu0 %v1401_v20  ;;  %v489_v57 = vrot.slane %v487_v39, 1 }
  0x19   : > { %1280 = vmatprep.subr.bf16.mxu0 %v1403_v21  ;;  %v501_v11 = vrot.slane %v499_v54, 1  ;;  %v513_v25 = vrot.slane %v511_v12, 1 }
  0x1a   : > { %1331 = vmatpush3.bf16.msra.mxu1 %v1411_v30  ;;  %v490_v10 = vor.u32 %v489_v57, %v485_v49  ;;  %v1390_v57 = vld [vmem:[%s304_s27] sm:$0x1f]   ;;  %s1261_s27 = sshll.u32 %s1776_s15, 5 }
  0x1b   : > { %441 = vrot.lane.b32.xlu0 %v1378_v4, %s1439_s23  ;;  %1332 = vmatprep.subr.bf16.mxu1 %v1412_v44  ;;  %v1634_v4 = vld [vmem:[%s1489_s22 + $0x60] sm:$0x1f]   ;;  %s1739_s21 = scalar_lea.vmem %s1770_s4, %s1261_s27 }
  0x1c   : > { %443 = vrot.lane.b32.xlu1 %v1379_v5, %s1439_s23  ;;  %1281 = vmatpush3.bf16.msra.mxu0 %v1404_v22  ;;  %v547_v49 = vshll.u32 %v1634_v4, 16 }
  0x1d   : > { %1282 = vmatprep.subr.bf16.mxu0 %v1406_v23  ;;  %v509_v23 = vshrl.u32 %v1592_v37, 16 }
  0x1e   : > { %1333 = vmatpush3.bf16.msra.mxu1 %v1412_v44 }
  0x1f   : > { %445 = vrot.lane.b32.xlu0 %v1380_v6, %s1439_s23  ;;  %1334 = vmatprep.subr.bf16.mxu1 %v1413_v59 }
  0x20   : > { %447 = vrot.lane.b32.xlu1 %v1381_v7, %s1439_s23  ;;  %1283 = vmatpush3.bf16.msra.mxu0 %v1407_v24  ;;  %v502_v24 = vor.u32 %v501_v11, %v497_v8  ;;  %v570_v8 = vshrl.u32 %v1390_v57, 16 }
  0x21   : > { %1284 = vmatprep.subr.bf16.mxu0 %v1409_v27 }
  0x22   : > { %1335 = vmatpush3.bf16.msra.mxu1 %v1413_v59  ;;  %v545_v59 = vshrl.u32 %v1634_v4, 16 }
  0x23   : > { %1336 = vmatprep.subr.bf16.mxu1 %v1414_v19 }
  0x24   : > { %1285 = vmatpush3.bf16.msra.mxu0 %v1410_v29 }
  0x26   : > { %1337 = vmatpush3.bf16.msra.mxu1 %v1414_v19 }
  0x85   : > { %v434_v31 = vpop.permute.xlu0 %433 }
  0x86   : > { %v1581_v32 = vsel %vm454_vm0, %v1382_v26, %v434_v31  ;;  %v438_v33 = vpop.permute.xlu1 %437  ;;  %v523_v26 = vshll.u32 %v1606_v48, 16 }
  0x87   : > { %v481_v35 = vshll.u32 %v1581_v32, 16  ;;  %v1589_v36 = vsel %vm454_vm0, %v1572_v28, %v438_v33  ;;  %v479_v40 = vshrl.u32 %v1581_v32, 16 }
  0x88   : > { %v505_v38 = vshll.u32 %v1589_v36, 16  ;;  %v503_v42 = vshrl.u32 %v1589_v36, 16  ;;  %v525_v39 = vrot.slane %v523_v26, 1 }
  0x89   : > { %v483_v41 = vrot.slane %v481_v35, 1  ;;  %v436_v43 = vpop.permute.xlu0 %435  ;;  %v514_v35 = vor.u32 %v513_v25, %v509_v23 }
  0x8a   : > { %v507_v45 = vrot.slane %v505_v38, 1  ;;  %v1603_v46 = vsel %vm454_vm0, %v1584_v34, %v436_v43  ;;  %v440_v47 = vpop.permute.xlu1 %439  ;;  %v521_v38 = vshrl.u32 %v1606_v48, 16 }
  0x8b   : > { %v493_v50 = vshll.u32 %v1603_v46, 16  ;;  %v1612_v51 = vsel %vm454_vm0, %v1592_v37, %v440_v47  ;;  %v484_v52 = vor.u32 %v483_v41, %v479_v40  ;;  %v491_v55 = vshrl.u32 %v1603_v46, 16 }
  0x8c   : > { %v517_v56 = vshll.u32 %v1612_v51, 16  ;;  %v1213_v58 = vcombine.low %v1581_v32, %v1603_v46  ;;  %v515_v61 = vshrl.u32 %v1612_v51, 16  ;;  %v508_v63 = vor.u32 %v507_v45, %v503_v42 }
  0x8d   : > { %v495_v60 = vrot.slane %v493_v50, 1  ;;  %576 = vrot.lane.b32.xlu0 %v484_v52, %s1439_s23  ;;  %v442_v62 = vpop.permute.xlu0 %441  ;;  %v1216_v0 = vcombine.low %v1589_v36, %v1612_v51  ;;  %v535_v40 = vshll.u32 %v1615_v53, 16  ;;  %v533_v45 = vshrl.u32 %v1615_v53, 16 }
  0x8e   : > { %v519_v1 = vrot.slane %v517_v56, 1  ;;  %v1631_v2 = vsel %vm454_vm0, %v1606_v48, %v442_v62  ;;  %v444_v3 = vpop.permute.xlu1 %443  ;;  %v559_v50 = vshll.u32 %v1643_v9, 16 }
  0x8f   : > { %v496_v5 = vor.u32 %v495_v60, %v491_v55  ;;  %v529_v6 = vshll.u32 %v1631_v2, 16  ;;  %v1639_v7 = vsel %vm454_vm0, %v1615_v53, %v444_v3  ;;  %v527_v14 = vshrl.u32 %v1631_v2, 16 }
  0x90   : > { %v1219_v13 = vcombine.low %v1631_v2, %v1639_v7  ;;  %v541_v16 = vshll.u32 %v1639_v7, 16  ;;  %v520_v17 = vor.u32 %v519_v1, %v515_v61  ;;  %v539_v29 = vshrl.u32 %v1639_v7, 16 }
  0x91   : > { %580 = vrot.lane.b32.xlu1 %v496_v5, %s1439_s23  ;;  %v531_v15 = vrot.slane %v529_v6, 1  ;;  %584 = vrot.lane.b32.xlu0 %v508_v63, %s1439_s23  ;;  %v446_v18 = vpop.permute.xlu0 %445  ;;  %v537_v47 = vrot.slane %v535_v40, 1  ;;  %v526_v55 = vor.u32 %v525_v39, %v521_v38  ;;  %v549_v60 = vrot.slane %v547_v49, 1 }
  0x92   : > { %v1657_v20 = vsel %vm454_vm0, %v1634_v4, %v446_v18  ;;  %v448_v21 = vpop.permute.xlu1 %447  ;;  %v543_v30 = vrot.slane %v541_v16, 1  ;;  %v557_v61 = vshrl.u32 %v1643_v9, 16  ;;  %v561_v1 = vrot.slane %v559_v50, 1 }
  0x93   : > { %v1661_v22 = vsel %vm454_vm0, %v1643_v9, %v448_v21  ;;  %v553_v31 = vshll.u32 %v1657_v20, 16  ;;  %v532_v33 = vor.u32 %v531_v15, %v527_v14  ;;  %v551_v41 = vshrl.u32 %v1657_v20, 16 }
  0x94   : > { %v1222_v27 = vcombine.low %v1657_v20, %v1661_v22  ;;  %v565_v43 = vshll.u32 %v1661_v22, 16  ;;  %v544_v44 = vor.u32 %v543_v30, %v539_v29  ;;  %v563_v52 = vshrl.u32 %v1661_v22, 16  ;;  %v1212_v20 = vld [vmem:[%s1769_s3] ss:$0 sm:$0xff] }
  0x95   : > { %588 = vrot.lane.b32.xlu1 %v520_v17, %s1439_s23  ;;  %578 = vrot.lane.b32.xlu0 %v490_v10, %s1439_s23  ;;  %v555_v42 = vrot.slane %v553_v31, 1  ;;  %v538_v63 = vor.u32 %v537_v47, %v533_v45  ;;  %v572_v3 = vshll.u32 %v1390_v57, 16  ;;  %v550_v5 = vor.u32 %v549_v60, %v545_v59 }
  0x96   : > { %v567_v54 = vrot.slane %v565_v43, 1  ;;  %v562_v6 = vor.u32 %v561_v1, %v557_v61 }
  0x97   : > { %v556_v56 = vor.u32 %v555_v42, %v551_v41  ;;  %v574_v10 = vrot.slane %v572_v3, 1 }
  0x98   : > { %v568_v62 = vor.u32 %v567_v54, %v563_v52 }
  0x99   : > { %582 = vrot.lane.b32.xlu1 %v502_v24, %s1439_s23  ;;  %592 = vrot.lane.b32.xlu0 %v532_v33, %s1439_s23  ;;  %v575_v11 = vor.u32 %v574_v10, %v570_v8 }
  0x9d   : > { %596 = vrot.lane.b32.xlu1 %v544_v44, %s1439_s23  ;;  %586 = vrot.lane.b32.xlu0 %v514_v35, %s1439_s23 }
  0xa1   : > { %590 = vrot.lane.b32.xlu1 %v526_v55, %s1439_s23  ;;  %600 = vrot.lane.b32.xlu0 %v556_v56, %s1439_s23 }
  0xa5   : > { %604 = vrot.lane.b32.xlu1 %v568_v62, %s1439_s23  ;;  %594 = vrot.lane.b32.xlu0 %v538_v63, %s1439_s23 }
  0xa9   : > { %598 = vrot.lane.b32.xlu1 %v550_v5, %s1439_s23  ;;  %602 = vrot.lane.b32.xlu0 %v562_v6, %s1439_s23 }
  0xad   : > { %606 = vrot.lane.b32.xlu1 %v575_v11, %s1439_s23 }
  0xff   : > { %v577_v12 = vpop.permute.xlu0 %576 }
 0x100   : > { %v618_v16 = vsel %vm454_vm0, %v1584_v34, %v577_v12 }
 0x103   : > { %v581_v14 = vpop.permute.xlu1 %580  ;;  %v585_v15 = vpop.permute.xlu0 %584 }
 0x104   : > { %v620_v17 = vsel %vm454_vm0, %v1572_v28, %v581_v14  ;;  %v622_v23 = vsel %vm454_vm0, %v1592_v37, %v585_v15 }
 0x105   : > { %v1214_v18 = vcombine.low %v618_v16, %v620_v17 }
 0x107   : > { %v589_v19 = vpop.permute.xlu1 %588  ;;  %928 = vmatprep.mubr.bf16.mxu0 %v1214_v18  ;;  %v579_v21 = vpop.permute.xlu0 %578 }
 0x108   : > { %v624_v24 = vsel %vm454_vm0, %v1606_v48, %v589_v19  ;;  %929 = vmatmul.mubr.bf16.vlgmr.msra.gmra.mrb[0].mxu0 %v1213_v58  ;;  %v609_v28 = vsel %vm454_vm0, %v577_v12, %v579_v21 }
 0x109   : > { %v1217_v25 = vcombine.low %v622_v23, %v624_v24 }
 0x10b   : > { %v583_v26 = vpop.permute.xlu1 %582  ;;  %936 = vmatprep.mubr.bf16.mxu0 %v1217_v25  ;;  %v593_v34 = vpop.permute.xlu0 %592 }
 0x10c   : > { %v610_v29 = vsel %vm454_vm0, %v581_v14, %v583_v26  ;;  %v626_v31 = vsel %vm454_vm0, %v1615_v53, %v593_v34 }
 0x10d   : > { %v1215_v30 = vcombine.low %v609_v28, %v610_v29 }
 0x10f   : > { %v597_v37 = vpop.permute.xlu1 %596  ;;  %1338 = vmatprep.mubr.bf16.mxu1 %v1215_v30  ;;  %v587_v33 = vpop.permute.xlu0 %586 }
 0x110   : > { %v628_v48 = vsel %vm454_vm0, %v1634_v4, %v597_v37  ;;  %937 = vmatmul.mubr.bf16.gmra.mrb[4].mxu0 %v1216_v0  ;;  %v611_v35 = vsel %vm454_vm0, %v585_v15, %v587_v33 }
 0x111   : > { %v1220_v32 = vcombine.low %v626_v31, %v628_v48 }
 0x113   : > { %v591_v46 = vpop.permute.xlu1 %590  ;;  %944 = vmatprep.mubr.bf16.mxu0 %v1220_v32  ;;  %v601_v58 = vpop.permute.xlu0 %600 }
 0x114   : > { %v612_v38 = vsel %vm454_vm0, %v589_v19, %v591_v46  ;;  %v630_v53 = vsel %vm454_vm0, %v1643_v9, %v601_v58 }
 0x115   : > { %v1218_v39 = vcombine.low %v611_v35, %v612_v38 }
 0x117   : > { %v605_v40 = vpop.permute.xlu1 %604  ;;  %1339 = vmatmul.mubr.bf16.vlgmr.msra.gmra.mrb[0].mxu1 %v1218_v39  ;;  %v595_v41 = vpop.permute.xlu0 %594 }
 0x118   : > { %v632_v4 = vsel %vm454_vm0, %v1390_v57, %v605_v40  ;;  %945 = vmatmul.mubr.bf16.gmra.mrb[8].mxu0 %v1219_v13  ;;  %v613_v0 = vsel %vm454_vm0, %v593_v34, %v595_v41 }
 0x119   : > { %v1223_v36 = vcombine.low %v630_v53, %v632_v4 }
 0x11b   : > { %v599_v51 = vpop.permute.xlu1 %598  ;;  %952 = vmatprep.mubr.bf16.mxu0 %v1223_v36  ;;  %v603_v44 = vpop.permute.xlu0 %602 }
 0x11c   : > { %v614_v42 = vsel %vm454_vm0, %v597_v37, %v599_v51  ;;  %v615_v9 = vsel %vm454_vm0, %v601_v58, %v603_v44 }
 0x11d   : > { %v1221_v43 = vcombine.low %v613_v0, %v614_v42 }
 0x11f   : > { %v607_v45 = vpop.permute.xlu1 %606  ;;  %1342 = vmatprep.mubr.bf16.mxu1 %v1221_v43 }
 0x120   : > { %v616_v47 = vsel %vm454_vm0, %v605_v40, %v607_v45  ;;  %953 = vmatmul.mubr.bf16.gmra.mrb[12].mxu0 %v1222_v27 }
 0x121   : > { %v1224_v2 = vcombine.low %v615_v9, %v616_v47 }
 0x123   : > { %1343 = vmatmul.mubr.bf16.gmra.mrb[4].mxu1 %v1224_v2 }
 0x1db   : > { %v1286_v7 = vpop.f32.mrb[0].mxu0 }
 0x1dc   : > { %v1287_v13 = vpop.f32.mrb[1].mxu0 }
 0x1dd   : > { %v1288_v49 = vadd.f32 %v1287_v13, %v1286_v7  ;;  %v1289_v50 = vpop.f32.mrb[2].mxu0 }
 0x1de   : > { %v1290_v52 = vpop.f32.mrb[3].mxu0 }
 0x1df   : > { %v1291_v54 = vadd.f32 %v1290_v52, %v1289_v50  ;;  %v931_v62 = vadd.f32 %v1288_v49, %v1212_v20 }
 0x1e1   : > { %v934_v11 = vadd.f32 %v1291_v54, %v1212_v20 }
 0x1e3   : > { %v1292_v55 = vpop.f32.mrb[4].mxu0 }
 0x1e4   : > { %v1293_v56 = vpop.f32.mrb[5].mxu0 }
 0x1e5   : > { %v1294_v57 = vadd.f32 %v1293_v56, %v1292_v55  ;;  %v1295_v59 = vpop.f32.mrb[6].mxu0 }
 0x1e6   : > { %v1296_v60 = vpop.f32.mrb[7].mxu0 }
 0x1e7   : > { %v1297_v61 = vadd.f32 %v1296_v60, %v1295_v59  ;;  %v939_v22 = vadd.f32 %v1294_v57, %v1212_v20 }
 0x1e9   : > { %v942_v5 = vadd.f32 %v1297_v61, %v1212_v20 }
 0x1ea   : > { %v1340_v27 = vpop.f32.mrb[0].mxu1 }
 0x1eb   : > { %v1004_v63 = vadd.f32 %v1340_v27, %v939_v22  ;;  %v1298_v1 = vpop.f32.mrb[8].mxu0  ;;  %v995_v3 = vpop.f32.mrb[1].mxu1 }
 0x1ec   : > { %v996_v6 = vadd.f32 %v995_v3, %v931_v62  ;;  %v1299_v8 = vpop.f32.mrb[9].mxu0  ;;  %v1341_v10 = vpop.f32.mrb[2].mxu1 }
 0x1ed   : > { %v1028_v12 = vmax.f32 %v1004_v63, 0.0  ;;  %v1300_v14 = vadd.f32 %v1299_v8, %v1298_v1  ;;  %v1007_v15 = vadd.f32 %v1341_v10, %v942_v5  ;;  %v1301_v16 = vpop.f32.mrb[10].mxu0  ;;  %v998_v17 = vpop.f32.mrb[3].mxu1 }
 0x1ee   : > { %v1026_v18 = vmax.f32 %v996_v6, 0.0  ;;  %v999_v19 = vadd.f32 %v998_v17, %v934_v11  ;;  %v1302_v21 = vpop.f32.mrb[11].mxu0 }
 0x1ef   : > { %v1264_v23 = vpack.c.bf16 %v1028_v12, %v1028_v12  ;;  %v1029_v24 = vmax.f32 %v1007_v15, 0.0  ;;  %v1303_v25 = vadd.f32 %v1302_v21, %v1301_v16  ;;  %v947_v46 = vadd.f32 %v1300_v14, %v1212_v20 }
 0x1f0   : > { %v1262_v26 = vpack.c.bf16 %v1026_v18, %v1026_v18  ;;  %v1027_v34 = vmax.f32 %v999_v19, 0.0 }
 0x1f1   : > { %1069 = vst.msk [vmem:[%s1739_s21 + $0x8] sm:$0xf] %vm1066_vm1, %v1264_v23  ;;  %v1265_v28 = vpack.c.bf16 %v1029_v24, %v1029_v24  ;;  %v950_v40 = vadd.f32 %v1303_v25, %v1212_v20 }
 0x1f2   : > { %1067 = vst.msk [vmem:[%s1739_s21] sm:$0xf] %vm1066_vm1, %v1262_v26  ;;  %v1263_v29 = vpack.c.bf16 %v1027_v34, %v1027_v34 }
 0x1f3   : > { %1070 = vst.msk [vmem:[%s1739_s21 + $0xc] sm:$0xf] %vm1066_vm1, %v1265_v28  ;;  %v1304_v30 = vpop.f32.mrb[12].mxu0 }
 0x1f4   : > { %1068 = vst.msk [vmem:[%s1739_s21 + $0x4] sm:$0xf] %vm1066_vm1, %v1263_v29  ;;  %v1305_v31 = vpop.f32.mrb[13].mxu0 }
 0x1f5   : > { %v1306_v37 = vadd.f32 %v1305_v31, %v1304_v30  ;;  %v1307_v33 = vpop.f32.mrb[14].mxu0 }
 0x1f6   : > { %v1308_v48 = vpop.f32.mrb[15].mxu0  ;;  %v1344_v32 = vpop.f32.mrb[4].mxu1 }
 0x1f7   : > { %v1309_v58 = vadd.f32 %v1308_v48, %v1307_v33  ;;  %v955_v35 = vadd.f32 %v1306_v37, %v1212_v20  ;;  %v1011_v38 = vpop.f32.mrb[5].mxu1 }
 0x1f8   : > { %v1012_v39 = vadd.f32 %v1011_v38, %v947_v46  ;;  %v1345_v53 = vpop.f32.mrb[6].mxu1 }
 0x1f9   : > { %v1020_v41 = vadd.f32 %v1344_v32, %v955_v35  ;;  %v958_v4 = vadd.f32 %v1309_v58, %v1212_v20  ;;  %v1014_v36 = vpop.f32.mrb[7].mxu1 }
 0x1fa   : > { %v1030_v51 = vmax.f32 %v1012_v39, 0.0  ;;  %v1015_v0 = vadd.f32 %v1014_v36, %v950_v40 }
 0x1fb   : > { %v1032_v42 = vmax.f32 %v1020_v41, 0.0  ;;  %v1023_v43 = vadd.f32 %v1345_v53, %v958_v4 }
 0x1fc   : > { %v1266_v44 = vpack.c.bf16 %v1030_v51, %v1030_v51  ;;  %v1031_v45 = vmax.f32 %v1015_v0, 0.0 }
 0x1fd   : > { %v1268_v9 = vpack.c.bf16 %v1032_v42, %v1032_v42  ;;  %v1033_v47 = vmax.f32 %v1023_v43, 0.0 }
 0x1fe   : > { %1071 = vst.msk [vmem:[%s1739_s21 + $0x10] sm:$0xf] %vm1066_vm1, %v1266_v44  ;;  %v1267_v2 = vpack.c.bf16 %v1031_v45, %v1031_v45 }
 0x1ff   : > { %1073 = vst.msk [vmem:[%s1739_s21 + $0x18] sm:$0xf] %vm1066_vm1, %v1268_v9  ;;  %v1269_v7 = vpack.c.bf16 %v1033_v47, %v1033_v47 }
 0x200   : > { %1072 = vst.msk [vmem:[%s1739_s21 + $0x14] sm:$0xf] %vm1066_vm1, %v1267_v2 }
 0x201   : > { %1074 = vst.msk [vmem:[%s1739_s21 + $0x1c] sm:$0xf] %vm1066_vm1, %v1269_v7 }
 0x202 PF: > { %s14_s17 = sadd.s32 1, %s1437_s17   ;;  %s1771_s15 = smov %s1433_s16 }
 0x203   : > { %p11_p5 = scmp.ge.s32.totalorder %s14_s17, 4   ;;  %s1772_s16 = smov %s1774_s18 }
 0x205   :  { %13 = sbr.rel (!%p11_p5) target bundleno = 2 (0x2), region = 69 }

// kernel: hrnet_forward.11
= control target key start
LH: loop header
LB: loop body
LE: loop exit
PB: predicated region body
PF: predicated region fallthrough
CT: control target
= control target key end

     0   :  { %v348_v1 = vmov 0.0   ;;  %vm349_vm0 = vmmov 0   ;;  %vm178_vm1 = vcmask 261120   ;;  %vm263_vm2 = vcmask 257024   ;;  %s436_s1 = inlined_call_operand.vmem [shape: bf16[288,32], index: 1, kind: input, shape index: {}]   ;;  %s437_s0 = inlined_call_operand.vmem [shape: bf16[8,288], index: 0, kind: input, shape index: {}]   ;;  %s438_s2 = inlined_call_operand.vmem [shape: f32[1,32], index: 2, kind: input, shape index: {}]   ;;  %s439_s3 = inlined_call_operand.vmem [shape: bf16[8,32], index: 3, kind: output, shape index: {}]  }
   0x1   :  { %v327_v0 = vld [vmem:[%s436_s1 + $0x40] sm:$0xff]   ;;  %317 = vmatprep.subr.bf16.mxu1 %v348_v1  ;;  %321 = vmatprep.mubr.msk.bf16.mxu1 %vm349_vm0, %v348_v1  ;;  %v329_v3 = vld [vmem:[%s436_s1 + $0x48] sm:$0xff]   ;;  %v331_v5 = vld [vmem:[%s436_s1 + $0x50] sm:$0xff]  }
   0x2   :  { %v328_v2 = vld [vmem:[%s436_s1] sm:$0xff]   ;;  %292 = vmatprep.subr.bf16.mxu0 %v327_v0  ;;  %v330_v4 = vld [vmem:[%s436_s1 + $0x8] sm:$0xff]   ;;  %v332_v6 = vld [vmem:[%s436_s1 + $0x10] sm:$0xff]  }
   0x3   :  { %293 = vmatpush3.bf16.msra.mxu0 %v328_v2  ;;  %v333_v7 = vld [vmem:[%s436_s1 + $0x58] sm:$0xff]   ;;  %v335_v9 = vld [vmem:[%s436_s1 + $0x60] sm:$0xff]   ;;  %v337_v12 = vld [vmem:[%s436_s1 + $0x68] sm:$0xff]  }
   0x4   :  { %294 = vmatprep.subr.bf16.mxu0 %v329_v3  ;;  %v334_v8 = vld [vmem:[%s436_s1 + $0x18] sm:$0xff]   ;;  %v341_v10 = vld [vmem:[%s436_s1 + $0x80] sm:$0xff]   ;;  %v347_v15 = vld [vmem:[%s436_s1 + $0x88] sm:$0xff]  }
   0x5   :  { %v336_v11 = vld [vmem:[%s436_s1 + $0x20] sm:$0xff]   ;;  %318 = vmatpush3.bf16.msra.mxu1 %v341_v10  ;;  %v338_v16 = vld [vmem:[%s436_s1 + $0x28] sm:$0xff]   ;;  %v339_v17 = vld [vmem:[%s436_s1 + $0x70] sm:$0xff]  }
   0x6   :  { %319 = vmatprep.subr.bf16.mxu1 %v348_v1  ;;  %v15_v13 = vld [vmem:[%s437_s0] sm:$0xff]  ;;  %v346_v18 = vld [vmem:[%s437_s0 + $0x8] ss:$0 sps:$4 sm:$0xff]   ;;  %v340_v19 = vld [vmem:[%s436_s1 + $0x30] sm:$0xff]  }
   0x7   :  { %295 = vmatpush3.bf16.msra.mxu0 %v330_v4  ;;  %v271_v14 = vcombine.high %v15_v13, %v15_v13  ;;  %v342_v20 = vld [vmem:[%s436_s1 + $0x78] sm:$0xff]   ;;  %v270_v22 = vcombine.low %v15_v13, %v15_v13  ;;  %v269_v29 = vld [vmem:[%s438_s2] ss:$0 sm:$0xff] }
   0x8   :  { %296 = vmatprep.subr.bf16.mxu0 %v331_v5  ;;  %v343_v21 = vld [vmem:[%s436_s1 + $0x38] sm:$0xff]  }
   0x9   :  { %214 = vmatprep.mubr.bf16.mxu0 %v271_v14  ;;  %320 = vmatpush3.bf16.msra.mxu1 %v347_v15 }
   0xb   :  { %297 = vmatpush3.bf16.msra.mxu0 %v332_v6 }
   0xc   :  { %298 = vmatprep.subr.bf16.mxu0 %v333_v7  ;;  %322 = vmatmul.mubr.msk.bf16.vlgmr.msra.gmra.mrb[0].mxu1 %vm178_vm1, %v346_v18 }
   0xf   :  { %299 = vmatpush3.bf16.msra.mxu0 %v334_v8 }
  0x10   :  { %300 = vmatprep.subr.bf16.mxu0 %v335_v9 }
  0x13   :  { %301 = vmatpush3.bf16.msra.mxu0 %v336_v11 }
  0x14   :  { %302 = vmatprep.subr.bf16.mxu0 %v337_v12 }
  0x17   :  { %303 = vmatpush3.bf16.msra.mxu0 %v338_v16 }
  0x18   :  { %304 = vmatprep.subr.bf16.mxu0 %v339_v17 }
  0x1b   :  { %305 = vmatpush3.bf16.msra.mxu0 %v340_v19 }
  0x1c   :  { %306 = vmatprep.subr.bf16.mxu0 %v342_v20 }
  0x1f   :  { %307 = vmatpush3.bf16.msra.mxu0 %v343_v21 }
  0x22   :  { %215 = vmatmul.mubr.bf16.vlgmr.msra.gmra.mrb[0].mxu0 %v270_v22 }
  0xdf   :  { %v256_v23 = vpop.f32.mrb[0].mxu1 }
  0xe0   :  { %v323_v24 = vpop.f32.mrb[1].mxu1 }
  0xe1   :  { %v259_v25 = vpop.f32.mrb[2].mxu1 }
  0xe2   :  { %v324_v26 = vpop.f32.mrb[3].mxu1 }
  0xf5   :  { %v308_v27 = vpop.f32.mrb[0].mxu0 }
  0xf6   :  { %v309_v28 = vpop.f32.mrb[1].mxu0 }
  0xf7   :  { %v310_v30 = vadd.f32 %v309_v28, %v308_v27  ;;  %v311_v31 = vpop.f32.mrb[2].mxu0 }
  0xf8   :  { %v312_v32 = vpop.f32.mrb[3].mxu0 }
  0xf9   :  { %v217_v33 = vadd.f32 %v310_v30, %v269_v29 }
  0xfb   :  { %v257_v34 = vadd.f32 %v256_v23, %v217_v33 }
  0xfd   :  { %v262_v35 = vpack.c.bf16 %v257_v34, %v257_v34 }
  0xff   :  { %264 = vst.msk [vmem:[%s439_s3] sm:$0xf] %vm263_vm2, %v262_v35 }

// kernel: hrnet_forward.9
= control target key start
LH: loop header
LB: loop body
LE: loop exit
PB: predicated region body
PF: predicated region fallthrough
CT: control target
= control target key end

     0   :  { %vm219_vm0 = vcmask 261120   ;;  %vm340_vm1 = vcmask 257024   ;;  %s1468_s1 = inlined_call_operand.vmem [shape: bf16[288,32], index: 1, kind: input, shape index: {}]   ;;  %s1469_s3 = inlined_call_operand.vmem [shape: bf16[288,32], index: 3, kind: input, shape index: {}]   ;;  %s1470_s0 = inlined_call_operand.vmem [shape: bf16[32,288], index: 0, kind: input, shape index: {}]   ;;  %s1471_s5 = inlined_call_operand.vmem [shape: bf16[288,32], index: 5, kind: input, shape index: {}]   ;;  %s1472_s2 = inlined_call_operand.vmem [shape: f32[1,32], index: 2, kind: input, shape index: {}, may-alias: {2,4,6}]   ;;  %s1473_s4 = inlined_call_operand.vmem [shape: f32[1,32], index: 4, kind: input, shape index: {}, may-alias: {2,4,6}]   ;;  %s1474_s7 = inlined_call_operand.vmem [shape: bf16[32,32], index: 7, kind: output, shape index: {0}]   ;;  %s1475_s8 = inlined_call_operand.vmem [shape: bf16[32,32], index: 8, kind: output, shape index: {1}]   ;;  %s1476_s6 = inlined_call_operand.vmem [shape: f32[1,32], index: 6, kind: input, shape index: {}, may-alias: {2,4,6}]   ;;  %s1477_s9 = inlined_call_operand.vmem [shape: bf16[32,32], index: 9, kind: output, shape index: {2}]  }
   0x1   :  { %v1108_v0 = vld [vmem:[%s1468_s1 + $0x40] sm:$0xff]   ;;  %v1112_v4 = vld [vmem:[%s1468_s1 + $0x48] sm:$0xff]   ;;  %v1116_v8 = vld [vmem:[%s1468_s1 + $0x50] sm:$0xff]  }
   0x2   :  { %v1109_v1 = vld [vmem:[%s1469_s3 + $0x40] sm:$0xff]   ;;  %988 = vmatprep.subr.bf16.mxu0 %v1108_v0  ;;  %v1113_v5 = vld [vmem:[%s1469_s3 + $0x48] sm:$0xff]   ;;  %v1117_v9 = vld [vmem:[%s1469_s3 + $0x50] sm:$0xff]  }
   0x3   :  { %v1110_v2 = vld [vmem:[%s1468_s1] sm:$0xff]   ;;  %1020 = vmatprep.subr.bf16.mxu1 %v1109_v1  ;;  %v1114_v6 = vld [vmem:[%s1468_s1 + $0x8] sm:$0xff]   ;;  %v1118_v10 = vld [vmem:[%s1468_s1 + $0x10] sm:$0xff]  }
   0x4   :  { %v1111_v3 = vld [vmem:[%s1469_s3] sm:$0xff]   ;;  %989 = vmatpush3.bf16.msra.mxu0 %v1110_v2  ;;  %v1115_v7 = vld [vmem:[%s1469_s3 + $0x8] sm:$0xff]   ;;  %v1119_v11 = vld [vmem:[%s1469_s3 + $0x10] sm:$0xff]  }
   0x5   :  { %1021 = vmatpush3.bf16.msra.mxu1 %v1111_v3  ;;  %990 = vmatprep.subr.bf16.mxu0 %v1112_v4  ;;  %v1120_v12 = vld [vmem:[%s1468_s1 + $0x58] sm:$0xff]   ;;  %v1124_v16 = vld [vmem:[%s1468_s1 + $0x60] sm:$0xff]   ;;  %v1128_v20 = vld [vmem:[%s1468_s1 + $0x68] sm:$0xff]  }
   0x6   :  { %1022 = vmatprep.subr.bf16.mxu1 %v1113_v5  ;;  %v1121_v13 = vld [vmem:[%s1469_s3 + $0x58] sm:$0xff]   ;;  %v1125_v17 = vld [vmem:[%s1469_s3 + $0x60] sm:$0xff]   ;;  %v1129_v21 = vld [vmem:[%s1469_s3 + $0x68] sm:$0xff]  }
   0x7   :  { %v1122_v14 = vld [vmem:[%s1468_s1 + $0x18] sm:$0xff]   ;;  %v1126_v18 = vld [vmem:[%s1468_s1 + $0x20] sm:$0xff]   ;;  %v1130_v22 = vld [vmem:[%s1468_s1 + $0x28] sm:$0xff]  }
   0x8   :  { %991 = vmatpush3.bf16.msra.mxu0 %v1114_v6  ;;  %v1123_v15 = vld [vmem:[%s1469_s3 + $0x18] sm:$0xff]   ;;  %v1127_v19 = vld [vmem:[%s1469_s3 + $0x20] sm:$0xff]   ;;  %v1131_v23 = vld [vmem:[%s1469_s3 + $0x28] sm:$0xff]  }
   0x9   :  { %1023 = vmatpush3.bf16.msra.mxu1 %v1115_v7  ;;  %992 = vmatprep.subr.bf16.mxu0 %v1116_v8  ;;  %v1132_v24 = vld [vmem:[%s1468_s1 + $0x70] sm:$0xff]   ;;  %v1136_v28 = vld [vmem:[%s1468_s1 + $0x78] sm:$0xff]   ;;  %v1322_v33 = vld [vmem:[%s1470_s0] ss:$12 sps:$4 sm:$0xff]  }
   0xa   :  { %1024 = vmatprep.subr.bf16.mxu1 %v1117_v9  ;;  %v1133_v25 = vld [vmem:[%s1469_s3 + $0x70] sm:$0xff]   ;;  %v1137_v29 = vld [vmem:[%s1469_s3 + $0x78] sm:$0xff]   ;;  %v1143_v34 = vld [vmem:[%s1471_s5 + $0x40] sm:$0xff]  }
   0xb   :  { %v1134_v26 = vld [vmem:[%s1468_s1 + $0x30] sm:$0xff]   ;;  %v1138_v30 = vld [vmem:[%s1468_s1 + $0x38] sm:$0xff]   ;;  %v1144_v35 = vld [vmem:[%s1471_s5] sm:$0xff]  }
   0xc   :  { %993 = vmatpush3.bf16.msra.mxu0 %v1118_v10  ;;  %v1135_v27 = vld [vmem:[%s1469_s3 + $0x30] sm:$0xff]   ;;  %v1139_v31 = vld [vmem:[%s1469_s3 + $0x38] sm:$0xff]   ;;  %v1145_v36 = vld [vmem:[%s1471_s5 + $0x48] sm:$0xff]  }
   0xd   :  { %1025 = vmatpush3.bf16.msra.mxu1 %v1119_v11  ;;  %994 = vmatprep.subr.bf16.mxu0 %v1120_v12  ;;  %v1140_v32 = vld [vmem:[%s1470_s0 + $0x4] ss:$12 sps:$4 sm:$0xff]   ;;  %v1146_v37 = vld [vmem:[%s1471_s5 + $0x8] sm:$0xff]   ;;  %v1154_v44 = vld [vmem:[%s1471_s5 + $0x58] sm:$0xff]  }
   0xe   :  { %1026 = vmatprep.subr.bf16.mxu1 %v1121_v13  ;;  %258 = vmatprep.mubr.bf16.mxu0 %v1140_v32  ;;  %v1147_v38 = vld [vmem:[%s1470_s0 + $0x1c] ss:$12 sps:$4 sm:$0xff]   ;;  %v1149_v39 = vld [vmem:[%s1470_s0 + $0x18] ss:$12 sps:$4 sm:$0xff]   ;;  %v1151_v41 = vld [vmem:[%s1471_s5 + $0x50] sm:$0xff]  }
   0xf   :  { %528 = vmatprep.mubr.bf16.mxu1 %v1140_v32  ;;  %v1150_v40 = vld [vmem:[%s1468_s1 + $0x80] sm:$0xff]   ;;  %v1152_v42 = vld [vmem:[%s1471_s5 + $0x10] sm:$0xff]   ;;  %v1153_v43 = vld [vmem:[%s1468_s1 + $0x88] sm:$0xff]  }
  0x10   :  { %995 = vmatpush3.bf16.msra.mxu0 %v1122_v14  ;;  %v1155_v45 = vld [vmem:[%s1471_s5 + $0x18] sm:$0xff]   ;;  %v1156_v46 = vld [vmem:[%s1470_s0 + $0x8] ss:$12 sps:$4 sm:$0xff]   ;;  %v1157_v47 = vld [vmem:[%s1470_s0 + $0x20] ss:$12 sps:$4 sm:$0xff]  }
  0x11   :  { %1027 = vmatpush3.bf16.msra.mxu1 %v1123_v15  ;;  %996 = vmatprep.subr.bf16.mxu0 %v1124_v16  ;;  %v1158_v48 = vld [vmem:[%s1469_s3 + $0x80] sm:$0xff]   ;;  %v1161_v51 = vld [vmem:[%s1469_s3 + $0x88] sm:$0xff]   ;;  %v1164_v54 = vld [vmem:[%s1471_s5 + $0x70] sm:$0xff]  }
  0x12   :  { %1028 = vmatprep.subr.bf16.mxu1 %v1125_v17  ;;  %v1159_v49 = vld [vmem:[%s1471_s5 + $0x60] sm:$0xff]   ;;  %v1162_v52 = vld [vmem:[%s1471_s5 + $0x68] sm:$0xff]   ;;  %v1165_v56 = vld [vmem:[%s1471_s5 + $0x30] sm:$0xff]  }
  0x13   :  { %v1160_v50 = vld [vmem:[%s1471_s5 + $0x20] sm:$0xff]   ;;  %v1163_v53 = vld [vmem:[%s1471_s5 + $0x28] sm:$0xff]   ;;  %v1166_v57 = vld [vmem:[%s1471_s5 + $0x78] sm:$0xff]  }
  0x14   :  { %997 = vmatpush3.bf16.msra.mxu0 %v1126_v18  ;;  %v1167_v55 = vld [vmem:[%s1471_s5 + $0x80] sm:$0xff]   ;;  %v1169_v58 = vld [vmem:[%s1471_s5 + $0x88] sm:$0xff]   ;;  %v1168_v59 = vld [vmem:[%s1471_s5 + $0x38] sm:$0xff]  }
  0x15   :  { %1029 = vmatpush3.bf16.msra.mxu1 %v1127_v19  ;;  %998 = vmatprep.subr.bf16.mxu0 %v1128_v20  ;;  %v895_v15 = vld [vmem:[%s1472_s2] ss:$0 sm:$0xff] }
  0x16   :  { %1030 = vmatprep.subr.bf16.mxu1 %v1129_v21 }
  0x18   :  { %999 = vmatpush3.bf16.msra.mxu0 %v1130_v22 }
  0x19   :  { %1031 = vmatpush3.bf16.msra.mxu1 %v1131_v23  ;;  %1000 = vmatprep.subr.bf16.mxu0 %v1132_v24 }
  0x1a   :  { %1032 = vmatprep.subr.bf16.mxu1 %v1133_v25 }
  0x1c   :  { %1001 = vmatpush3.bf16.msra.mxu0 %v1134_v26 }
  0x1d   :  { %1033 = vmatpush3.bf16.msra.mxu1 %v1135_v27  ;;  %1002 = vmatprep.subr.bf16.mxu0 %v1136_v28 }
  0x1e   :  { %1034 = vmatprep.subr.bf16.mxu1 %v1137_v29 }
  0x20   :  { %1003 = vmatpush3.bf16.msra.mxu0 %v1138_v30 }
  0x21   :  { %1035 = vmatpush3.bf16.msra.mxu1 %v1139_v31  ;;  %1084 = vmatprep.subr.bf16.mxu0 %v1150_v40 }
  0x22   :  { %1052 = vmatprep.subr.bf16.mxu1 %v1143_v34 }
  0x23   :  { %259 = vmatmul.mubr.bf16.vlgmr.msra.gmra.mrb[0].mxu0 %v1322_v33 }
  0x24   :  { %529 = vmatmul.mubr.bf16.vlgmr.msra.gmra.mrb[0].mxu1 %v1322_v33  ;;  %266 = vmatprep.mubr.bf16.mxu0 %v1147_v38 }
  0x25   :  { %1053 = vmatpush3.bf16.msra.mxu1 %v1144_v35  ;;  %536 = vmatprep.mubr.bf16.mxu1 %v1147_v38  ;;  %v926_v35 = vld [vmem:[%s1473_s4] ss:$0 sm:$0xff] }
  0x26   :  { %1054 = vmatprep.subr.bf16.mxu1 %v1145_v36  ;;  %1085 = vmatpush3.bf16.msra.mxu0 %v1150_v40 }
  0x27   :  { %1086 = vmatprep.subr.bf16.mxu0 %v1153_v43 }
  0x29   :  { %1055 = vmatpush3.bf16.msra.mxu1 %v1146_v37 }
  0x2a   :  { %1056 = vmatprep.subr.bf16.mxu1 %v1151_v41  ;;  %1087 = vmatpush3.bf16.msra.mxu0 %v1153_v43 }
  0x2b   :  { %267 = vmatmul.mubr.bf16.gmra.mrb[4].mxu0 %v1149_v39  ;;  %1092 = vmatprep.subr.bf16.mxu0 %v1158_v48 }
  0x2c   :  { %537 = vmatmul.mubr.bf16.gmra.mrb[4].mxu1 %v1149_v39  ;;  %1088 = vmatprep.mubr.msk.bf16.mxu0 %vm219_vm0, %v1156_v46 }
  0x2d   :  { %1057 = vmatpush3.bf16.msra.mxu1 %v1152_v42  ;;  %797 = vmatprep.mubr.bf16.mxu1 %v1140_v32 }
  0x2e   :  { %1058 = vmatprep.subr.bf16.mxu1 %v1154_v44 }
  0x31   :  { %1059 = vmatpush3.bf16.msra.mxu1 %v1155_v45 }
  0x32   :  { %1060 = vmatprep.subr.bf16.mxu1 %v1159_v49 }
  0x33   :  { %1089 = vmatmul.mubr.msk.bf16.vlgmr.msra.gmra.mrb[8].mxu0 %vm219_vm0, %v1157_v47 }
  0x34   :  { %1093 = vmatpush3.bf16.msra.mxu0 %v1158_v48  ;;  %1096 = vmatprep.mubr.msk.bf16.mxu0 %vm219_vm0, %v1156_v46 }
  0x35   :  { %1061 = vmatpush3.bf16.msra.mxu1 %v1160_v50  ;;  %1094 = vmatprep.subr.bf16.mxu0 %v1161_v51 }
  0x36   :  { %1062 = vmatprep.subr.bf16.mxu1 %v1162_v52 }
  0x38   :  { %1095 = vmatpush3.bf16.msra.mxu0 %v1161_v51 }
  0x39   :  { %1063 = vmatpush3.bf16.msra.mxu1 %v1163_v53  ;;  %1100 = vmatprep.subr.bf16.mxu0 %v1167_v55 }
  0x3a   :  { %1064 = vmatprep.subr.bf16.mxu1 %v1164_v54 }
  0x3b   :  { %1097 = vmatmul.mubr.msk.bf16.vlgmr.msra.gmra.mrb[12].mxu0 %vm219_vm0, %v1157_v47 }
  0x3c   :  { %1101 = vmatpush3.bf16.msra.mxu0 %v1167_v55  ;;  %1104 = vmatprep.mubr.msk.bf16.mxu0 %vm219_vm0, %v1156_v46 }
  0x3d   :  { %1065 = vmatpush3.bf16.msra.mxu1 %v1165_v56  ;;  %1102 = vmatprep.subr.bf16.mxu0 %v1169_v58 }
  0x3e   :  { %1066 = vmatprep.subr.bf16.mxu1 %v1166_v57 }
  0x40   :  { %1103 = vmatpush3.bf16.msra.mxu0 %v1169_v58  ;;  %v951_v58 = vld [vmem:[%s1476_s6] ss:$0 sm:$0xff] }
  0x41   :  { %1067 = vmatpush3.bf16.msra.mxu1 %v1168_v59 }
  0x43   :  { %1105 = vmatmul.mubr.msk.bf16.vlgmr.msra.gmra.mrb[16].mxu0 %vm219_vm0, %v1157_v47 }
  0x44   :  { %798 = vmatmul.mubr.bf16.vlgmr.msra.gmra.mrb[8].mxu1 %v1322_v33 }
  0x45   :  { %805 = vmatprep.mubr.bf16.mxu1 %v1147_v38 }
  0x4c   :  { %806 = vmatmul.mubr.bf16.gmra.mrb[12].mxu1 %v1149_v39 }
  0xf6   :  { %v1004_v60 = vpop.f32.mrb[0].mxu0 }
  0xf7   :  { %v1036_v61 = vpop.f32.mrb[0].mxu1  ;;  %v1005_v62 = vpop.f32.mrb[1].mxu0 }
  0xf8   :  { %v1037_v63 = vpop.f32.mrb[1].mxu1  ;;  %v1006_v0 = vadd.f32 %v1005_v62, %v1004_v60  ;;  %v1007_v1 = vpop.f32.mrb[2].mxu0 }
  0xf9   :  { %v1038_v2 = vadd.f32 %v1037_v63, %v1036_v61  ;;  %v1039_v3 = vpop.f32.mrb[2].mxu1  ;;  %v1008_v4 = vpop.f32.mrb[3].mxu0 }
  0xfa   :  { %v1040_v5 = vpop.f32.mrb[3].mxu1  ;;  %v1009_v6 = vadd.f32 %v1008_v4, %v1007_v1  ;;  %v261_v22 = vadd.f32 %v1006_v0, %v895_v15 }
  0xfb   :  { %v1041_v7 = vadd.f32 %v1040_v5, %v1039_v3  ;;  %v531_v41 = vadd.f32 %v1038_v2, %v926_v35 }
  0xfc   :  { %v264_v29 = vadd.f32 %v1009_v6, %v895_v15 }
  0xfd   :  { %v534_v46 = vadd.f32 %v1041_v7, %v926_v35 }
  0xfe   :  { %v1010_v8 = vpop.f32.mrb[4].mxu0 }
  0xff   :  { %v1011_v9 = vpop.f32.mrb[5].mxu0  ;;  %v1042_v10 = vpop.f32.mrb[4].mxu1 }
 0x100   :  { %v1012_v11 = vadd.f32 %v1011_v9, %v1010_v8  ;;  %v1013_v12 = vpop.f32.mrb[6].mxu0  ;;  %v1043_v13 = vpop.f32.mrb[5].mxu1 }
 0x101   :  { %v1014_v14 = vpop.f32.mrb[7].mxu0  ;;  %v1044_v16 = vadd.f32 %v1043_v13, %v1042_v10  ;;  %v1045_v17 = vpop.f32.mrb[6].mxu1 }
 0x102   :  { %v1015_v18 = vadd.f32 %v1014_v14, %v1013_v12  ;;  %v1046_v19 = vpop.f32.mrb[7].mxu1  ;;  %v269_v20 = vadd.f32 %v1012_v11, %v895_v15 }
 0x103   :  { %v1047_v21 = vadd.f32 %v1046_v19, %v1045_v17  ;;  %v539_v37 = vadd.f32 %v1044_v16, %v926_v35 }
 0x104   :  { %v272_v23 = vadd.f32 %v1015_v18, %v895_v15 }
 0x105   :  { %v542_v39 = vadd.f32 %v1047_v21, %v926_v35 }
 0x106   :  { %v1090_v24 = vpop.f32.mrb[8].mxu0 }
 0x107   :  { %v318_v25 = vadd.f32 %v1090_v24, %v269_v20  ;;  %v309_v26 = vpop.f32.mrb[9].mxu0 }
 0x108   :  { %v310_v27 = vadd.f32 %v309_v26, %v261_v22  ;;  %v1091_v28 = vpop.f32.mrb[10].mxu0 }
 0x109   :  { %v978_v30 = vpack.c.bf16 %v318_v25, %v318_v25  ;;  %v321_v31 = vadd.f32 %v1091_v28, %v272_v23  ;;  %v312_v32 = vpop.f32.mrb[11].mxu0 }
 0x10a   :  { %v976_v33 = vpack.c.bf16 %v310_v27, %v310_v27  ;;  %v313_v34 = vadd.f32 %v312_v32, %v264_v29 }
 0x10b   :  { %343 = vst.msk [vmem:[%s1474_s7 + $0x8] sm:$0xf] %vm340_vm1, %v978_v30  ;;  %v979_v36 = vpack.c.bf16 %v321_v31, %v321_v31 }
 0x10c   :  { %341 = vst.msk [vmem:[%s1474_s7] sm:$0xf] %vm340_vm1, %v976_v33  ;;  %v977_v38 = vpack.c.bf16 %v313_v34, %v313_v34 }
 0x10d   :  { %344 = vst.msk [vmem:[%s1474_s7 + $0xc] sm:$0xf] %vm340_vm1, %v979_v36 }
 0x10e   :  { %342 = vst.msk [vmem:[%s1474_s7 + $0x4] sm:$0xf] %vm340_vm1, %v977_v38  ;;  %v1098_v40 = vpop.f32.mrb[12].mxu0 }
 0x10f   :  { %v588_v42 = vadd.f32 %v1098_v40, %v539_v37  ;;  %v579_v43 = vpop.f32.mrb[13].mxu0 }
 0x110   :  { %v580_v44 = vadd.f32 %v579_v43, %v531_v41  ;;  %v1099_v45 = vpop.f32.mrb[14].mxu0 }
 0x111   :  { %v982_v47 = vpack.c.bf16 %v588_v42, %v588_v42  ;;  %v591_v48 = vadd.f32 %v1099_v45, %v542_v39  ;;  %v582_v49 = vpop.f32.mrb[15].mxu0 }
 0x112   :  { %v980_v50 = vpack.c.bf16 %v580_v44, %v580_v44  ;;  %v583_v51 = vadd.f32 %v582_v49, %v534_v46 }
 0x113   :  { %612 = vst.msk [vmem:[%s1475_s8 + $0x8] sm:$0xf] %vm340_vm1, %v982_v47  ;;  %v983_v52 = vpack.c.bf16 %v591_v48, %v591_v48 }
 0x114   :  { %610 = vst.msk [vmem:[%s1475_s8] sm:$0xf] %vm340_vm1, %v980_v50  ;;  %v981_v53 = vpack.c.bf16 %v583_v51, %v583_v51 }
 0x115   :  { %613 = vst.msk [vmem:[%s1475_s8 + $0xc] sm:$0xf] %vm340_vm1, %v983_v52 }
 0x116   :  { %611 = vst.msk [vmem:[%s1475_s8 + $0x4] sm:$0xf] %vm340_vm1, %v981_v53  ;;  %v1106_v54 = vpop.f32.mrb[16].mxu0 }
 0x117   :  { %v1068_v55 = vpop.f32.mrb[8].mxu1  ;;  %v848_v56 = vpop.f32.mrb[17].mxu0 }
 0x118   :  { %v1069_v57 = vpop.f32.mrb[9].mxu1  ;;  %v1107_v59 = vpop.f32.mrb[18].mxu0 }
 0x119   :  { %v1070_v60 = vadd.f32 %v1069_v57, %v1068_v55  ;;  %v1071_v61 = vpop.f32.mrb[10].mxu1  ;;  %v851_v62 = vpop.f32.mrb[19].mxu0 }
 0x11a   :  { %v1072_v63 = vpop.f32.mrb[11].mxu1 }
 0x11b   :  { %v1073_v0 = vadd.f32 %v1072_v63, %v1071_v61  ;;  %v800_v1 = vadd.f32 %v1070_v60, %v951_v58 }
 0x11d   :  { %v849_v2 = vadd.f32 %v848_v56, %v800_v1  ;;  %v803_v3 = vadd.f32 %v1073_v0, %v951_v58 }
 0x11f   :  { %v984_v4 = vpack.c.bf16 %v849_v2, %v849_v2  ;;  %v852_v5 = vadd.f32 %v851_v62, %v803_v3  ;;  %v1074_v6 = vpop.f32.mrb[12].mxu1 }
 0x120   :  { %v1075_v7 = vpop.f32.mrb[13].mxu1 }
 0x121   :  { %879 = vst.msk [vmem:[%s1477_s9] sm:$0xf] %vm340_vm1, %v984_v4  ;;  %v985_v8 = vpack.c.bf16 %v852_v5, %v852_v5  ;;  %v1076_v9 = vadd.f32 %v1075_v7, %v1074_v6  ;;  %v1077_v10 = vpop.f32.mrb[14].mxu1 }
 0x122   :  { %v1078_v11 = vpop.f32.mrb[15].mxu1 }
 0x123   :  { %880 = vst.msk [vmem:[%s1477_s9 + $0x4] sm:$0xf] %vm340_vm1, %v985_v8  ;;  %v808_v12 = vadd.f32 %v1076_v9, %v951_v58  ;;  %v1079_v13 = vadd.f32 %v1078_v11, %v1077_v10 }
 0x125   :  { %v857_v14 = vadd.f32 %v1106_v54, %v808_v12  ;;  %v811_v15 = vadd.f32 %v1079_v13, %v951_v58 }
 0x127   :  { %v986_v16 = vpack.c.bf16 %v857_v14, %v857_v14  ;;  %v860_v17 = vadd.f32 %v1107_v59, %v811_v15 }
 0x129   :  { %881 = vst.msk [vmem:[%s1477_s9 + $0x8] sm:$0xf] %vm340_vm1, %v986_v16  ;;  %v987_v18 = vpack.c.bf16 %v860_v17, %v860_v17 }
 0x12b   :  { %882 = vst.msk [vmem:[%s1477_s9 + $0xc] sm:$0xf] %vm340_vm1, %v987_v18 }

// kernel: hrnet_forward.13
= control target key start
LH: loop header
LB: loop body
LE: loop exit
PB: predicated region body
PF: predicated region fallthrough
CT: control target
= control target key end

     0   :  { %s1324_s27 = smov 0   ;;  %s1326_s28 = smov 0   ;;  %s1475_s0 = inlined_call_operand.vmem [shape: bf16[2,8,8,32], index: 0, kind: input, shape index: {}]   ;;  %s1476_s1 = inlined_call_operand.vmem [shape: bf16[2,4,8,32], index: 1, kind: input, shape index: {}]   ;;  %s1477_s2 = inlined_call_operand.vmem [shape: bf16[2,2,8,32], index: 2, kind: input, shape index: {}]   ;;  %s1478_s3 = inlined_call_operand.vmem [shape: bf16[2,1,8,32], index: 3, kind: input, shape index: {}]   ;;  %s1479_s4 = inlined_call_operand.vmem [shape: bf16[128,128], index: 4, kind: input, shape index: {}]   ;;  %s1480_s5 = inlined_call_operand.vmem [shape: f32[1,128], index: 5, kind: input, shape index: {}]   ;;  %s1481_s6 = inlined_call_operand.vmem [shape: bf16[128,17], index: 6, kind: input, shape index: {}]   ;;  %s1482_s7 = inlined_call_operand.vmem [shape: f32[1,17], index: 7, kind: input, shape index: {}]   ;;  %s1483_s8 = inlined_call_operand.vmem [shape: f32[2,64,17], index: 8, kind: output, shape index: {}]  }
   0x1   :  { %s1328_s29 = smov 0  }
   0x2 LB: > { %s30_s30 = sadd.s32 1, %s1270_s28  ;;  %p1045_p0 = scmp.ge.s32.totalorder %s1274_s29, 1  ;;  %s1274_s29 = sphi %s1328_s29, %s18_s29   ;;  %s1270_s28 = sphi %s1326_s28, %s1485_s28   ;;  %s1266_s27 = sphi %s1324_s27, %s1484_s27  }
   0x3   : > { %p32_p1 = scmp.ge.s32.totalorder %s30_s30, 2  ;;  %p331_p2 = scmp.lt.s32.totalorder %s1274_s29, 3 }
   0x5   : > { %s1487_s30 = smov (%p32_p1, %s30_s30), 0  ;;  %p332_p3 = pnand %p1045_p0, %p331_p2 }
   0x6   : > { %p399_p4 = scmp.lt.s32.totalorder (!%p332_p3), %s1266_s27, 1  ;;  %v1204_v0 = vld [vmem:[%s1479_s4] sm:$0xff] (!%p332_p3)   ;;  %v1205_v1 = vld [vmem:[%s1479_s4 + $0x8] sm:$0xff] (!%p332_p3)   ;;  %v1206_v2 = vld [vmem:[%s1479_s4 + $0x10] sm:$0xff] (!%p332_p3)   ;;  %s1276_s21 = smov (!%p332_p3), 64   ;;  %vm496_vm0 = vcmask (!%p332_p3), 261120  }
   0x7   : > { %335 = sbr.rel (%p332_p3) target bundleno = 617 (0x269), region = 52  ;;  %1122 = vmatprep.subr.bf16.mxu0 (!%p332_p3), %v1204_v0  ;;  %v1207_v4 = vld [vmem:[%s1479_s4 + $0x18] sm:$0xff] (!%p332_p3)   ;;  %s1277_s12 = smov (!%p332_p3), 32   ;;  %v1208_v9 = vld [vmem:[%s1479_s4 + $0x20] sm:$0xff] (!%p332_p3)   ;;  %v1209_v11 = vld [vmem:[%s1479_s4 + $0x28] sm:$0xff] (!%p332_p3)   ;;  %vm517_vm1 = vcmask (!%p332_p3), 523264  }
   0x8   : > { %1123 = vmatpush3.bf16.msra.mxu0 (!%p332_p3), %v1204_v0  ;;  %v1212_v12 = vld [vmem:[%s1481_s6] sm:$0xff] (!%p332_p3)   ;;  %v1213_v13 = vld [vmem:[%s1481_s6 + $0x8] sm:$0xff] (!%p332_p3)   ;;  %v1210_v15 = vld [vmem:[%s1479_s4 + $0x30] sm:$0xff] (!%p332_p3)   ;;  %vm528_vm2 = vcmask (!%p332_p3), 785408   ;;  %vm894_vm3 = vcmask (!%p332_p3), 138240  }
   0x9   : > { %1124 = vmatprep.subr.bf16.mxu0 (!%p332_p3), %v1205_v1  ;;  %1146 = vmatprep.subr.bf16.mxu1 (!%p332_p3), %v1212_v12  ;;  %v1214_v16 = vld [vmem:[%s1481_s6 + $0x10] sm:$0xff] (!%p332_p3)   ;;  %v1211_v17 = vld [vmem:[%s1479_s4 + $0x38] sm:$0xff] (!%p332_p3)   ;;  %v1216_v19 = vld [vmem:[%s1481_s6 + $0x20] sm:$0xff] (!%p332_p3)  }
   0xa   : > { %1147 = vmatpush3.bf16.msra.mxu1 (!%p332_p3), %v1212_v12  ;;  %v1215_v18 = vld [vmem:[%s1481_s6 + $0x18] sm:$0xff] (!%p332_p3)   ;;  %v1217_v20 = vld [vmem:[%s1481_s6 + $0x28] sm:$0xff] (!%p332_p3)   ;;  %v1218_v0 = vld [vmem:[%s1481_s6 + $0x30] sm:$0xff] (!%p332_p3)  }
   0xb   : > { %1148 = vmatprep.subr.bf16.mxu1 (!%p332_p3), %v1213_v13 }
   0xc   : > { %1125 = vmatpush3.bf16.msra.mxu0 (!%p332_p3), %v1205_v1  ;;  %v1219_v1 = vld [vmem:[%s1481_s6 + $0x38] sm:$0xff] (!%p332_p3)  }
   0xd   : > { %1126 = vmatprep.subr.bf16.mxu0 (!%p332_p3), %v1206_v2 }
   0xe   : > { %s1489_s27 = smov (!%p399_p4, %s1266_s27), 1  ;;  %1149 = vmatpush3.bf16.msra.mxu1 %v1213_v13 }
   0xf   : > { %s1096_s13 = sshll.u32 %s1489_s27, 3  ;;  %s1095_s19 = sshll.u32 %s1489_s27, 4  ;;  %1150 = vmatprep.subr.bf16.mxu1 %v1214_v16 }
  0x10   : > { %s1357_s18 = scalar_lea.vmem %s1477_s2, %s1096_s13  ;;  %s1052_s20 = sshll.u32 %s1489_s27, 2  ;;  %1127 = vmatpush3.bf16.msra.mxu0 %v1206_v2  ;;  %v1062_v2 = vld [vmem:[%s1480_s5] ss:$0 sm:$0xff] }
  0x11   : > { %v1197_v3 = vld [vmem:[%s1357_s18] ss:$0 sps:$4 sm:$0xff]   ;;  %s416_s24 = scalar_lea.vmem %s1476_s1, %s1095_s19  ;;  %s434_s9 = scalar_lea.vmem %s1478_s3, %s1052_s20  ;;  %1128 = vmatprep.subr.bf16.mxu0 %v1207_v4  ;;  %v1203_v14 = vld [vmem:[%s1357_s18 + $0x4] ss:$0 sps:$4 sm:$0xff]  }
  0x12   : > { %487 = vrot.lane.b32.xlu1 %v1197_v3, %s1276_s21  ;;  %v1198_v5 = vld [vmem:[%s416_s24] ss:$0 sps:$4 sm:$0xff]   ;;  %v1200_v7 = vld [vmem:[%s416_s24 + $0x4] ss:$0 sps:$4 sm:$0xff]   ;;  %s1278_s13 = smov 96   ;;  %1151 = vmatpush3.bf16.msra.mxu1 %v1214_v16  ;;  %s1094_s16 = sshll.u32 %s1489_s27, 5 }
  0x13   : > { %v1199_v6 = vld [vmem:[%s434_s9] ss:$0 sps:$4 sm:$0xff]   ;;  %473 = vrot.lane.b32.xlu0 %v1198_v5, %s1277_s12  ;;  %v1202_v8 = vld [vmem:[%s416_s24 + $0xc] ss:$0 sps:$4 sm:$0xff]   ;;  %v1201_v10 = vld [vmem:[%s416_s24 + $0x8] ss:$0 sps:$4 sm:$0xff]   ;;  %1152 = vmatprep.subr.bf16.mxu1 %v1215_v18  ;;  %s1408_s20 = scalar_lea.vmem %s1475_s0, %s1094_s16 }
  0x14   : > { %1129 = vmatpush3.bf16.msra.mxu0 %v1207_v4  ;;  %v446_v22 = vld [vmem:[%s1408_s20] sm:$0xf]  ;;  %v447_v23 = vld [vmem:[%s1408_s20 + $0x4] sm:$0xf]  ;;  %v448_v28 = vld [vmem:[%s1408_s20 + $0x8] sm:$0xf] }
  0x15   : > { %1130 = vmatprep.subr.bf16.mxu0 %v1208_v9  ;;  %v449_v29 = vld [vmem:[%s1408_s20 + $0xc] sm:$0xf]  ;;  %v452_v43 = vld [vmem:[%s1408_s20 + $0x18] sm:$0xf]  ;;  %v453_v44 = vld [vmem:[%s1408_s20 + $0x1c] sm:$0xf] }
  0x16   : > { %494 = vrot.lane.b32.xlu1 %v1199_v6, %s1278_s13  ;;  %1153 = vmatpush3.bf16.msra.mxu1 %v1215_v18  ;;  %v450_v47 = vld [vmem:[%s1408_s20 + $0x10] sm:$0xf]  ;;  %v451_v48 = vld [vmem:[%s1408_s20 + $0x14] sm:$0xf]  ;;  %s1097_s11 = sshll.u32 %s1489_s27, 6 }
  0x17   : > { %475 = vrot.lane.b32.xlu0 %v1200_v7, %s1277_s12  ;;  %1154 = vmatprep.subr.bf16.mxu1 %v1216_v19  ;;  %s443_s14 = scalar_lea.vmem %s1483_s8, %s1097_s11 }
  0x18   : > { %1131 = vmatpush3.bf16.msra.mxu0 %v1208_v9 }
  0x19   : > { %1132 = vmatprep.subr.bf16.mxu0 %v1209_v11 }
  0x1a   : > { %479 = vrot.lane.b32.xlu1 %v1202_v8, %s1277_s12  ;;  %1155 = vmatpush3.bf16.msra.mxu1 %v1216_v19 }
  0x1b   : > { %477 = vrot.lane.b32.xlu0 %v1201_v10, %s1277_s12  ;;  %1156 = vmatprep.subr.bf16.mxu1 %v1217_v20 }
  0x1c   : > { %1133 = vmatpush3.bf16.msra.mxu0 %v1209_v11 }
  0x1d   : > { %1134 = vmatprep.subr.bf16.mxu0 %v1210_v15 }
  0x1e   : > { %1157 = vmatpush3.bf16.msra.mxu1 %v1217_v20 }
  0x1f   : > { %489 = vrot.lane.b32.xlu0 %v1203_v14, %s1276_s21  ;;  %1158 = vmatprep.subr.bf16.mxu1 %v1218_v0 }
  0x20   : > { %1135 = vmatpush3.bf16.msra.mxu0 %v1210_v15 }
  0x21   : > { %1136 = vmatprep.subr.bf16.mxu0 %v1211_v17 }
  0x22   : > { %1159 = vmatpush3.bf16.msra.mxu1 %v1218_v0 }
  0x23   : > { %1160 = vmatprep.subr.bf16.mxu1 %v1219_v1 }
  0x24   : > { %1137 = vmatpush3.bf16.msra.mxu0 %v1211_v17 }
  0x26   : > { %1161 = vmatpush3.bf16.msra.mxu1 %v1219_v1 }
  0x84   : > { %v488_v21 = vpop.permute.xlu1 %487 }
  0x85   : > { %v474_v24 = vpop.permute.xlu0 %473 }
  0x86   : > { %v499_v25 = vsel %vm496_vm0, %v446_v22, %v474_v24  ;;  %v501_v26 = vsel %vm496_vm0, %v447_v23, %v474_v24 }
  0x87   : > { %v519_v30 = vsel %vm517_vm1, %v499_v25, %v488_v21  ;;  %v520_v31 = vsel %vm517_vm1, %v501_v26, %v488_v21 }
  0x88   : > { %v495_v27 = vpop.permute.xlu1 %494 }
  0x89   : > { %v530_v32 = vsel %vm528_vm2, %v519_v30, %v495_v27  ;;  %v531_v33 = vsel %vm528_vm2, %v520_v31, %v495_v27  ;;  %v476_v34 = vpop.permute.xlu0 %475  ;;  %v1075_v31 = vld [vmem:[%s1482_s7] ss:$0 sm:$0xff] }
  0x8a   : > { %v1063_v35 = vcombine.low %v530_v32, %v531_v33  ;;  %v504_v36 = vsel %vm496_vm0, %v448_v28, %v476_v34  ;;  %v506_v37 = vsel %vm496_vm0, %v449_v29, %v476_v34 }
  0x8b   : > { %v521_v38 = vsel %vm517_vm1, %v504_v36, %v488_v21  ;;  %v522_v39 = vsel %vm517_vm1, %v506_v37, %v488_v21 }
  0x8c   : > { %1138 = vmatprep.mubr.bf16.mxu0 %v1063_v35  ;;  %v532_v40 = vsel %vm528_vm2, %v521_v38, %v495_v27  ;;  %v533_v41 = vsel %vm528_vm2, %v522_v39, %v495_v27  ;;  %v480_v42 = vpop.permute.xlu1 %479 }
  0x8d   : > { %v478_v45 = vpop.permute.xlu0 %477  ;;  %v1064_v46 = vcombine.low %v532_v40, %v533_v41  ;;  %v514_v49 = vsel %vm496_vm0, %v452_v43, %v480_v42  ;;  %v516_v50 = vsel %vm496_vm0, %v453_v44, %v480_v42 }
  0x8e   : > { %v509_v51 = vsel %vm496_vm0, %v450_v47, %v478_v45  ;;  %v511_v52 = vsel %vm496_vm0, %v451_v48, %v478_v45 }
  0x8f   : > { %1139 = vmatmul.mubr.bf16.vlgmr.msra.gmra.mrb[0].mxu0 %v1064_v46 }
  0x91   : > { %v490_v53 = vpop.permute.xlu0 %489 }
  0x92   : > { %v524_v54 = vsel %vm517_vm1, %v509_v51, %v490_v53  ;;  %v525_v55 = vsel %vm517_vm1, %v511_v52, %v490_v53  ;;  %v526_v56 = vsel %vm517_vm1, %v514_v49, %v490_v53  ;;  %v527_v57 = vsel %vm517_vm1, %v516_v50, %v490_v53 }
  0x93   : > { %v534_v58 = vsel %vm528_vm2, %v524_v54, %v495_v27  ;;  %v535_v59 = vsel %vm528_vm2, %v525_v55, %v495_v27  ;;  %v536_v60 = vsel %vm528_vm2, %v526_v56, %v495_v27  ;;  %v537_v61 = vsel %vm528_vm2, %v527_v57, %v495_v27 }
  0x94   : > { %v1065_v62 = vcombine.low %v534_v58, %v535_v59  ;;  %v1066_v63 = vcombine.low %v536_v60, %v537_v61 }
  0x96   : > { %1142 = vmatprep.mubr.bf16.mxu0 %v1065_v62 }
  0x97   : > { %1143 = vmatmul.mubr.bf16.gmra.mrb[4].mxu0 %v1066_v63 }
 0x162   : > { %v1140_v3 = vpop.f32.mrb[0].mxu0 }
 0x163   : > { %v676_v4 = vadd.f32 %v1140_v3, %v1062_v2  ;;  %v667_v5 = vpop.f32.mrb[1].mxu0 }
 0x164   : > { %v668_v6 = vadd.f32 %v1062_v2, %v667_v5  ;;  %v1141_v7 = vpop.f32.mrb[2].mxu0 }
 0x165   : > { %v679_v8 = vadd.f32 %v1141_v7, %v1062_v2  ;;  %v670_v9 = vpop.f32.mrb[3].mxu0  ;;  %v700_v11 = vmax.f32 %v676_v4, 0.0 }
 0x166   : > { %v671_v10 = vadd.f32 %v1062_v2, %v670_v9  ;;  %v698_v13 = vmax.f32 %v668_v6, 0.0 }
 0x167   : > { %v701_v12 = vmax.f32 %v679_v8, 0.0 }
 0x168   : > { %v699_v14 = vmax.f32 %v671_v10, 0.0 }
 0x169   : > { %v707_v15 = vpack.c.bf16 %v701_v12, %v700_v11 }
 0x16a   : > { %v1144_v16 = vpop.f32.mrb[4].mxu0  ;;  %v706_v17 = vpack.c.bf16 %v699_v14, %v698_v13 }
 0x16b   : > { %v692_v18 = vadd.f32 %v1144_v16, %v1062_v2  ;;  %v683_v19 = vpop.f32.mrb[5].mxu0 }
 0x16c   : > { %v684_v20 = vadd.f32 %v1062_v2, %v683_v19  ;;  %v1145_v21 = vpop.f32.mrb[6].mxu0  ;;  %1162 = vmatprep.mubr.bf16.mxu1 %v706_v17 }
 0x16d   : > { %v695_v22 = vadd.f32 %v1145_v21, %v1062_v2  ;;  %v686_v23 = vpop.f32.mrb[7].mxu0  ;;  %1163 = vmatmul.mubr.bf16.vlgmr.msra.gmra.mrb[0].mxu1 %v707_v15  ;;  %v704_v25 = vmax.f32 %v692_v18, 0.0 }
 0x16e   : > { %v687_v24 = vadd.f32 %v1062_v2, %v686_v23  ;;  %v702_v27 = vmax.f32 %v684_v20, 0.0 }
 0x16f   : > { %v705_v26 = vmax.f32 %v695_v22, 0.0 }
 0x170   : > { %v703_v28 = vmax.f32 %v687_v24, 0.0 }
 0x171   : > { %v709_v29 = vpack.c.bf16 %v705_v26, %v704_v25 }
 0x172   : > { %v708_v30 = vpack.c.bf16 %v703_v28, %v702_v27 }
 0x174   : > { %1166 = vmatprep.mubr.bf16.mxu1 %v708_v30 }
 0x175   : > { %1167 = vmatmul.mubr.bf16.gmra.mrb[4].mxu1 %v709_v29 }
 0x240   : > { %v1164_v32 = vpop.f32.mrb[0].mxu1 }
 0x241   : > { %v824_v33 = vadd.f32 %v1164_v32, %v1075_v31  ;;  %v815_v34 = vpop.f32.mrb[1].mxu1 }
 0x242   : > { %v816_v35 = vadd.f32 %v1075_v31, %v815_v34  ;;  %v1165_v36 = vpop.f32.mrb[2].mxu1 }
 0x243   : > { %v1086_v37 = vmul.f32 -1.442695, %v824_v33  ;;  %v827_v38 = vadd.f32 %v1165_v36, %v1075_v31  ;;  %v818_v39 = vpop.f32.mrb[3].mxu1 }
 0x244   : > { %v1084_v40 = vmul.f32 -1.442695, %v816_v35  ;;  %v819_v41 = vadd.f32 %v1075_v31, %v818_v39 }
 0x245   : > { %1220 = vpow2.f32 %v1086_v37  ;;  %v1087_v42 = vmul.f32 -1.442695, %v827_v38 }
 0x246   : > { %1222 = vpow2.f32 %v1084_v40  ;;  %v1085_v43 = vmul.f32 -1.442695, %v819_v41 }
 0x247   : > { %1224 = vpow2.f32 %v1087_v42 }
 0x248   : > { %1226 = vpow2.f32 %v1085_v43  ;;  %v1168_v44 = vpop.f32.mrb[4].mxu1 }
 0x249   : > { %v840_v45 = vadd.f32 %v1168_v44, %v1075_v31  ;;  %v831_v46 = vpop.f32.mrb[5].mxu1 }
 0x24a   : > { %v832_v47 = vadd.f32 %v1075_v31, %v831_v46  ;;  %v1169_v48 = vpop.f32.mrb[6].mxu1 }
 0x24b   : > { %v1090_v49 = vmul.f32 -1.442695, %v840_v45  ;;  %v843_v50 = vadd.f32 %v1169_v48, %v1075_v31  ;;  %v834_v51 = vpop.f32.mrb[7].mxu1 }
 0x24c   : > { %v1088_v52 = vmul.f32 -1.442695, %v832_v47  ;;  %v835_v53 = vadd.f32 %v1075_v31, %v834_v51 }
 0x24d   : > { %1228 = vpow2.f32 %v1090_v49  ;;  %v1091_v54 = vmul.f32 -1.442695, %v843_v50 }
 0x24e   : > { %1230 = vpow2.f32 %v1088_v52  ;;  %v1089_v55 = vmul.f32 -1.442695, %v835_v53 }
 0x24f   : > { %v1221_v56 = vpop.eup %1220  ;;  %1232 = vpow2.f32 %v1091_v54 }
 0x250   : > { %v1223_v57 = vpop.eup %1222  ;;  %v872_v58 = vadd.f32 1.0, %v1221_v56  ;;  %1234 = vpow2.f32 %v1089_v55 }
 0x251   : > { %v1225_v59 = vpop.eup %1224  ;;  %v870_v60 = vadd.f32 1.0, %v1223_v57 }
 0x252   : > { %v1227_v61 = vpop.eup %1226  ;;  %1236 = vrcp.f32 %v872_v58  ;;  %v873_v62 = vadd.f32 1.0, %v1225_v59 }
 0x253   : > { %1238 = vrcp.f32 %v870_v60  ;;  %v871_v63 = vadd.f32 1.0, %v1227_v61 }
 0x254   : > { %1240 = vrcp.f32 %v873_v62 }
 0x255   : > { %1242 = vrcp.f32 %v871_v63 }
 0x257   : > { %v1229_v0 = vpop.eup %1228 }
 0x258   : > { %v1231_v1 = vpop.eup %1230  ;;  %v876_v2 = vadd.f32 1.0, %v1229_v0 }
 0x259   : > { %v1233_v3 = vpop.eup %1232  ;;  %v874_v4 = vadd.f32 1.0, %v1231_v1 }
 0x25a   : > { %v1235_v5 = vpop.eup %1234  ;;  %1244 = vrcp.f32 %v876_v2  ;;  %v877_v6 = vadd.f32 1.0, %v1233_v3 }
 0x25b   : > { %1246 = vrcp.f32 %v874_v4  ;;  %v875_v7 = vadd.f32 1.0, %v1235_v5 }
 0x25c   : > { %v1237_v8 = vpop.eup %1236  ;;  %1248 = vrcp.f32 %v877_v6 }
 0x25d   : > { %v1239_v9 = vpop.eup %1238  ;;  %897 = vst.msk [vmem:[%s443_s14 + $0x10] sm:$0xff] %vm894_vm3, %v1237_v8  ;;  %1250 = vrcp.f32 %v875_v7 }
 0x25e   : > { %v1241_v10 = vpop.eup %1240  ;;  %895 = vst.msk [vmem:[%s443_s14] sm:$0xff] %vm894_vm3, %v1239_v9 }
 0x25f   : > { %v1243_v11 = vpop.eup %1242  ;;  %898 = vst.msk [vmem:[%s443_s14 + $0x18] sm:$0xff] %vm894_vm3, %v1241_v10 }
 0x260   : > { %896 = vst.msk [vmem:[%s443_s14 + $0x8] sm:$0xff] %vm894_vm3, %v1243_v11 }
 0x264   : > { %v1245_v12 = vpop.eup %1244 }
 0x265   : > { %v1247_v13 = vpop.eup %1246  ;;  %901 = vst.msk [vmem:[%s443_s14 + $0x30] sm:$0xff] %vm894_vm3, %v1245_v12 }
 0x266   : > { %v1249_v14 = vpop.eup %1248  ;;  %899 = vst.msk [vmem:[%s443_s14 + $0x20] sm:$0xff] %vm894_vm3, %v1247_v13 }
 0x267   : > { %v1251_v15 = vpop.eup %1250  ;;  %902 = vst.msk [vmem:[%s443_s14 + $0x38] sm:$0xff] %vm894_vm3, %v1249_v14 }
 0x268   : > { %900 = vst.msk [vmem:[%s443_s14 + $0x28] sm:$0xff] %vm894_vm3, %v1251_v15 }
 0x269 PF: > { %s18_s29 = sadd.s32 1, %s1274_s29   ;;  %s1484_s27 = smov %s1270_s28 }
 0x26a   : > { %p15_p5 = scmp.ge.s32.totalorder %s18_s29, 4   ;;  %s1485_s28 = smov %s1487_s30 }
 0x26c   :  { %17 = sbr.rel (!%p15_p5) target bundleno = 2 (0x2), region = 91 }

</bundles_post_ra>
